<compile_context>
chip_gen: v7x
topology: tpu7x:2x2x1
jax: 0.10.0
libtpu: 0.0.40
codegen_flags: <defaults>
</compile_context>

<pallas_src>
import numpy as np
import jax
import jax.numpy as jnp
from jax.experimental import pallas as pl
from jax.experimental.pallas import tpu as pltpu

# ---- module config (ResidualCouplingBlock.__init__ arguments, small sizes) ----
CHANNELS = 4          # must be even (coupling splits channels in half)
HIDDEN = 32           # hidden_channels
KERNEL_SIZE = 3
DILATION_RATE = 1
N_LAYERS = 3
N_FLOWS = 4
GIN_CHANNELS = 0      # g=None path
HALF = CHANNELS // 2


# ----------------------------- Pallas kernel -----------------------------------
def _block_kernel(x_ref, mask_ref, tapmask_ref,
                  pre_w_ref, pre_b_ref, in_w_ref, in_b_ref,
                  rs_w_ref, rs_b_ref, post_w_ref, post_b_ref,
                  out_ref):
    """All N_FLOWS ResidualCouplingLayers (+ folded Flips) in one invocation.

    x_ref      : (CHANNELS, L)                 batch packed into lanes, L % 128 == 0
    mask_ref   : (1, L)                        valid-length mask in packed layout
    tapmask_ref: (N_LAYERS, KERNEL_SIZE, 1, L) per-tap source-validity masks
    weights    : stacked over flows along a leading N_FLOWS axis
    """
    L = x_ref.shape[-1]
    mask = mask_ref[...]                      # (1, L)
    x = x_ref[...]                            # (CHANNELS, L)
    xa = x[:HALF]                             # first channel half
    xb = x[HALF:]                             # second channel half

    for f in range(N_FLOWS):                  # static unroll: weights kept VMEM-resident
        # Flip folded into weights: even flows condition on xa and transform xb;
        # odd flows (conjugated P L_f P) condition on xb and transform xa.
        cond, upd = (xa, xb) if f % 2 == 0 else (xb, xa)

        # pre 1x1 conv == channel matmul on the MXU
        h = (jnp.dot(pre_w_ref[f], cond, preferred_element_type=jnp.float32)
             + pre_b_ref[f]) * mask                                   # (HIDDEN, L)

        # WaveNet (WN) stack
        skip = jnp.zeros((HIDDEN, L), jnp.float32)
        for i in range(N_LAYERS):
            dil = DILATION_RATE ** i
            pad = (KERNEL_SIZE * dil - dil) // 2
            taps = []
            for j in range(KERNEL_SIZE):
                d = j * dil - pad            # this tap reads h[:, t + d]
                hj = h if d == 0 else pltpu.roll(h, shift=(-d) % L, axis=1)
                taps.append(hj * tapmask_ref[i, j])                   # zero invalid srcs
            h_stack = jnp.concatenate(taps, axis=0)        # (KERNEL_SIZE*HIDDEN, L)
            # fused dilated conv: one MXU call over all taps, bias added once
            x_in = (jnp.dot(in_w_ref[f, i], h_stack,
                            preferred_element_type=jnp.float32)
                    + in_b_ref[f, i])                                 # (2*HIDDEN, L)
            # fused_add_tanh_sigmoid_multiply with g = None (g_l == 0)
            acts = jnp.tanh(x_in[:HIDDEN]) * jax.nn.sigmoid(x_in[HIDDEN:])
            # res/skip 1x1 conv (last layer's skip-only weights are packed into
            # rows [HIDDEN:]; its unused residual rows are zero)
            rsa = (jnp.dot(rs_w_ref[f, i], acts,
                           preferred_element_type=jnp.float32)
                   + rs_b_ref[f, i])                                  # (2*HIDDEN, L)
            if i < N_LAYERS - 1:
                h = (h + rsa[:HIDDEN]) * mask
            skip = skip + rsa[HIDDEN:]
        skip = skip * mask

        # post 1x1 conv; mean_only=True -> m = stats, logs = 0 (exp(logs) == 1)
        m = (jnp.dot(post_w_ref[f], skip, preferred_element_type=jnp.float32)
             + post_b_ref[f]) * mask                                  # (HALF, L)
        new_half = m + upd * mask

        if f % 2 == 0:
            xb = new_half
        else:
            xa = new_half

    # single dense full-block store (one concat per call, unmasked wide store)
    out_ref[...] = jnp.concatenate([xa, xb], axis=0)


# ------------------------------- wrapper ----------------------------------------
def _make_tap_masks(B, T, L):
    """(N_LAYERS, KERNEL_SIZE, 1, L): validity of each conv tap's *source* lane.

    Zero where the tap would cross a packed batch-element boundary, read the lane
    padding beyond B*T, or fall in the conv 'same' zero-padding region.
    """
    lane = np.arange(L)
    in_data = lane < B * T
    t_in_b = lane % T
    m = np.zeros((N_LAYERS, KERNEL_SIZE, 1, L), np.float32)
    for i in range(N_LAYERS):
        dil = DILATION_RATE ** i
        pad = (KERNEL_SIZE * dil - dil) // 2
        for j in range(KERNEL_SIZE):
            d = j * dil - pad
            src = t_in_b + d
            m[i, j, 0] = (in_data & (src >= 0) & (src < T)).astype(np.float32)
    return jnp.asarray(m)


def _full_spec(arr):
    nd = arr.ndim
    return pl.BlockSpec(arr.shape, lambda i, _nd=nd: (0,) * _nd)


def residual_coupling_block_forward(x, x_mask, packed):
    """reverse=False path of ResidualCouplingBlock: a single fused pallas_call."""
    B, C, T = x.shape
    BT = B * T
    L = max(128, ((BT + 127) // 128) * 128)        # lane-dense padded width

    # pack batch into the lane axis: (B, C, T) -> (C, B*T) -> zero-pad to (C, L)
    xp = jnp.transpose(x, (1, 0, 2)).reshape(C, BT)
    mp = jnp.transpose(x_mask, (1, 0, 2)).reshape(1, BT)
    xp = jnp.pad(xp, ((0, 0), (0, L - BT)))
    mp = jnp.pad(mp, ((0, 0), (0, L - BT)))
    tap_masks = _make_tap_masks(B, T, L)

    operands = (xp, mp, tap_masks,
                packed['pre_w'], packed['pre_b'],
                packed['in_w'], packed['in_b'],
                packed['rs_w'], packed['rs_b'],
                packed['post_w'], packed['post_b'])

    out = pl.pallas_call(
        _block_kernel,
        out_shape=jax.ShapeDtypeStruct((C, L), jnp.float32),
        grid=(1,),
        in_specs=[_full_spec(a) for a in operands],
        out_specs=pl.BlockSpec((C, L), lambda i: (0, 0)),
        compiler_params=pltpu.CompilerParams(
            dimension_semantics=("arbitrary",)),
    )(*operands)

    out = jnp.transpose(out[:, :BT].reshape(C, B, T), (1, 0, 2))   # unpack lanes
    if N_FLOWS % 2 == 1:          # odd flow count leaves one unfolded trailing Flip
        out = out[:, ::-1, :]
    return out


# ------------------------- deterministic parameter init ------------------------
def init_params(key):
    """Per-flow params in the 'reference' (PyTorch-like) layout."""
    flow_params = []
    for f in range(N_FLOWS):
        keys = jax.random.split(jax.random.fold_in(key, f), 8)
        s = 0.1
        pre_w = s * jax.random.normal(keys[0], (HIDDEN, HALF), jnp.float32)
        pre_b = s * jax.random.normal(keys[1], (HIDDEN, 1), jnp.float32)
        # in_layers (dilated convs), weights as (layer, tap, out, in)
        in_w = s * jax.random.normal(
            keys[2], (N_LAYERS, KERNEL_SIZE, 2 * HIDDEN, HIDDEN), jnp.float32)
        in_b = s * jax.random.normal(keys[3], (N_LAYERS, 2 * HIDDEN, 1), jnp.float32)
        # res_skip_layers: the last layer really has only HIDDEN (skip) outputs;
        # pack those into rows [HIDDEN:2*HIDDEN] and zero the unused residual half.
        rs_w = s * jax.random.normal(keys[4], (N_LAYERS, 2 * HIDDEN, HIDDEN), jnp.float32)
        rs_b = s * jax.random.normal(keys[5], (N_LAYERS, 2 * HIDDEN, 1), jnp.float32)
        rs_w = rs_w.at[N_LAYERS - 1, :HIDDEN].set(0.0)
        rs_b = rs_b.at[N_LAYERS - 1, :HIDDEN].set(0.0)
        # NOTE: the real module zero-initializes post.weight/bias; small random values
        # keep the kernel doing non-trivial work (still deterministic).
        post_w = s * jax.random.normal(keys[6], (HALF, HIDDEN), jnp.float32)
        post_b = s * jax.random.normal(keys[7], (HALF, 1), jnp.float32)
        flow_params.append(dict(pre_w=pre_w, pre_b=pre_b, in_w=in_w, in_b=in_b,
                                rs_w=rs_w, rs_b=rs_b, post_w=post_w, post_b=post_b))
    return flow_params


def pack_params(flow_params):
    """Stack per-flow weights, fold the Flip into odd flows, fuse conv taps."""
    pre_w, pre_b, in_w, in_b, rs_w, rs_b, post_w, post_b = ([] for _ in range(8))
    for f, p in enumerate(flow_params):
        pw, pow_, pob = p['pre_w'], p['post_w'], p['post_b']
        if f % 2 == 1:
            # conjugation P L_f P: reverse pre-conv input channels and
            # post-conv output channels/bias (halves are swapped in-kernel).
            pw = pw[:, ::-1]
            pow_ = pow_[::-1, :]
            pob = pob[::-1, :]
        # fuse conv taps along the input dim:
        # (n_layers, K, 2H, H) -> (n_layers, 2H, K*H), column block j == tap j
        iw = jnp.transpose(p['in_w'], (0, 2, 1, 3)).reshape(
            N_LAYERS, 2 * HIDDEN, KERNEL_SIZE * HIDDEN)
        pre_w.append(pw); pre_b.append(p['pre_b'])
        in_w.append(iw); in_b.append(p['in_b'])
        rs_w.append(p['rs_w']); rs_b.append(p['rs_b'])
        post_w.append(pow_); post_b.append(pob)
    stk = lambda xs: jnp.stack(xs, axis=0)
    return dict(pre_w=stk(pre_w), pre_b=stk(pre_b), in_w=stk(in_w), in_b=stk(in_b),
                rs_w=stk(rs_w), rs_b=stk(rs_b), post_w=stk(post_w), post_b=stk(post_b))


# ------------------------------ pure-JAX reference ------------------------------
def _ref_coupling_layer(x, mask, p):
    B, _, T = x.shape
    x0, x1 = x[:, :HALF], x[:, HALF:]
    h = (jnp.einsum('oc,bct->bot', p['pre_w'], x0) + p['pre_b'][None]) * mask
    output = jnp.zeros((B, HIDDEN, T), jnp.float32)
    for i in range(N_LAYERS):
        dil = DILATION_RATE ** i
        pad = (KERNEL_SIZE * dil - dil) // 2
        h_pad = jnp.pad(h, ((0, 0), (0, 0), (pad, pad)))
        x_in = jnp.broadcast_to(p['in_b'][i][None], (B, 2 * HIDDEN, T))
        for j in range(KERNEL_SIZE):
            x_in = x_in + jnp.einsum('oc,bct->bot', p['in_w'][i, j],
                                     h_pad[:, :, j * dil: j * dil + T])
        acts = jnp.tanh(x_in[:, :HIDDEN]) * jax.nn.sigmoid(x_in[:, HIDDEN:])
        rsa = jnp.einsum('oc,bct->bot', p['rs_w'][i], acts) + p['rs_b'][i][None]
        if i < N_LAYERS - 1:
            h = (h + rsa[:, :HIDDEN]) * mask
        output = output + rsa[:, HIDDEN:]
    output = output * mask
    m = (jnp.einsum('oc,bct->bot', p['post_w'], output) + p['post_b'][None]) * mask
    return jnp.concatenate([x0, m + x1 * mask], axis=1)


def _ref_block(x, mask, flow_params):
    for p in flow_params:
        x = _ref_coupling_layer(x, mask, p)   # ResidualCouplingLayer
        x = x[:, ::-1, :]                     # Flip
    return x


# ------------------------------------ main ---------------------------------------
if __name__ == "__main__":
    key = jax.random.PRNGKey(0)
    k_x, k_p = jax.random.split(key)

    B, T = 2, 16
    x = jax.random.normal(k_x, (B, CHANNELS, T), jnp.float32)
    lengths = jnp.array([16, 12])
    x_mask = (jnp.arange(T)[None, None, :] < lengths[:, None, None]).astype(jnp.float32)

    flow_params = init_params(k_p)
    packed = pack_params(flow_params)

    fwd = jax.jit(residual_coupling_block_forward)
    out = jax.block_until_ready(fwd(x, x_mask, packed))

    ref = _ref_block(x, x_mask, flow_params)
    assert out.shape == (B, CHANNELS, T)
    max_err = float(jnp.max(jnp.abs(out - ref)))
    assert jnp.allclose(out, ref, atol=5e-4, rtol=5e-4), f"max_err={max_err}"

    print("KERNEL_OK")
</pallas_src>

<mosaic_0001>
module attributes {stable_mosaic.version = 11 : i64} {
  func.func @_block_kernel(%arg0: i32, %arg1: memref<4x128xf32, #tpu.memory_space<vmem>>, %arg2: memref<1x128xf32, #tpu.memory_space<vmem>>, %arg3: memref<3x3x1x128xf32, #tpu.memory_space<vmem>>, %arg4: memref<4x32x2xf32, #tpu.memory_space<vmem>>, %arg5: memref<4x32x1xf32, #tpu.memory_space<vmem>>, %arg6: memref<4x3x64x96xf32, #tpu.memory_space<vmem>>, %arg7: memref<4x3x64x1xf32, #tpu.memory_space<vmem>>, %arg8: memref<4x3x64x32xf32, #tpu.memory_space<vmem>>, %arg9: memref<4x3x64x1xf32, #tpu.memory_space<vmem>>, %arg10: memref<4x2x32xf32, #tpu.memory_space<vmem>>, %arg11: memref<4x2x1xf32, #tpu.memory_space<vmem>>, %arg12: memref<4x128xf32, #tpu.memory_space<vmem>>) attributes {dimension_semantics = [#tpu.dimension_semantics<arbitrary>], iteration_bounds = array<i64: 1>, scalar_prefetch = 0 : i64, scratch_operands = 0 : i64, tpu.core_type = #tpu.core_type<tc>, window_params = [{pipeline_mode = #tpu.pipeline_mode<synchronous>, transform_indices = @transform_0, window_bounds = array<i64: 4, 128>}, {pipeline_mode = #tpu.pipeline_mode<synchronous>, transform_indices = @transform_1, window_bounds = array<i64: 1, 128>}, {pipeline_mode = #tpu.pipeline_mode<synchronous>, transform_indices = @transform_2, window_bounds = array<i64: 3, 3, 1, 128>}, {pipeline_mode = #tpu.pipeline_mode<synchronous>, transform_indices = @transform_3, window_bounds = array<i64: 4, 32, 2>}, {pipeline_mode = #tpu.pipeline_mode<synchronous>, transform_indices = @transform_4, window_bounds = array<i64: 4, 32, 1>}, {pipeline_mode = #tpu.pipeline_mode<synchronous>, transform_indices = @transform_5, window_bounds = array<i64: 4, 3, 64, 96>}, {pipeline_mode = #tpu.pipeline_mode<synchronous>, transform_indices = @transform_6, window_bounds = array<i64: 4, 3, 64, 1>}, {pipeline_mode = #tpu.pipeline_mode<synchronous>, transform_indices = @transform_7, window_bounds = array<i64: 4, 3, 64, 32>}, {pipeline_mode = #tpu.pipeline_mode<synchronous>, transform_indices = @transform_8, window_bounds = array<i64: 4, 3, 64, 1>}, {pipeline_mode = #tpu.pipeline_mode<synchronous>, transform_indices = @transform_9, window_bounds = array<i64: 4, 2, 32>}, {pipeline_mode = #tpu.pipeline_mode<synchronous>, transform_indices = @transform_10, window_bounds = array<i64: 4, 2, 1>}, {pipeline_mode = #tpu.pipeline_mode<synchronous>, transform_indices = @transform_11, window_bounds = array<i64: 4, 128>}]} {
    %c0 = arith.constant 0 : index
    %c0_0 = arith.constant 0 : index
    %0 = vector.load %arg2[%c0, %c0_0] : memref<1x128xf32, #tpu.memory_space<vmem>>, vector<1x128xf32>
    %c0_1 = arith.constant 0 : index
    %c0_2 = arith.constant 0 : index
    %1 = vector.load %arg1[%c0_1, %c0_2] : memref<4x128xf32, #tpu.memory_space<vmem>>, vector<4x128xf32>
    %2 = vector.extract_strided_slice %1 {offsets = [0, 0], sizes = [2, 128], strides = [1, 1]} : vector<4x128xf32> to vector<2x128xf32>
    %3 = vector.extract_strided_slice %1 {offsets = [2, 0], sizes = [2, 128], strides = [1, 1]} : vector<4x128xf32> to vector<2x128xf32>
    %c0_3 = arith.constant 0 : index
    %c0_4 = arith.constant 0 : index
    %c0_5 = arith.constant 0 : index
    %4 = vector.load %arg4[%c0_3, %c0_4, %c0_5] : memref<4x32x2xf32, #tpu.memory_space<vmem>>, vector<1x32x2xf32>
    %5 = vector.shape_cast %4 : vector<1x32x2xf32> to vector<32x2xf32>
    %cst = arith.constant dense<0.000000e+00> : vector<32x128xf32>
    %6 = tpu.matmul %5, %2, %cst {dimension_numbers = #tpu.dot_dimension_numbers<[1], [0], [0], [1], [0, 0, 1, 1], [], []>} : vector<32x2xf32>, vector<2x128xf32>, vector<32x128xf32> -> vector<32x128xf32>
    %c0_6 = arith.constant 0 : index
    %c0_7 = arith.constant 0 : index
    %c0_8 = arith.constant 0 : index
    %7 = vector.load %arg5[%c0_6, %c0_7, %c0_8] : memref<4x32x1xf32, #tpu.memory_space<vmem>>, vector<1x32x1xf32>
    %8 = vector.shape_cast %7 : vector<1x32x1xf32> to vector<32x1xf32>
    %9 = vector.broadcast %8 : vector<32x1xf32> to vector<32x128xf32>
    %10 = arith.addf %6, %9 : vector<32x128xf32>
    %11 = vector.broadcast %0 : vector<1x128xf32> to vector<32x128xf32>
    %12 = arith.mulf %10, %11 : vector<32x128xf32>
    %cst_9 = arith.constant 0.000000e+00 : f32
    %13 = vector.broadcast %cst_9 : f32 to vector<32x128xf32>
    %c1_i32 = arith.constant 1 : i32
    %14 = tpu.dynamic_rotate %12 by %c1_i32 dim 1 : vector<32x128xf32>, i32 -> vector<32x128xf32>
    %c0_10 = arith.constant 0 : index
    %c0_11 = arith.constant 0 : index
    %c0_12 = arith.constant 0 : index
    %c0_13 = arith.constant 0 : index
    %15 = vector.load %arg3[%c0_10, %c0_11, %c0_12, %c0_13] : memref<3x3x1x128xf32, #tpu.memory_space<vmem>>, vector<1x1x1x128xf32>
    %16 = vector.shape_cast %15 : vector<1x1x1x128xf32> to vector<1x128xf32>
    %17 = vector.broadcast %16 : vector<1x128xf32> to vector<32x128xf32>
    %18 = arith.mulf %14, %17 : vector<32x128xf32>
    %c0_14 = arith.constant 0 : index
    %c1 = arith.constant 1 : index
    %c0_15 = arith.constant 0 : index
    %c0_16 = arith.constant 0 : index
    %19 = vector.load %arg3[%c0_14, %c1, %c0_15, %c0_16] : memref<3x3x1x128xf32, #tpu.memory_space<vmem>>, vector<1x1x1x128xf32>
    %20 = vector.shape_cast %19 : vector<1x1x1x128xf32> to vector<1x128xf32>
    %21 = vector.broadcast %20 : vector<1x128xf32> to vector<32x128xf32>
    %22 = arith.mulf %12, %21 : vector<32x128xf32>
    %c127_i32 = arith.constant 127 : i32
    %23 = tpu.dynamic_rotate %12 by %c127_i32 dim 1 : vector<32x128xf32>, i32 -> vector<32x128xf32>
    %c0_17 = arith.constant 0 : index
    %c2 = arith.constant 2 : index
    %c0_18 = arith.constant 0 : index
    %c0_19 = arith.constant 0 : index
    %24 = vector.load %arg3[%c0_17, %c2, %c0_18, %c0_19] : memref<3x3x1x128xf32, #tpu.memory_space<vmem>>, vector<1x1x1x128xf32>
    %25 = vector.shape_cast %24 : vector<1x1x1x128xf32> to vector<1x128xf32>
    %26 = vector.broadcast %25 : vector<1x128xf32> to vector<32x128xf32>
    %27 = arith.mulf %23, %26 : vector<32x128xf32>
    %28 = tpu.concatenate %18, %22, %27 in 0 : vector<32x128xf32>, vector<32x128xf32>, vector<32x128xf32> -> vector<96x128xf32>
    %c0_20 = arith.constant 0 : index
    %c0_21 = arith.constant 0 : index
    %c0_22 = arith.constant 0 : index
    %c0_23 = arith.constant 0 : index
    %29 = vector.load %arg6[%c0_20, %c0_21, %c0_22, %c0_23] : memref<4x3x64x96xf32, #tpu.memory_space<vmem>>, vector<1x1x64x96xf32>
    %30 = vector.shape_cast %29 : vector<1x1x64x96xf32> to vector<64x96xf32>
    %cst_24 = arith.constant dense<0.000000e+00> : vector<64x128xf32>
    %31 = tpu.matmul %30, %28, %cst_24 {dimension_numbers = #tpu.dot_dimension_numbers<[1], [0], [0], [1], [0, 0, 1, 1], [], []>} : vector<64x96xf32>, vector<96x128xf32>, vector<64x128xf32> -> vector<64x128xf32>
    %c0_25 = arith.constant 0 : index
    %c0_26 = arith.constant 0 : index
    %c0_27 = arith.constant 0 : index
    %c0_28 = arith.constant 0 : index
    %32 = vector.load %arg7[%c0_25, %c0_26, %c0_27, %c0_28] : memref<4x3x64x1xf32, #tpu.memory_space<vmem>>, vector<1x1x64x1xf32>
    %33 = vector.shape_cast %32 : vector<1x1x64x1xf32> to vector<64x1xf32>
    %34 = vector.broadcast %33 : vector<64x1xf32> to vector<64x128xf32>
    %35 = arith.addf %31, %34 : vector<64x128xf32>
    %36 = vector.extract_strided_slice %35 {offsets = [0, 0], sizes = [32, 128], strides = [1, 1]} : vector<64x128xf32> to vector<32x128xf32>
    %37 = math.tanh %36 : vector<32x128xf32>
    %38 = vector.extract_strided_slice %35 {offsets = [32, 0], sizes = [32, 128], strides = [1, 1]} : vector<64x128xf32> to vector<32x128xf32>
    %39 = arith.negf %38 : vector<32x128xf32>
    %40 = math.exp %39 : vector<32x128xf32>
    %cst_29 = arith.constant 1.000000e+00 : f32
    %41 = vector.broadcast %cst_29 : f32 to vector<32x128xf32>
    %42 = arith.addf %41, %40 : vector<32x128xf32>
    %43 = arith.divf %41, %42 : vector<32x128xf32>
    %44 = arith.mulf %37, %43 : vector<32x128xf32>
    %c0_30 = arith.constant 0 : index
    %c0_31 = arith.constant 0 : index
    %c0_32 = arith.constant 0 : index
    %c0_33 = arith.constant 0 : index
    %45 = vector.load %arg8[%c0_30, %c0_31, %c0_32, %c0_33] : memref<4x3x64x32xf32, #tpu.memory_space<vmem>>, vector<1x1x64x32xf32>
    %46 = vector.shape_cast %45 : vector<1x1x64x32xf32> to vector<64x32xf32>
    %cst_34 = arith.constant dense<0.000000e+00> : vector<64x128xf32>
    %47 = tpu.matmul %46, %44, %cst_34 {dimension_numbers = #tpu.dot_dimension_numbers<[1], [0], [0], [1], [0, 0, 1, 1], [], []>} : vector<64x32xf32>, vector<32x128xf32>, vector<64x128xf32> -> vector<64x128xf32>
    %c0_35 = arith.constant 0 : index
    %c0_36 = arith.constant 0 : index
    %c0_37 = arith.constant 0 : index
    %c0_38 = arith.constant 0 : index
    %48 = vector.load %arg9[%c0_35, %c0_36, %c0_37, %c0_38] : memref<4x3x64x1xf32, #tpu.memory_space<vmem>>, vector<1x1x64x1xf32>
    %49 = vector.shape_cast %48 : vector<1x1x64x1xf32> to vector<64x1xf32>
    %50 = vector.broadcast %49 : vector<64x1xf32> to vector<64x128xf32>
    %51 = arith.addf %47, %50 : vector<64x128xf32>
    %52 = vector.extract_strided_slice %51 {offsets = [0, 0], sizes = [32, 128], strides = [1, 1]} : vector<64x128xf32> to vector<32x128xf32>
    %53 = arith.addf %12, %52 : vector<32x128xf32>
    %54 = vector.broadcast %0 : vector<1x128xf32> to vector<32x128xf32>
    %55 = arith.mulf %53, %54 : vector<32x128xf32>
    %56 = vector.extract_strided_slice %51 {offsets = [32, 0], sizes = [32, 128], strides = [1, 1]} : vector<64x128xf32> to vector<32x128xf32>
    %57 = arith.addf %13, %56 : vector<32x128xf32>
    %c1_i32_39 = arith.constant 1 : i32
    %58 = tpu.dynamic_rotate %55 by %c1_i32_39 dim 1 : vector<32x128xf32>, i32 -> vector<32x128xf32>
    %c1_40 = arith.constant 1 : index
    %c0_41 = arith.constant 0 : index
    %c0_42 = arith.constant 0 : index
    %c0_43 = arith.constant 0 : index
    %59 = vector.load %arg3[%c1_40, %c0_41, %c0_42, %c0_43] : memref<3x3x1x128xf32, #tpu.memory_space<vmem>>, vector<1x1x1x128xf32>
    %60 = vector.shape_cast %59 : vector<1x1x1x128xf32> to vector<1x128xf32>
    %61 = vector.broadcast %60 : vector<1x128xf32> to vector<32x128xf32>
    %62 = arith.mulf %58, %61 : vector<32x128xf32>
    %c1_44 = arith.constant 1 : index
    %c1_45 = arith.constant 1 : index
    %c0_46 = arith.constant 0 : index
    %c0_47 = arith.constant 0 : index
    %63 = vector.load %arg3[%c1_44, %c1_45, %c0_46, %c0_47] : memref<3x3x1x128xf32, #tpu.memory_space<vmem>>, vector<1x1x1x128xf32>
    %64 = vector.shape_cast %63 : vector<1x1x1x128xf32> to vector<1x128xf32>
    %65 = vector.broadcast %64 : vector<1x128xf32> to vector<32x128xf32>
    %66 = arith.mulf %55, %65 : vector<32x128xf32>
    %c127_i32_48 = arith.constant 127 : i32
    %67 = tpu.dynamic_rotate %55 by %c127_i32_48 dim 1 : vector<32x128xf32>, i32 -> vector<32x128xf32>
    %c1_49 = arith.constant 1 : index
    %c2_50 = arith.constant 2 : index
    %c0_51 = arith.constant 0 : index
    %c0_52 = arith.constant 0 : index
    %68 = vector.load %arg3[%c1_49, %c2_50, %c0_51, %c0_52] : memref<3x3x1x128xf32, #tpu.memory_space<vmem>>, vector<1x1x1x128xf32>
    %69 = vector.shape_cast %68 : vector<1x1x1x128xf32> to vector<1x128xf32>
    %70 = vector.broadcast %69 : vector<1x128xf32> to vector<32x128xf32>
    %71 = arith.mulf %67, %70 : vector<32x128xf32>
    %72 = tpu.concatenate %62, %66, %71 in 0 : vector<32x128xf32>, vector<32x128xf32>, vector<32x128xf32> -> vector<96x128xf32>
    %c0_53 = arith.constant 0 : index
    %c1_54 = arith.constant 1 : index
    %c0_55 = arith.constant 0 : index
    %c0_56 = arith.constant 0 : index
    %73 = vector.load %arg6[%c0_53, %c1_54, %c0_55, %c0_56] : memref<4x3x64x96xf32, #tpu.memory_space<vmem>>, vector<1x1x64x96xf32>
    %74 = vector.shape_cast %73 : vector<1x1x64x96xf32> to vector<64x96xf32>
    %cst_57 = arith.constant dense<0.000000e+00> : vector<64x128xf32>
    %75 = tpu.matmul %74, %72, %cst_57 {dimension_numbers = #tpu.dot_dimension_numbers<[1], [0], [0], [1], [0, 0, 1, 1], [], []>} : vector<64x96xf32>, vector<96x128xf32>, vector<64x128xf32> -> vector<64x128xf32>
    %c0_58 = arith.constant 0 : index
    %c1_59 = arith.constant 1 : index
    %c0_60 = arith.constant 0 : index
    %c0_61 = arith.constant 0 : index
    %76 = vector.load %arg7[%c0_58, %c1_59, %c0_60, %c0_61] : memref<4x3x64x1xf32, #tpu.memory_space<vmem>>, vector<1x1x64x1xf32>
    %77 = vector.shape_cast %76 : vector<1x1x64x1xf32> to vector<64x1xf32>
    %78 = vector.broadcast %77 : vector<64x1xf32> to vector<64x128xf32>
    %79 = arith.addf %75, %78 : vector<64x128xf32>
    %80 = vector.extract_strided_slice %79 {offsets = [0, 0], sizes = [32, 128], strides = [1, 1]} : vector<64x128xf32> to vector<32x128xf32>
    %81 = math.tanh %80 : vector<32x128xf32>
    %82 = vector.extract_strided_slice %79 {offsets = [32, 0], sizes = [32, 128], strides = [1, 1]} : vector<64x128xf32> to vector<32x128xf32>
    %83 = arith.negf %82 : vector<32x128xf32>
    %84 = math.exp %83 : vector<32x128xf32>
    %cst_62 = arith.constant 1.000000e+00 : f32
    %85 = vector.broadcast %cst_62 : f32 to vector<32x128xf32>
    %86 = arith.addf %85, %84 : vector<32x128xf32>
    %87 = arith.divf %85, %86 : vector<32x128xf32>
    %88 = arith.mulf %81, %87 : vector<32x128xf32>
    %c0_63 = arith.constant 0 : index
    %c1_64 = arith.constant 1 : index
    %c0_65 = arith.constant 0 : index
    %c0_66 = arith.constant 0 : index
    %89 = vector.load %arg8[%c0_63, %c1_64, %c0_65, %c0_66] : memref<4x3x64x32xf32, #tpu.memory_space<vmem>>, vector<1x1x64x32xf32>
    %90 = vector.shape_cast %89 : vector<1x1x64x32xf32> to vector<64x32xf32>
    %cst_67 = arith.constant dense<0.000000e+00> : vector<64x128xf32>
    %91 = tpu.matmul %90, %88, %cst_67 {dimension_numbers = #tpu.dot_dimension_numbers<[1], [0], [0], [1], [0, 0, 1, 1], [], []>} : vector<64x32xf32>, vector<32x128xf32>, vector<64x128xf32> -> vector<64x128xf32>
    %c0_68 = arith.constant 0 : index
    %c1_69 = arith.constant 1 : index
    %c0_70 = arith.constant 0 : index
    %c0_71 = arith.constant 0 : index
    %92 = vector.load %arg9[%c0_68, %c1_69, %c0_70, %c0_71] : memref<4x3x64x1xf32, #tpu.memory_space<vmem>>, vector<1x1x64x1xf32>
    %93 = vector.shape_cast %92 : vector<1x1x64x1xf32> to vector<64x1xf32>
    %94 = vector.broadcast %93 : vector<64x1xf32> to vector<64x128xf32>
    %95 = arith.addf %91, %94 : vector<64x128xf32>
    %96 = vector.extract_strided_slice %95 {offsets = [0, 0], sizes = [32, 128], strides = [1, 1]} : vector<64x128xf32> to vector<32x128xf32>
    %97 = arith.addf %55, %96 : vector<32x128xf32>
    %98 = vector.broadcast %0 : vector<1x128xf32> to vector<32x128xf32>
    %99 = arith.mulf %97, %98 : vector<32x128xf32>
    %100 = vector.extract_strided_slice %95 {offsets = [32, 0], sizes = [32, 128], strides = [1, 1]} : vector<64x128xf32> to vector<32x128xf32>
    %101 = arith.addf %57, %100 : vector<32x128xf32>
    %c1_i32_72 = arith.constant 1 : i32
    %102 = tpu.dynamic_rotate %99 by %c1_i32_72 dim 1 : vector<32x128xf32>, i32 -> vector<32x128xf32>
    %c2_73 = arith.constant 2 : index
    %c0_74 = arith.constant 0 : index
    %c0_75 = arith.constant 0 : index
    %c0_76 = arith.constant 0 : index
    %103 = vector.load %arg3[%c2_73, %c0_74, %c0_75, %c0_76] : memref<3x3x1x128xf32, #tpu.memory_space<vmem>>, vector<1x1x1x128xf32>
    %104 = vector.shape_cast %103 : vector<1x1x1x128xf32> to vector<1x128xf32>
    %105 = vector.broadcast %104 : vector<1x128xf32> to vector<32x128xf32>
    %106 = arith.mulf %102, %105 : vector<32x128xf32>
    %c2_77 = arith.constant 2 : index
    %c1_78 = arith.constant 1 : index
    %c0_79 = arith.constant 0 : index
    %c0_80 = arith.constant 0 : index
    %107 = vector.load %arg3[%c2_77, %c1_78, %c0_79, %c0_80] : memref<3x3x1x128xf32, #tpu.memory_space<vmem>>, vector<1x1x1x128xf32>
    %108 = vector.shape_cast %107 : vector<1x1x1x128xf32> to vector<1x128xf32>
    %109 = vector.broadcast %108 : vector<1x128xf32> to vector<32x128xf32>
    %110 = arith.mulf %99, %109 : vector<32x128xf32>
    %c127_i32_81 = arith.constant 127 : i32
    %111 = tpu.dynamic_rotate %99 by %c127_i32_81 dim 1 : vector<32x128xf32>, i32 -> vector<32x128xf32>
    %c2_82 = arith.constant 2 : index
    %c2_83 = arith.constant 2 : index
    %c0_84 = arith.constant 0 : index
    %c0_85 = arith.constant 0 : index
    %112 = vector.load %arg3[%c2_82, %c2_83, %c0_84, %c0_85] : memref<3x3x1x128xf32, #tpu.memory_space<vmem>>, vector<1x1x1x128xf32>
    %113 = vector.shape_cast %112 : vector<1x1x1x128xf32> to vector<1x128xf32>
    %114 = vector.broadcast %113 : vector<1x128xf32> to vector<32x128xf32>
    %115 = arith.mulf %111, %114 : vector<32x128xf32>
    %116 = tpu.concatenate %106, %110, %115 in 0 : vector<32x128xf32>, vector<32x128xf32>, vector<32x128xf32> -> vector<96x128xf32>
    %c0_86 = arith.constant 0 : index
    %c2_87 = arith.constant 2 : index
    %c0_88 = arith.constant 0 : index
    %c0_89 = arith.constant 0 : index
    %117 = vector.load %arg6[%c0_86, %c2_87, %c0_88, %c0_89] : memref<4x3x64x96xf32, #tpu.memory_space<vmem>>, vector<1x1x64x96xf32>
    %118 = vector.shape_cast %117 : vector<1x1x64x96xf32> to vector<64x96xf32>
    %cst_90 = arith.constant dense<0.000000e+00> : vector<64x128xf32>
    %119 = tpu.matmul %118, %116, %cst_90 {dimension_numbers = #tpu.dot_dimension_numbers<[1], [0], [0], [1], [0, 0, 1, 1], [], []>} : vector<64x96xf32>, vector<96x128xf32>, vector<64x128xf32> -> vector<64x128xf32>
    %c0_91 = arith.constant 0 : index
    %c2_92 = arith.constant 2 : index
    %c0_93 = arith.constant 0 : index
    %c0_94 = arith.constant 0 : index
    %120 = vector.load %arg7[%c0_91, %c2_92, %c0_93, %c0_94] : memref<4x3x64x1xf32, #tpu.memory_space<vmem>>, vector<1x1x64x1xf32>
    %121 = vector.shape_cast %120 : vector<1x1x64x1xf32> to vector<64x1xf32>
    %122 = vector.broadcast %121 : vector<64x1xf32> to vector<64x128xf32>
    %123 = arith.addf %119, %122 : vector<64x128xf32>
    %124 = vector.extract_strided_slice %123 {offsets = [0, 0], sizes = [32, 128], strides = [1, 1]} : vector<64x128xf32> to vector<32x128xf32>
    %125 = math.tanh %124 : vector<32x128xf32>
    %126 = vector.extract_strided_slice %123 {offsets = [32, 0], sizes = [32, 128], strides = [1, 1]} : vector<64x128xf32> to vector<32x128xf32>
    %127 = arith.negf %126 : vector<32x128xf32>
    %128 = math.exp %127 : vector<32x128xf32>
    %cst_95 = arith.constant 1.000000e+00 : f32
    %129 = vector.broadcast %cst_95 : f32 to vector<32x128xf32>
    %130 = arith.addf %129, %128 : vector<32x128xf32>
    %131 = arith.divf %129, %130 : vector<32x128xf32>
    %132 = arith.mulf %125, %131 : vector<32x128xf32>
    %c0_96 = arith.constant 0 : index
    %c2_97 = arith.constant 2 : index
    %c0_98 = arith.constant 0 : index
    %c0_99 = arith.constant 0 : index
    %133 = vector.load %arg8[%c0_96, %c2_97, %c0_98, %c0_99] : memref<4x3x64x32xf32, #tpu.memory_space<vmem>>, vector<1x1x64x32xf32>
    %134 = vector.shape_cast %133 : vector<1x1x64x32xf32> to vector<64x32xf32>
    %cst_100 = arith.constant dense<0.000000e+00> : vector<64x128xf32>
    %135 = tpu.matmul %134, %132, %cst_100 {dimension_numbers = #tpu.dot_dimension_numbers<[1], [0], [0], [1], [0, 0, 1, 1], [], []>} : vector<64x32xf32>, vector<32x128xf32>, vector<64x128xf32> -> vector<64x128xf32>
    %c0_101 = arith.constant 0 : index
    %c2_102 = arith.constant 2 : index
    %c0_103 = arith.constant 0 : index
    %c0_104 = arith.constant 0 : index
    %136 = vector.load %arg9[%c0_101, %c2_102, %c0_103, %c0_104] : memref<4x3x64x1xf32, #tpu.memory_space<vmem>>, vector<1x1x64x1xf32>
    %137 = vector.shape_cast %136 : vector<1x1x64x1xf32> to vector<64x1xf32>
    %138 = vector.broadcast %137 : vector<64x1xf32> to vector<64x128xf32>
    %139 = arith.addf %135, %138 : vector<64x128xf32>
    %140 = vector.extract_strided_slice %139 {offsets = [32, 0], sizes = [32, 128], strides = [1, 1]} : vector<64x128xf32> to vector<32x128xf32>
    %141 = arith.addf %101, %140 : vector<32x128xf32>
    %142 = vector.broadcast %0 : vector<1x128xf32> to vector<32x128xf32>
    %143 = arith.mulf %141, %142 : vector<32x128xf32>
    %c0_105 = arith.constant 0 : index
    %c0_106 = arith.constant 0 : index
    %c0_107 = arith.constant 0 : index
    %144 = vector.load %arg10[%c0_105, %c0_106, %c0_107] : memref<4x2x32xf32, #tpu.memory_space<vmem>>, vector<1x2x32xf32>
    %145 = vector.shape_cast %144 : vector<1x2x32xf32> to vector<2x32xf32>
    %cst_108 = arith.constant dense<0.000000e+00> : vector<2x128xf32>
    %146 = tpu.matmul %145, %143, %cst_108 {dimension_numbers = #tpu.dot_dimension_numbers<[1], [0], [0], [1], [0, 0, 1, 1], [], []>} : vector<2x32xf32>, vector<32x128xf32>, vector<2x128xf32> -> vector<2x128xf32>
    %c0_109 = arith.constant 0 : index
    %c0_110 = arith.constant 0 : index
    %c0_111 = arith.constant 0 : index
    %147 = vector.load %arg11[%c0_109, %c0_110, %c0_111] : memref<4x2x1xf32, #tpu.memory_space<vmem>>, vector<1x2x1xf32>
    %148 = vector.shape_cast %147 : vector<1x2x1xf32> to vector<2x1xf32>
    %149 = vector.broadcast %148 : vector<2x1xf32> to vector<2x128xf32>
    %150 = arith.addf %146, %149 : vector<2x128xf32>
    %151 = vector.broadcast %0 : vector<1x128xf32> to vector<2x128xf32>
    %152 = arith.mulf %150, %151 : vector<2x128xf32>
    %153 = vector.broadcast %0 : vector<1x128xf32> to vector<2x128xf32>
    %154 = arith.mulf %3, %153 : vector<2x128xf32>
    %155 = arith.addf %152, %154 : vector<2x128xf32>
    %c1_112 = arith.constant 1 : index
    %c0_113 = arith.constant 0 : index
    %c0_114 = arith.constant 0 : index
    %156 = vector.load %arg4[%c1_112, %c0_113, %c0_114] : memref<4x32x2xf32, #tpu.memory_space<vmem>>, vector<1x32x2xf32>
    %157 = vector.shape_cast %156 : vector<1x32x2xf32> to vector<32x2xf32>
    %cst_115 = arith.constant dense<0.000000e+00> : vector<32x128xf32>
    %158 = tpu.matmul %157, %155, %cst_115 {dimension_numbers = #tpu.dot_dimension_numbers<[1], [0], [0], [1], [0, 0, 1, 1], [], []>} : vector<32x2xf32>, vector<2x128xf32>, vector<32x128xf32> -> vector<32x128xf32>
    %c1_116 = arith.constant 1 : index
    %c0_117 = arith.constant 0 : index
    %c0_118 = arith.constant 0 : index
    %159 = vector.load %arg5[%c1_116, %c0_117, %c0_118] : memref<4x32x1xf32, #tpu.memory_space<vmem>>, vector<1x32x1xf32>
    %160 = vector.shape_cast %159 : vector<1x32x1xf32> to vector<32x1xf32>
    %161 = vector.broadcast %160 : vector<32x1xf32> to vector<32x128xf32>
    %162 = arith.addf %158, %161 : vector<32x128xf32>
    %163 = vector.broadcast %0 : vector<1x128xf32> to vector<32x128xf32>
    %164 = arith.mulf %162, %163 : vector<32x128xf32>
    %cst_119 = arith.constant 0.000000e+00 : f32
    %165 = vector.broadcast %cst_119 : f32 to vector<32x128xf32>
    %c1_i32_120 = arith.constant 1 : i32
    %166 = tpu.dynamic_rotate %164 by %c1_i32_120 dim 1 : vector<32x128xf32>, i32 -> vector<32x128xf32>
    %c0_121 = arith.constant 0 : index
    %c0_122 = arith.constant 0 : index
    %c0_123 = arith.constant 0 : index
    %c0_124 = arith.constant 0 : index
    %167 = vector.load %arg3[%c0_121, %c0_122, %c0_123, %c0_124] : memref<3x3x1x128xf32, #tpu.memory_space<vmem>>, vector<1x1x1x128xf32>
    %168 = vector.shape_cast %167 : vector<1x1x1x128xf32> to vector<1x128xf32>
    %169 = vector.broadcast %168 : vector<1x128xf32> to vector<32x128xf32>
    %170 = arith.mulf %166, %169 : vector<32x128xf32>
    %c0_125 = arith.constant 0 : index
    %c1_126 = arith.constant 1 : index
    %c0_127 = arith.constant 0 : index
    %c0_128 = arith.constant 0 : index
    %171 = vector.load %arg3[%c0_125, %c1_126, %c0_127, %c0_128] : memref<3x3x1x128xf32, #tpu.memory_space<vmem>>, vector<1x1x1x128xf32>
    %172 = vector.shape_cast %171 : vector<1x1x1x128xf32> to vector<1x128xf32>
    %173 = vector.broadcast %172 : vector<1x128xf32> to vector<32x128xf32>
    %174 = arith.mulf %164, %173 : vector<32x128xf32>
    %c127_i32_129 = arith.constant 127 : i32
    %175 = tpu.dynamic_rotate %164 by %c127_i32_129 dim 1 : vector<32x128xf32>, i32 -> vector<32x128xf32>
    %c0_130 = arith.constant 0 : index
    %c2_131 = arith.constant 2 : index
    %c0_132 = arith.constant 0 : index
    %c0_133 = arith.constant 0 : index
    %176 = vector.load %arg3[%c0_130, %c2_131, %c0_132, %c0_133] : memref<3x3x1x128xf32, #tpu.memory_space<vmem>>, vector<1x1x1x128xf32>
    %177 = vector.shape_cast %176 : vector<1x1x1x128xf32> to vector<1x128xf32>
    %178 = vector.broadcast %177 : vector<1x128xf32> to vector<32x128xf32>
    %179 = arith.mulf %175, %178 : vector<32x128xf32>
    %180 = tpu.concatenate %170, %174, %179 in 0 : vector<32x128xf32>, vector<32x128xf32>, vector<32x128xf32> -> vector<96x128xf32>
    %c1_134 = arith.constant 1 : index
    %c0_135 = arith.constant 0 : index
    %c0_136 = arith.constant 0 : index
    %c0_137 = arith.constant 0 : index
    %181 = vector.load %arg6[%c1_134, %c0_135, %c0_136, %c0_137] : memref<4x3x64x96xf32, #tpu.memory_space<vmem>>, vector<1x1x64x96xf32>
    %182 = vector.shape_cast %181 : vector<1x1x64x96xf32> to vector<64x96xf32>
    %cst_138 = arith.constant dense<0.000000e+00> : vector<64x128xf32>
    %183 = tpu.matmul %182, %180, %cst_138 {dimension_numbers = #tpu.dot_dimension_numbers<[1], [0], [0], [1], [0, 0, 1, 1], [], []>} : vector<64x96xf32>, vector<96x128xf32>, vector<64x128xf32> -> vector<64x128xf32>
    %c1_139 = arith.constant 1 : index
    %c0_140 = arith.constant 0 : index
    %c0_141 = arith.constant 0 : index
    %c0_142 = arith.constant 0 : index
    %184 = vector.load %arg7[%c1_139, %c0_140, %c0_141, %c0_142] : memref<4x3x64x1xf32, #tpu.memory_space<vmem>>, vector<1x1x64x1xf32>
    %185 = vector.shape_cast %184 : vector<1x1x64x1xf32> to vector<64x1xf32>
    %186 = vector.broadcast %185 : vector<64x1xf32> to vector<64x128xf32>
    %187 = arith.addf %183, %186 : vector<64x128xf32>
    %188 = vector.extract_strided_slice %187 {offsets = [0, 0], sizes = [32, 128], strides = [1, 1]} : vector<64x128xf32> to vector<32x128xf32>
    %189 = math.tanh %188 : vector<32x128xf32>
    %190 = vector.extract_strided_slice %187 {offsets = [32, 0], sizes = [32, 128], strides = [1, 1]} : vector<64x128xf32> to vector<32x128xf32>
    %191 = arith.negf %190 : vector<32x128xf32>
    %192 = math.exp %191 : vector<32x128xf32>
    %cst_143 = arith.constant 1.000000e+00 : f32
    %193 = vector.broadcast %cst_143 : f32 to vector<32x128xf32>
    %194 = arith.addf %193, %192 : vector<32x128xf32>
    %195 = arith.divf %193, %194 : vector<32x128xf32>
    %196 = arith.mulf %189, %195 : vector<32x128xf32>
    %c1_144 = arith.constant 1 : index
    %c0_145 = arith.constant 0 : index
    %c0_146 = arith.constant 0 : index
    %c0_147 = arith.constant 0 : index
    %197 = vector.load %arg8[%c1_144, %c0_145, %c0_146, %c0_147] : memref<4x3x64x32xf32, #tpu.memory_space<vmem>>, vector<1x1x64x32xf32>
    %198 = vector.shape_cast %197 : vector<1x1x64x32xf32> to vector<64x32xf32>
    %cst_148 = arith.constant dense<0.000000e+00> : vector<64x128xf32>
    %199 = tpu.matmul %198, %196, %cst_148 {dimension_numbers = #tpu.dot_dimension_numbers<[1], [0], [0], [1], [0, 0, 1, 1], [], []>} : vector<64x32xf32>, vector<32x128xf32>, vector<64x128xf32> -> vector<64x128xf32>
    %c1_149 = arith.constant 1 : index
    %c0_150 = arith.constant 0 : index
    %c0_151 = arith.constant 0 : index
    %c0_152 = arith.constant 0 : index
    %200 = vector.load %arg9[%c1_149, %c0_150, %c0_151, %c0_152] : memref<4x3x64x1xf32, #tpu.memory_space<vmem>>, vector<1x1x64x1xf32>
    %201 = vector.shape_cast %200 : vector<1x1x64x1xf32> to vector<64x1xf32>
    %202 = vector.broadcast %201 : vector<64x1xf32> to vector<64x128xf32>
    %203 = arith.addf %199, %202 : vector<64x128xf32>
    %204 = vector.extract_strided_slice %203 {offsets = [0, 0], sizes = [32, 128], strides = [1, 1]} : vector<64x128xf32> to vector<32x128xf32>
    %205 = arith.addf %164, %204 : vector<32x128xf32>
    %206 = vector.broadcast %0 : vector<1x128xf32> to vector<32x128xf32>
    %207 = arith.mulf %205, %206 : vector<32x128xf32>
    %208 = vector.extract_strided_slice %203 {offsets = [32, 0], sizes = [32, 128], strides = [1, 1]} : vector<64x128xf32> to vector<32x128xf32>
    %209 = arith.addf %165, %208 : vector<32x128xf32>
    %c1_i32_153 = arith.constant 1 : i32
    %210 = tpu.dynamic_rotate %207 by %c1_i32_153 dim 1 : vector<32x128xf32>, i32 -> vector<32x128xf32>
    %c1_154 = arith.constant 1 : index
    %c0_155 = arith.constant 0 : index
    %c0_156 = arith.constant 0 : index
    %c0_157 = arith.constant 0 : index
    %211 = vector.load %arg3[%c1_154, %c0_155, %c0_156, %c0_157] : memref<3x3x1x128xf32, #tpu.memory_space<vmem>>, vector<1x1x1x128xf32>
    %212 = vector.shape_cast %211 : vector<1x1x1x128xf32> to vector<1x128xf32>
    %213 = vector.broadcast %212 : vector<1x128xf32> to vector<32x128xf32>
    %214 = arith.mulf %210, %213 : vector<32x128xf32>
    %c1_158 = arith.constant 1 : index
    %c1_159 = arith.constant 1 : index
    %c0_160 = arith.constant 0 : index
    %c0_161 = arith.constant 0 : index
    %215 = vector.load %arg3[%c1_158, %c1_159, %c0_160, %c0_161] : memref<3x3x1x128xf32, #tpu.memory_space<vmem>>, vector<1x1x1x128xf32>
    %216 = vector.shape_cast %215 : vector<1x1x1x128xf32> to vector<1x128xf32>
    %217 = vector.broadcast %216 : vector<1x128xf32> to vector<32x128xf32>
    %218 = arith.mulf %207, %217 : vector<32x128xf32>
    %c127_i32_162 = arith.constant 127 : i32
    %219 = tpu.dynamic_rotate %207 by %c127_i32_162 dim 1 : vector<32x128xf32>, i32 -> vector<32x128xf32>
    %c1_163 = arith.constant 1 : index
    %c2_164 = arith.constant 2 : index
    %c0_165 = arith.constant 0 : index
    %c0_166 = arith.constant 0 : index
    %220 = vector.load %arg3[%c1_163, %c2_164, %c0_165, %c0_166] : memref<3x3x1x128xf32, #tpu.memory_space<vmem>>, vector<1x1x1x128xf32>
    %221 = vector.shape_cast %220 : vector<1x1x1x128xf32> to vector<1x128xf32>
    %222 = vector.broadcast %221 : vector<1x128xf32> to vector<32x128xf32>
    %223 = arith.mulf %219, %222 : vector<32x128xf32>
    %224 = tpu.concatenate %214, %218, %223 in 0 : vector<32x128xf32>, vector<32x128xf32>, vector<32x128xf32> -> vector<96x128xf32>
    %c1_167 = arith.constant 1 : index
    %c1_168 = arith.constant 1 : index
    %c0_169 = arith.constant 0 : index
    %c0_170 = arith.constant 0 : index
    %225 = vector.load %arg6[%c1_167, %c1_168, %c0_169, %c0_170] : memref<4x3x64x96xf32, #tpu.memory_space<vmem>>, vector<1x1x64x96xf32>
    %226 = vector.shape_cast %225 : vector<1x1x64x96xf32> to vector<64x96xf32>
    %cst_171 = arith.constant dense<0.000000e+00> : vector<64x128xf32>
    %227 = tpu.matmul %226, %224, %cst_171 {dimension_numbers = #tpu.dot_dimension_numbers<[1], [0], [0], [1], [0, 0, 1, 1], [], []>} : vector<64x96xf32>, vector<96x128xf32>, vector<64x128xf32> -> vector<64x128xf32>
    %c1_172 = arith.constant 1 : index
    %c1_173 = arith.constant 1 : index
    %c0_174 = arith.constant 0 : index
    %c0_175 = arith.constant 0 : index
    %228 = vector.load %arg7[%c1_172, %c1_173, %c0_174, %c0_175] : memref<4x3x64x1xf32, #tpu.memory_space<vmem>>, vector<1x1x64x1xf32>
    %229 = vector.shape_cast %228 : vector<1x1x64x1xf32> to vector<64x1xf32>
    %230 = vector.broadcast %229 : vector<64x1xf32> to vector<64x128xf32>
    %231 = arith.addf %227, %230 : vector<64x128xf32>
    %232 = vector.extract_strided_slice %231 {offsets = [0, 0], sizes = [32, 128], strides = [1, 1]} : vector<64x128xf32> to vector<32x128xf32>
    %233 = math.tanh %232 : vector<32x128xf32>
    %234 = vector.extract_strided_slice %231 {offsets = [32, 0], sizes = [32, 128], strides = [1, 1]} : vector<64x128xf32> to vector<32x128xf32>
    %235 = arith.negf %234 : vector<32x128xf32>
    %236 = math.exp %235 : vector<32x128xf32>
    %cst_176 = arith.constant 1.000000e+00 : f32
    %237 = vector.broadcast %cst_176 : f32 to vector<32x128xf32>
    %238 = arith.addf %237, %236 : vector<32x128xf32>
    %239 = arith.divf %237, %238 : vector<32x128xf32>
    %240 = arith.mulf %233, %239 : vector<32x128xf32>
    %c1_177 = arith.constant 1 : index
    %c1_178 = arith.constant 1 : index
    %c0_179 = arith.constant 0 : index
    %c0_180 = arith.constant 0 : index
    %241 = vector.load %arg8[%c1_177, %c1_178, %c0_179, %c0_180] : memref<4x3x64x32xf32, #tpu.memory_space<vmem>>, vector<1x1x64x32xf32>
    %242 = vector.shape_cast %241 : vector<1x1x64x32xf32> to vector<64x32xf32>
    %cst_181 = arith.constant dense<0.000000e+00> : vector<64x128xf32>
    %243 = tpu.matmul %242, %240, %cst_181 {dimension_numbers = #tpu.dot_dimension_numbers<[1], [0], [0], [1], [0, 0, 1, 1], [], []>} : vector<64x32xf32>, vector<32x128xf32>, vector<64x128xf32> -> vector<64x128xf32>
    %c1_182 = arith.constant 1 : index
    %c1_183 = arith.constant 1 : index
    %c0_184 = arith.constant 0 : index
    %c0_185 = arith.constant 0 : index
    %244 = vector.load %arg9[%c1_182, %c1_183, %c0_184, %c0_185] : memref<4x3x64x1xf32, #tpu.memory_space<vmem>>, vector<1x1x64x1xf32>
    %245 = vector.shape_cast %244 : vector<1x1x64x1xf32> to vector<64x1xf32>
    %246 = vector.broadcast %245 : vector<64x1xf32> to vector<64x128xf32>
    %247 = arith.addf %243, %246 : vector<64x128xf32>
    %248 = vector.extract_strided_slice %247 {offsets = [0, 0], sizes = [32, 128], strides = [1, 1]} : vector<64x128xf32> to vector<32x128xf32>
    %249 = arith.addf %207, %248 : vector<32x128xf32>
    %250 = vector.broadcast %0 : vector<1x128xf32> to vector<32x128xf32>
    %251 = arith.mulf %249, %250 : vector<32x128xf32>
    %252 = vector.extract_strided_slice %247 {offsets = [32, 0], sizes = [32, 128], strides = [1, 1]} : vector<64x128xf32> to vector<32x128xf32>
    %253 = arith.addf %209, %252 : vector<32x128xf32>
    %c1_i32_186 = arith.constant 1 : i32
    %254 = tpu.dynamic_rotate %251 by %c1_i32_186 dim 1 : vector<32x128xf32>, i32 -> vector<32x128xf32>
    %c2_187 = arith.constant 2 : index
    %c0_188 = arith.constant 0 : index
    %c0_189 = arith.constant 0 : index
    %c0_190 = arith.constant 0 : index
    %255 = vector.load %arg3[%c2_187, %c0_188, %c0_189, %c0_190] : memref<3x3x1x128xf32, #tpu.memory_space<vmem>>, vector<1x1x1x128xf32>
    %256 = vector.shape_cast %255 : vector<1x1x1x128xf32> to vector<1x128xf32>
    %257 = vector.broadcast %256 : vector<1x128xf32> to vector<32x128xf32>
    %258 = arith.mulf %254, %257 : vector<32x128xf32>
    %c2_191 = arith.constant 2 : index
    %c1_192 = arith.constant 1 : index
    %c0_193 = arith.constant 0 : index
    %c0_194 = arith.constant 0 : index
    %259 = vector.load %arg3[%c2_191, %c1_192, %c0_193, %c0_194] : memref<3x3x1x128xf32, #tpu.memory_space<vmem>>, vector<1x1x1x128xf32>
    %260 = vector.shape_cast %259 : vector<1x1x1x128xf32> to vector<1x128xf32>
    %261 = vector.broadcast %260 : vector<1x128xf32> to vector<32x128xf32>
    %262 = arith.mulf %251, %261 : vector<32x128xf32>
    %c127_i32_195 = arith.constant 127 : i32
    %263 = tpu.dynamic_rotate %251 by %c127_i32_195 dim 1 : vector<32x128xf32>, i32 -> vector<32x128xf32>
    %c2_196 = arith.constant 2 : index
    %c2_197 = arith.constant 2 : index
    %c0_198 = arith.constant 0 : index
    %c0_199 = arith.constant 0 : index
    %264 = vector.load %arg3[%c2_196, %c2_197, %c0_198, %c0_199] : memref<3x3x1x128xf32, #tpu.memory_space<vmem>>, vector<1x1x1x128xf32>
    %265 = vector.shape_cast %264 : vector<1x1x1x128xf32> to vector<1x128xf32>
    %266 = vector.broadcast %265 : vector<1x128xf32> to vector<32x128xf32>
    %267 = arith.mulf %263, %266 : vector<32x128xf32>
    %268 = tpu.concatenate %258, %262, %267 in 0 : vector<32x128xf32>, vector<32x128xf32>, vector<32x128xf32> -> vector<96x128xf32>
    %c1_200 = arith.constant 1 : index
    %c2_201 = arith.constant 2 : index
    %c0_202 = arith.constant 0 : index
    %c0_203 = arith.constant 0 : index
    %269 = vector.load %arg6[%c1_200, %c2_201, %c0_202, %c0_203] : memref<4x3x64x96xf32, #tpu.memory_space<vmem>>, vector<1x1x64x96xf32>
    %270 = vector.shape_cast %269 : vector<1x1x64x96xf32> to vector<64x96xf32>
    %cst_204 = arith.constant dense<0.000000e+00> : vector<64x128xf32>
    %271 = tpu.matmul %270, %268, %cst_204 {dimension_numbers = #tpu.dot_dimension_numbers<[1], [0], [0], [1], [0, 0, 1, 1], [], []>} : vector<64x96xf32>, vector<96x128xf32>, vector<64x128xf32> -> vector<64x128xf32>
    %c1_205 = arith.constant 1 : index
    %c2_206 = arith.constant 2 : index
    %c0_207 = arith.constant 0 : index
    %c0_208 = arith.constant 0 : index
    %272 = vector.load %arg7[%c1_205, %c2_206, %c0_207, %c0_208] : memref<4x3x64x1xf32, #tpu.memory_space<vmem>>, vector<1x1x64x1xf32>
    %273 = vector.shape_cast %272 : vector<1x1x64x1xf32> to vector<64x1xf32>
    %274 = vector.broadcast %273 : vector<64x1xf32> to vector<64x128xf32>
    %275 = arith.addf %271, %274 : vector<64x128xf32>
    %276 = vector.extract_strided_slice %275 {offsets = [0, 0], sizes = [32, 128], strides = [1, 1]} : vector<64x128xf32> to vector<32x128xf32>
    %277 = math.tanh %276 : vector<32x128xf32>
    %278 = vector.extract_strided_slice %275 {offsets = [32, 0], sizes = [32, 128], strides = [1, 1]} : vector<64x128xf32> to vector<32x128xf32>
    %279 = arith.negf %278 : vector<32x128xf32>
    %280 = math.exp %279 : vector<32x128xf32>
    %cst_209 = arith.constant 1.000000e+00 : f32
    %281 = vector.broadcast %cst_209 : f32 to vector<32x128xf32>
    %282 = arith.addf %281, %280 : vector<32x128xf32>
    %283 = arith.divf %281, %282 : vector<32x128xf32>
    %284 = arith.mulf %277, %283 : vector<32x128xf32>
    %c1_210 = arith.constant 1 : index
    %c2_211 = arith.constant 2 : index
    %c0_212 = arith.constant 0 : index
    %c0_213 = arith.constant 0 : index
    %285 = vector.load %arg8[%c1_210, %c2_211, %c0_212, %c0_213] : memref<4x3x64x32xf32, #tpu.memory_space<vmem>>, vector<1x1x64x32xf32>
    %286 = vector.shape_cast %285 : vector<1x1x64x32xf32> to vector<64x32xf32>
    %cst_214 = arith.constant dense<0.000000e+00> : vector<64x128xf32>
    %287 = tpu.matmul %286, %284, %cst_214 {dimension_numbers = #tpu.dot_dimension_numbers<[1], [0], [0], [1], [0, 0, 1, 1], [], []>} : vector<64x32xf32>, vector<32x128xf32>, vector<64x128xf32> -> vector<64x128xf32>
    %c1_215 = arith.constant 1 : index
    %c2_216 = arith.constant 2 : index
    %c0_217 = arith.constant 0 : index
    %c0_218 = arith.constant 0 : index
    %288 = vector.load %arg9[%c1_215, %c2_216, %c0_217, %c0_218] : memref<4x3x64x1xf32, #tpu.memory_space<vmem>>, vector<1x1x64x1xf32>
    %289 = vector.shape_cast %288 : vector<1x1x64x1xf32> to vector<64x1xf32>
    %290 = vector.broadcast %289 : vector<64x1xf32> to vector<64x128xf32>
    %291 = arith.addf %287, %290 : vector<64x128xf32>
    %292 = vector.extract_strided_slice %291 {offsets = [32, 0], sizes = [32, 128], strides = [1, 1]} : vector<64x128xf32> to vector<32x128xf32>
    %293 = arith.addf %253, %292 : vector<32x128xf32>
    %294 = vector.broadcast %0 : vector<1x128xf32> to vector<32x128xf32>
    %295 = arith.mulf %293, %294 : vector<32x128xf32>
    %c1_219 = arith.constant 1 : index
    %c0_220 = arith.constant 0 : index
    %c0_221 = arith.constant 0 : index
    %296 = vector.load %arg10[%c1_219, %c0_220, %c0_221] : memref<4x2x32xf32, #tpu.memory_space<vmem>>, vector<1x2x32xf32>
    %297 = vector.shape_cast %296 : vector<1x2x32xf32> to vector<2x32xf32>
    %cst_222 = arith.constant dense<0.000000e+00> : vector<2x128xf32>
    %298 = tpu.matmul %297, %295, %cst_222 {dimension_numbers = #tpu.dot_dimension_numbers<[1], [0], [0], [1], [0, 0, 1, 1], [], []>} : vector<2x32xf32>, vector<32x128xf32>, vector<2x128xf32> -> vector<2x128xf32>
    %c1_223 = arith.constant 1 : index
    %c0_224 = arith.constant 0 : index
    %c0_225 = arith.constant 0 : index
    %299 = vector.load %arg11[%c1_223, %c0_224, %c0_225] : memref<4x2x1xf32, #tpu.memory_space<vmem>>, vector<1x2x1xf32>
    %300 = vector.shape_cast %299 : vector<1x2x1xf32> to vector<2x1xf32>
    %301 = vector.broadcast %300 : vector<2x1xf32> to vector<2x128xf32>
    %302 = arith.addf %298, %301 : vector<2x128xf32>
    %303 = vector.broadcast %0 : vector<1x128xf32> to vector<2x128xf32>
    %304 = arith.mulf %302, %303 : vector<2x128xf32>
    %305 = vector.broadcast %0 : vector<1x128xf32> to vector<2x128xf32>
    %306 = arith.mulf %2, %305 : vector<2x128xf32>
    %307 = arith.addf %304, %306 : vector<2x128xf32>
    %c2_226 = arith.constant 2 : index
    %c0_227 = arith.constant 0 : index
    %c0_228 = arith.constant 0 : index
    %308 = vector.load %arg4[%c2_226, %c0_227, %c0_228] : memref<4x32x2xf32, #tpu.memory_space<vmem>>, vector<1x32x2xf32>
    %309 = vector.shape_cast %308 : vector<1x32x2xf32> to vector<32x2xf32>
    %cst_229 = arith.constant dense<0.000000e+00> : vector<32x128xf32>
    %310 = tpu.matmul %309, %307, %cst_229 {dimension_numbers = #tpu.dot_dimension_numbers<[1], [0], [0], [1], [0, 0, 1, 1], [], []>} : vector<32x2xf32>, vector<2x128xf32>, vector<32x128xf32> -> vector<32x128xf32>
    %c2_230 = arith.constant 2 : index
    %c0_231 = arith.constant 0 : index
    %c0_232 = arith.constant 0 : index
    %311 = vector.load %arg5[%c2_230, %c0_231, %c0_232] : memref<4x32x1xf32, #tpu.memory_space<vmem>>, vector<1x32x1xf32>
    %312 = vector.shape_cast %311 : vector<1x32x1xf32> to vector<32x1xf32>
    %313 = vector.broadcast %312 : vector<32x1xf32> to vector<32x128xf32>
    %314 = arith.addf %310, %313 : vector<32x128xf32>
    %315 = vector.broadcast %0 : vector<1x128xf32> to vector<32x128xf32>
    %316 = arith.mulf %314, %315 : vector<32x128xf32>
    %cst_233 = arith.constant 0.000000e+00 : f32
    %317 = vector.broadcast %cst_233 : f32 to vector<32x128xf32>
    %c1_i32_234 = arith.constant 1 : i32
    %318 = tpu.dynamic_rotate %316 by %c1_i32_234 dim 1 : vector<32x128xf32>, i32 -> vector<32x128xf32>
    %c0_235 = arith.constant 0 : index
    %c0_236 = arith.constant 0 : index
    %c0_237 = arith.constant 0 : index
    %c0_238 = arith.constant 0 : index
    %319 = vector.load %arg3[%c0_235, %c0_236, %c0_237, %c0_238] : memref<3x3x1x128xf32, #tpu.memory_space<vmem>>, vector<1x1x1x128xf32>
    %320 = vector.shape_cast %319 : vector<1x1x1x128xf32> to vector<1x128xf32>
    %321 = vector.broadcast %320 : vector<1x128xf32> to vector<32x128xf32>
    %322 = arith.mulf %318, %321 : vector<32x128xf32>
    %c0_239 = arith.constant 0 : index
    %c1_240 = arith.constant 1 : index
    %c0_241 = arith.constant 0 : index
    %c0_242 = arith.constant 0 : index
    %323 = vector.load %arg3[%c0_239, %c1_240, %c0_241, %c0_242] : memref<3x3x1x128xf32, #tpu.memory_space<vmem>>, vector<1x1x1x128xf32>
    %324 = vector.shape_cast %323 : vector<1x1x1x128xf32> to vector<1x128xf32>
    %325 = vector.broadcast %324 : vector<1x128xf32> to vector<32x128xf32>
    %326 = arith.mulf %316, %325 : vector<32x128xf32>
    %c127_i32_243 = arith.constant 127 : i32
    %327 = tpu.dynamic_rotate %316 by %c127_i32_243 dim 1 : vector<32x128xf32>, i32 -> vector<32x128xf32>
    %c0_244 = arith.constant 0 : index
    %c2_245 = arith.constant 2 : index
    %c0_246 = arith.constant 0 : index
    %c0_247 = arith.constant 0 : index
    %328 = vector.load %arg3[%c0_244, %c2_245, %c0_246, %c0_247] : memref<3x3x1x128xf32, #tpu.memory_space<vmem>>, vector<1x1x1x128xf32>
    %329 = vector.shape_cast %328 : vector<1x1x1x128xf32> to vector<1x128xf32>
    %330 = vector.broadcast %329 : vector<1x128xf32> to vector<32x128xf32>
    %331 = arith.mulf %327, %330 : vector<32x128xf32>
    %332 = tpu.concatenate %322, %326, %331 in 0 : vector<32x128xf32>, vector<32x128xf32>, vector<32x128xf32> -> vector<96x128xf32>
    %c2_248 = arith.constant 2 : index
    %c0_249 = arith.constant 0 : index
    %c0_250 = arith.constant 0 : index
    %c0_251 = arith.constant 0 : index
    %333 = vector.load %arg6[%c2_248, %c0_249, %c0_250, %c0_251] : memref<4x3x64x96xf32, #tpu.memory_space<vmem>>, vector<1x1x64x96xf32>
    %334 = vector.shape_cast %333 : vector<1x1x64x96xf32> to vector<64x96xf32>
    %cst_252 = arith.constant dense<0.000000e+00> : vector<64x128xf32>
    %335 = tpu.matmul %334, %332, %cst_252 {dimension_numbers = #tpu.dot_dimension_numbers<[1], [0], [0], [1], [0, 0, 1, 1], [], []>} : vector<64x96xf32>, vector<96x128xf32>, vector<64x128xf32> -> vector<64x128xf32>
    %c2_253 = arith.constant 2 : index
    %c0_254 = arith.constant 0 : index
    %c0_255 = arith.constant 0 : index
    %c0_256 = arith.constant 0 : index
    %336 = vector.load %arg7[%c2_253, %c0_254, %c0_255, %c0_256] : memref<4x3x64x1xf32, #tpu.memory_space<vmem>>, vector<1x1x64x1xf32>
    %337 = vector.shape_cast %336 : vector<1x1x64x1xf32> to vector<64x1xf32>
    %338 = vector.broadcast %337 : vector<64x1xf32> to vector<64x128xf32>
    %339 = arith.addf %335, %338 : vector<64x128xf32>
    %340 = vector.extract_strided_slice %339 {offsets = [0, 0], sizes = [32, 128], strides = [1, 1]} : vector<64x128xf32> to vector<32x128xf32>
    %341 = math.tanh %340 : vector<32x128xf32>
    %342 = vector.extract_strided_slice %339 {offsets = [32, 0], sizes = [32, 128], strides = [1, 1]} : vector<64x128xf32> to vector<32x128xf32>
    %343 = arith.negf %342 : vector<32x128xf32>
    %344 = math.exp %343 : vector<32x128xf32>
    %cst_257 = arith.constant 1.000000e+00 : f32
    %345 = vector.broadcast %cst_257 : f32 to vector<32x128xf32>
    %346 = arith.addf %345, %344 : vector<32x128xf32>
    %347 = arith.divf %345, %346 : vector<32x128xf32>
    %348 = arith.mulf %341, %347 : vector<32x128xf32>
    %c2_258 = arith.constant 2 : index
    %c0_259 = arith.constant 0 : index
    %c0_260 = arith.constant 0 : index
    %c0_261 = arith.constant 0 : index
    %349 = vector.load %arg8[%c2_258, %c0_259, %c0_260, %c0_261] : memref<4x3x64x32xf32, #tpu.memory_space<vmem>>, vector<1x1x64x32xf32>
    %350 = vector.shape_cast %349 : vector<1x1x64x32xf32> to vector<64x32xf32>
    %cst_262 = arith.constant dense<0.000000e+00> : vector<64x128xf32>
    %351 = tpu.matmul %350, %348, %cst_262 {dimension_numbers = #tpu.dot_dimension_numbers<[1], [0], [0], [1], [0, 0, 1, 1], [], []>} : vector<64x32xf32>, vector<32x128xf32>, vector<64x128xf32> -> vector<64x128xf32>
    %c2_263 = arith.constant 2 : index
    %c0_264 = arith.constant 0 : index
    %c0_265 = arith.constant 0 : index
    %c0_266 = arith.constant 0 : index
    %352 = vector.load %arg9[%c2_263, %c0_264, %c0_265, %c0_266] : memref<4x3x64x1xf32, #tpu.memory_space<vmem>>, vector<1x1x64x1xf32>
    %353 = vector.shape_cast %352 : vector<1x1x64x1xf32> to vector<64x1xf32>
    %354 = vector.broadcast %353 : vector<64x1xf32> to vector<64x128xf32>
    %355 = arith.addf %351, %354 : vector<64x128xf32>
    %356 = vector.extract_strided_slice %355 {offsets = [0, 0], sizes = [32, 128], strides = [1, 1]} : vector<64x128xf32> to vector<32x128xf32>
    %357 = arith.addf %316, %356 : vector<32x128xf32>
    %358 = vector.broadcast %0 : vector<1x128xf32> to vector<32x128xf32>
    %359 = arith.mulf %357, %358 : vector<32x128xf32>
    %360 = vector.extract_strided_slice %355 {offsets = [32, 0], sizes = [32, 128], strides = [1, 1]} : vector<64x128xf32> to vector<32x128xf32>
    %361 = arith.addf %317, %360 : vector<32x128xf32>
    %c1_i32_267 = arith.constant 1 : i32
    %362 = tpu.dynamic_rotate %359 by %c1_i32_267 dim 1 : vector<32x128xf32>, i32 -> vector<32x128xf32>
    %c1_268 = arith.constant 1 : index
    %c0_269 = arith.constant 0 : index
    %c0_270 = arith.constant 0 : index
    %c0_271 = arith.constant 0 : index
    %363 = vector.load %arg3[%c1_268, %c0_269, %c0_270, %c0_271] : memref<3x3x1x128xf32, #tpu.memory_space<vmem>>, vector<1x1x1x128xf32>
    %364 = vector.shape_cast %363 : vector<1x1x1x128xf32> to vector<1x128xf32>
    %365 = vector.broadcast %364 : vector<1x128xf32> to vector<32x128xf32>
    %366 = arith.mulf %362, %365 : vector<32x128xf32>
    %c1_272 = arith.constant 1 : index
    %c1_273 = arith.constant 1 : index
    %c0_274 = arith.constant 0 : index
    %c0_275 = arith.constant 0 : index
    %367 = vector.load %arg3[%c1_272, %c1_273, %c0_274, %c0_275] : memref<3x3x1x128xf32, #tpu.memory_space<vmem>>, vector<1x1x1x128xf32>
    %368 = vector.shape_cast %367 : vector<1x1x1x128xf32> to vector<1x128xf32>
    %369 = vector.broadcast %368 : vector<1x128xf32> to vector<32x128xf32>
    %370 = arith.mulf %359, %369 : vector<32x128xf32>
    %c127_i32_276 = arith.constant 127 : i32
    %371 = tpu.dynamic_rotate %359 by %c127_i32_276 dim 1 : vector<32x128xf32>, i32 -> vector<32x128xf32>
    %c1_277 = arith.constant 1 : index
    %c2_278 = arith.constant 2 : index
    %c0_279 = arith.constant 0 : index
    %c0_280 = arith.constant 0 : index
    %372 = vector.load %arg3[%c1_277, %c2_278, %c0_279, %c0_280] : memref<3x3x1x128xf32, #tpu.memory_space<vmem>>, vector<1x1x1x128xf32>
    %373 = vector.shape_cast %372 : vector<1x1x1x128xf32> to vector<1x128xf32>
    %374 = vector.broadcast %373 : vector<1x128xf32> to vector<32x128xf32>
    %375 = arith.mulf %371, %374 : vector<32x128xf32>
    %376 = tpu.concatenate %366, %370, %375 in 0 : vector<32x128xf32>, vector<32x128xf32>, vector<32x128xf32> -> vector<96x128xf32>
    %c2_281 = arith.constant 2 : index
    %c1_282 = arith.constant 1 : index
    %c0_283 = arith.constant 0 : index
    %c0_284 = arith.constant 0 : index
    %377 = vector.load %arg6[%c2_281, %c1_282, %c0_283, %c0_284] : memref<4x3x64x96xf32, #tpu.memory_space<vmem>>, vector<1x1x64x96xf32>
    %378 = vector.shape_cast %377 : vector<1x1x64x96xf32> to vector<64x96xf32>
    %cst_285 = arith.constant dense<0.000000e+00> : vector<64x128xf32>
    %379 = tpu.matmul %378, %376, %cst_285 {dimension_numbers = #tpu.dot_dimension_numbers<[1], [0], [0], [1], [0, 0, 1, 1], [], []>} : vector<64x96xf32>, vector<96x128xf32>, vector<64x128xf32> -> vector<64x128xf32>
    %c2_286 = arith.constant 2 : index
    %c1_287 = arith.constant 1 : index
    %c0_288 = arith.constant 0 : index
    %c0_289 = arith.constant 0 : index
    %380 = vector.load %arg7[%c2_286, %c1_287, %c0_288, %c0_289] : memref<4x3x64x1xf32, #tpu.memory_space<vmem>>, vector<1x1x64x1xf32>
    %381 = vector.shape_cast %380 : vector<1x1x64x1xf32> to vector<64x1xf32>
    %382 = vector.broadcast %381 : vector<64x1xf32> to vector<64x128xf32>
    %383 = arith.addf %379, %382 : vector<64x128xf32>
    %384 = vector.extract_strided_slice %383 {offsets = [0, 0], sizes = [32, 128], strides = [1, 1]} : vector<64x128xf32> to vector<32x128xf32>
    %385 = math.tanh %384 : vector<32x128xf32>
    %386 = vector.extract_strided_slice %383 {offsets = [32, 0], sizes = [32, 128], strides = [1, 1]} : vector<64x128xf32> to vector<32x128xf32>
    %387 = arith.negf %386 : vector<32x128xf32>
    %388 = math.exp %387 : vector<32x128xf32>
    %cst_290 = arith.constant 1.000000e+00 : f32
    %389 = vector.broadcast %cst_290 : f32 to vector<32x128xf32>
    %390 = arith.addf %389, %388 : vector<32x128xf32>
    %391 = arith.divf %389, %390 : vector<32x128xf32>
    %392 = arith.mulf %385, %391 : vector<32x128xf32>
    %c2_291 = arith.constant 2 : index
    %c1_292 = arith.constant 1 : index
    %c0_293 = arith.constant 0 : index
    %c0_294 = arith.constant 0 : index
    %393 = vector.load %arg8[%c2_291, %c1_292, %c0_293, %c0_294] : memref<4x3x64x32xf32, #tpu.memory_space<vmem>>, vector<1x1x64x32xf32>
    %394 = vector.shape_cast %393 : vector<1x1x64x32xf32> to vector<64x32xf32>
    %cst_295 = arith.constant dense<0.000000e+00> : vector<64x128xf32>
    %395 = tpu.matmul %394, %392, %cst_295 {dimension_numbers = #tpu.dot_dimension_numbers<[1], [0], [0], [1], [0, 0, 1, 1], [], []>} : vector<64x32xf32>, vector<32x128xf32>, vector<64x128xf32> -> vector<64x128xf32>
    %c2_296 = arith.constant 2 : index
    %c1_297 = arith.constant 1 : index
    %c0_298 = arith.constant 0 : index
    %c0_299 = arith.constant 0 : index
    %396 = vector.load %arg9[%c2_296, %c1_297, %c0_298, %c0_299] : memref<4x3x64x1xf32, #tpu.memory_space<vmem>>, vector<1x1x64x1xf32>
    %397 = vector.shape_cast %396 : vector<1x1x64x1xf32> to vector<64x1xf32>
    %398 = vector.broadcast %397 : vector<64x1xf32> to vector<64x128xf32>
    %399 = arith.addf %395, %398 : vector<64x128xf32>
    %400 = vector.extract_strided_slice %399 {offsets = [0, 0], sizes = [32, 128], strides = [1, 1]} : vector<64x128xf32> to vector<32x128xf32>
    %401 = arith.addf %359, %400 : vector<32x128xf32>
    %402 = vector.broadcast %0 : vector<1x128xf32> to vector<32x128xf32>
    %403 = arith.mulf %401, %402 : vector<32x128xf32>
    %404 = vector.extract_strided_slice %399 {offsets = [32, 0], sizes = [32, 128], strides = [1, 1]} : vector<64x128xf32> to vector<32x128xf32>
    %405 = arith.addf %361, %404 : vector<32x128xf32>
    %c1_i32_300 = arith.constant 1 : i32
    %406 = tpu.dynamic_rotate %403 by %c1_i32_300 dim 1 : vector<32x128xf32>, i32 -> vector<32x128xf32>
    %c2_301 = arith.constant 2 : index
    %c0_302 = arith.constant 0 : index
    %c0_303 = arith.constant 0 : index
    %c0_304 = arith.constant 0 : index
    %407 = vector.load %arg3[%c2_301, %c0_302, %c0_303, %c0_304] : memref<3x3x1x128xf32, #tpu.memory_space<vmem>>, vector<1x1x1x128xf32>
    %408 = vector.shape_cast %407 : vector<1x1x1x128xf32> to vector<1x128xf32>
    %409 = vector.broadcast %408 : vector<1x128xf32> to vector<32x128xf32>
    %410 = arith.mulf %406, %409 : vector<32x128xf32>
    %c2_305 = arith.constant 2 : index
    %c1_306 = arith.constant 1 : index
    %c0_307 = arith.constant 0 : index
    %c0_308 = arith.constant 0 : index
    %411 = vector.load %arg3[%c2_305, %c1_306, %c0_307, %c0_308] : memref<3x3x1x128xf32, #tpu.memory_space<vmem>>, vector<1x1x1x128xf32>
    %412 = vector.shape_cast %411 : vector<1x1x1x128xf32> to vector<1x128xf32>
    %413 = vector.broadcast %412 : vector<1x128xf32> to vector<32x128xf32>
    %414 = arith.mulf %403, %413 : vector<32x128xf32>
    %c127_i32_309 = arith.constant 127 : i32
    %415 = tpu.dynamic_rotate %403 by %c127_i32_309 dim 1 : vector<32x128xf32>, i32 -> vector<32x128xf32>
    %c2_310 = arith.constant 2 : index
    %c2_311 = arith.constant 2 : index
    %c0_312 = arith.constant 0 : index
    %c0_313 = arith.constant 0 : index
    %416 = vector.load %arg3[%c2_310, %c2_311, %c0_312, %c0_313] : memref<3x3x1x128xf32, #tpu.memory_space<vmem>>, vector<1x1x1x128xf32>
    %417 = vector.shape_cast %416 : vector<1x1x1x128xf32> to vector<1x128xf32>
    %418 = vector.broadcast %417 : vector<1x128xf32> to vector<32x128xf32>
    %419 = arith.mulf %415, %418 : vector<32x128xf32>
    %420 = tpu.concatenate %410, %414, %419 in 0 : vector<32x128xf32>, vector<32x128xf32>, vector<32x128xf32> -> vector<96x128xf32>
    %c2_314 = arith.constant 2 : index
    %c2_315 = arith.constant 2 : index
    %c0_316 = arith.constant 0 : index
    %c0_317 = arith.constant 0 : index
    %421 = vector.load %arg6[%c2_314, %c2_315, %c0_316, %c0_317] : memref<4x3x64x96xf32, #tpu.memory_space<vmem>>, vector<1x1x64x96xf32>
    %422 = vector.shape_cast %421 : vector<1x1x64x96xf32> to vector<64x96xf32>
    %cst_318 = arith.constant dense<0.000000e+00> : vector<64x128xf32>
    %423 = tpu.matmul %422, %420, %cst_318 {dimension_numbers = #tpu.dot_dimension_numbers<[1], [0], [0], [1], [0, 0, 1, 1], [], []>} : vector<64x96xf32>, vector<96x128xf32>, vector<64x128xf32> -> vector<64x128xf32>
    %c2_319 = arith.constant 2 : index
    %c2_320 = arith.constant 2 : index
    %c0_321 = arith.constant 0 : index
    %c0_322 = arith.constant 0 : index
    %424 = vector.load %arg7[%c2_319, %c2_320, %c0_321, %c0_322] : memref<4x3x64x1xf32, #tpu.memory_space<vmem>>, vector<1x1x64x1xf32>
    %425 = vector.shape_cast %424 : vector<1x1x64x1xf32> to vector<64x1xf32>
    %426 = vector.broadcast %425 : vector<64x1xf32> to vector<64x128xf32>
    %427 = arith.addf %423, %426 : vector<64x128xf32>
    %428 = vector.extract_strided_slice %427 {offsets = [0, 0], sizes = [32, 128], strides = [1, 1]} : vector<64x128xf32> to vector<32x128xf32>
    %429 = math.tanh %428 : vector<32x128xf32>
    %430 = vector.extract_strided_slice %427 {offsets = [32, 0], sizes = [32, 128], strides = [1, 1]} : vector<64x128xf32> to vector<32x128xf32>
    %431 = arith.negf %430 : vector<32x128xf32>
    %432 = math.exp %431 : vector<32x128xf32>
    %cst_323 = arith.constant 1.000000e+00 : f32
    %433 = vector.broadcast %cst_323 : f32 to vector<32x128xf32>
    %434 = arith.addf %433, %432 : vector<32x128xf32>
    %435 = arith.divf %433, %434 : vector<32x128xf32>
    %436 = arith.mulf %429, %435 : vector<32x128xf32>
    %c2_324 = arith.constant 2 : index
    %c2_325 = arith.constant 2 : index
    %c0_326 = arith.constant 0 : index
    %c0_327 = arith.constant 0 : index
    %437 = vector.load %arg8[%c2_324, %c2_325, %c0_326, %c0_327] : memref<4x3x64x32xf32, #tpu.memory_space<vmem>>, vector<1x1x64x32xf32>
    %438 = vector.shape_cast %437 : vector<1x1x64x32xf32> to vector<64x32xf32>
    %cst_328 = arith.constant dense<0.000000e+00> : vector<64x128xf32>
    %439 = tpu.matmul %438, %436, %cst_328 {dimension_numbers = #tpu.dot_dimension_numbers<[1], [0], [0], [1], [0, 0, 1, 1], [], []>} : vector<64x32xf32>, vector<32x128xf32>, vector<64x128xf32> -> vector<64x128xf32>
    %c2_329 = arith.constant 2 : index
    %c2_330 = arith.constant 2 : index
    %c0_331 = arith.constant 0 : index
    %c0_332 = arith.constant 0 : index
    %440 = vector.load %arg9[%c2_329, %c2_330, %c0_331, %c0_332] : memref<4x3x64x1xf32, #tpu.memory_space<vmem>>, vector<1x1x64x1xf32>
    %441 = vector.shape_cast %440 : vector<1x1x64x1xf32> to vector<64x1xf32>
    %442 = vector.broadcast %441 : vector<64x1xf32> to vector<64x128xf32>
    %443 = arith.addf %439, %442 : vector<64x128xf32>
    %444 = vector.extract_strided_slice %443 {offsets = [32, 0], sizes = [32, 128], strides = [1, 1]} : vector<64x128xf32> to vector<32x128xf32>
    %445 = arith.addf %405, %444 : vector<32x128xf32>
    %446 = vector.broadcast %0 : vector<1x128xf32> to vector<32x128xf32>
    %447 = arith.mulf %445, %446 : vector<32x128xf32>
    %c2_333 = arith.constant 2 : index
    %c0_334 = arith.constant 0 : index
    %c0_335 = arith.constant 0 : index
    %448 = vector.load %arg10[%c2_333, %c0_334, %c0_335] : memref<4x2x32xf32, #tpu.memory_space<vmem>>, vector<1x2x32xf32>
    %449 = vector.shape_cast %448 : vector<1x2x32xf32> to vector<2x32xf32>
    %cst_336 = arith.constant dense<0.000000e+00> : vector<2x128xf32>
    %450 = tpu.matmul %449, %447, %cst_336 {dimension_numbers = #tpu.dot_dimension_numbers<[1], [0], [0], [1], [0, 0, 1, 1], [], []>} : vector<2x32xf32>, vector<32x128xf32>, vector<2x128xf32> -> vector<2x128xf32>
    %c2_337 = arith.constant 2 : index
    %c0_338 = arith.constant 0 : index
    %c0_339 = arith.constant 0 : index
    %451 = vector.load %arg11[%c2_337, %c0_338, %c0_339] : memref<4x2x1xf32, #tpu.memory_space<vmem>>, vector<1x2x1xf32>
    %452 = vector.shape_cast %451 : vector<1x2x1xf32> to vector<2x1xf32>
    %453 = vector.broadcast %452 : vector<2x1xf32> to vector<2x128xf32>
    %454 = arith.addf %450, %453 : vector<2x128xf32>
    %455 = vector.broadcast %0 : vector<1x128xf32> to vector<2x128xf32>
    %456 = arith.mulf %454, %455 : vector<2x128xf32>
    %457 = vector.broadcast %0 : vector<1x128xf32> to vector<2x128xf32>
    %458 = arith.mulf %155, %457 : vector<2x128xf32>
    %459 = arith.addf %456, %458 : vector<2x128xf32>
    %c3 = arith.constant 3 : index
    %c0_340 = arith.constant 0 : index
    %c0_341 = arith.constant 0 : index
    %460 = vector.load %arg4[%c3, %c0_340, %c0_341] : memref<4x32x2xf32, #tpu.memory_space<vmem>>, vector<1x32x2xf32>
    %461 = vector.shape_cast %460 : vector<1x32x2xf32> to vector<32x2xf32>
    %cst_342 = arith.constant dense<0.000000e+00> : vector<32x128xf32>
    %462 = tpu.matmul %461, %459, %cst_342 {dimension_numbers = #tpu.dot_dimension_numbers<[1], [0], [0], [1], [0, 0, 1, 1], [], []>} : vector<32x2xf32>, vector<2x128xf32>, vector<32x128xf32> -> vector<32x128xf32>
    %c3_343 = arith.constant 3 : index
    %c0_344 = arith.constant 0 : index
    %c0_345 = arith.constant 0 : index
    %463 = vector.load %arg5[%c3_343, %c0_344, %c0_345] : memref<4x32x1xf32, #tpu.memory_space<vmem>>, vector<1x32x1xf32>
    %464 = vector.shape_cast %463 : vector<1x32x1xf32> to vector<32x1xf32>
    %465 = vector.broadcast %464 : vector<32x1xf32> to vector<32x128xf32>
    %466 = arith.addf %462, %465 : vector<32x128xf32>
    %467 = vector.broadcast %0 : vector<1x128xf32> to vector<32x128xf32>
    %468 = arith.mulf %466, %467 : vector<32x128xf32>
    %cst_346 = arith.constant 0.000000e+00 : f32
    %469 = vector.broadcast %cst_346 : f32 to vector<32x128xf32>
    %c1_i32_347 = arith.constant 1 : i32
    %470 = tpu.dynamic_rotate %468 by %c1_i32_347 dim 1 : vector<32x128xf32>, i32 -> vector<32x128xf32>
    %c0_348 = arith.constant 0 : index
    %c0_349 = arith.constant 0 : index
    %c0_350 = arith.constant 0 : index
    %c0_351 = arith.constant 0 : index
    %471 = vector.load %arg3[%c0_348, %c0_349, %c0_350, %c0_351] : memref<3x3x1x128xf32, #tpu.memory_space<vmem>>, vector<1x1x1x128xf32>
    %472 = vector.shape_cast %471 : vector<1x1x1x128xf32> to vector<1x128xf32>
    %473 = vector.broadcast %472 : vector<1x128xf32> to vector<32x128xf32>
    %474 = arith.mulf %470, %473 : vector<32x128xf32>
    %c0_352 = arith.constant 0 : index
    %c1_353 = arith.constant 1 : index
    %c0_354 = arith.constant 0 : index
    %c0_355 = arith.constant 0 : index
    %475 = vector.load %arg3[%c0_352, %c1_353, %c0_354, %c0_355] : memref<3x3x1x128xf32, #tpu.memory_space<vmem>>, vector<1x1x1x128xf32>
    %476 = vector.shape_cast %475 : vector<1x1x1x128xf32> to vector<1x128xf32>
    %477 = vector.broadcast %476 : vector<1x128xf32> to vector<32x128xf32>
    %478 = arith.mulf %468, %477 : vector<32x128xf32>
    %c127_i32_356 = arith.constant 127 : i32
    %479 = tpu.dynamic_rotate %468 by %c127_i32_356 dim 1 : vector<32x128xf32>, i32 -> vector<32x128xf32>
    %c0_357 = arith.constant 0 : index
    %c2_358 = arith.constant 2 : index
    %c0_359 = arith.constant 0 : index
    %c0_360 = arith.constant 0 : index
    %480 = vector.load %arg3[%c0_357, %c2_358, %c0_359, %c0_360] : memref<3x3x1x128xf32, #tpu.memory_space<vmem>>, vector<1x1x1x128xf32>
    %481 = vector.shape_cast %480 : vector<1x1x1x128xf32> to vector<1x128xf32>
    %482 = vector.broadcast %481 : vector<1x128xf32> to vector<32x128xf32>
    %483 = arith.mulf %479, %482 : vector<32x128xf32>
    %484 = tpu.concatenate %474, %478, %483 in 0 : vector<32x128xf32>, vector<32x128xf32>, vector<32x128xf32> -> vector<96x128xf32>
    %c3_361 = arith.constant 3 : index
    %c0_362 = arith.constant 0 : index
    %c0_363 = arith.constant 0 : index
    %c0_364 = arith.constant 0 : index
    %485 = vector.load %arg6[%c3_361, %c0_362, %c0_363, %c0_364] : memref<4x3x64x96xf32, #tpu.memory_space<vmem>>, vector<1x1x64x96xf32>
    %486 = vector.shape_cast %485 : vector<1x1x64x96xf32> to vector<64x96xf32>
    %cst_365 = arith.constant dense<0.000000e+00> : vector<64x128xf32>
    %487 = tpu.matmul %486, %484, %cst_365 {dimension_numbers = #tpu.dot_dimension_numbers<[1], [0], [0], [1], [0, 0, 1, 1], [], []>} : vector<64x96xf32>, vector<96x128xf32>, vector<64x128xf32> -> vector<64x128xf32>
    %c3_366 = arith.constant 3 : index
    %c0_367 = arith.constant 0 : index
    %c0_368 = arith.constant 0 : index
    %c0_369 = arith.constant 0 : index
    %488 = vector.load %arg7[%c3_366, %c0_367, %c0_368, %c0_369] : memref<4x3x64x1xf32, #tpu.memory_space<vmem>>, vector<1x1x64x1xf32>
    %489 = vector.shape_cast %488 : vector<1x1x64x1xf32> to vector<64x1xf32>
    %490 = vector.broadcast %489 : vector<64x1xf32> to vector<64x128xf32>
    %491 = arith.addf %487, %490 : vector<64x128xf32>
    %492 = vector.extract_strided_slice %491 {offsets = [0, 0], sizes = [32, 128], strides = [1, 1]} : vector<64x128xf32> to vector<32x128xf32>
    %493 = math.tanh %492 : vector<32x128xf32>
    %494 = vector.extract_strided_slice %491 {offsets = [32, 0], sizes = [32, 128], strides = [1, 1]} : vector<64x128xf32> to vector<32x128xf32>
    %495 = arith.negf %494 : vector<32x128xf32>
    %496 = math.exp %495 : vector<32x128xf32>
    %cst_370 = arith.constant 1.000000e+00 : f32
    %497 = vector.broadcast %cst_370 : f32 to vector<32x128xf32>
    %498 = arith.addf %497, %496 : vector<32x128xf32>
    %499 = arith.divf %497, %498 : vector<32x128xf32>
    %500 = arith.mulf %493, %499 : vector<32x128xf32>
    %c3_371 = arith.constant 3 : index
    %c0_372 = arith.constant 0 : index
    %c0_373 = arith.constant 0 : index
    %c0_374 = arith.constant 0 : index
    %501 = vector.load %arg8[%c3_371, %c0_372, %c0_373, %c0_374] : memref<4x3x64x32xf32, #tpu.memory_space<vmem>>, vector<1x1x64x32xf32>
    %502 = vector.shape_cast %501 : vector<1x1x64x32xf32> to vector<64x32xf32>
    %cst_375 = arith.constant dense<0.000000e+00> : vector<64x128xf32>
    %503 = tpu.matmul %502, %500, %cst_375 {dimension_numbers = #tpu.dot_dimension_numbers<[1], [0], [0], [1], [0, 0, 1, 1], [], []>} : vector<64x32xf32>, vector<32x128xf32>, vector<64x128xf32> -> vector<64x128xf32>
    %c3_376 = arith.constant 3 : index
    %c0_377 = arith.constant 0 : index
    %c0_378 = arith.constant 0 : index
    %c0_379 = arith.constant 0 : index
    %504 = vector.load %arg9[%c3_376, %c0_377, %c0_378, %c0_379] : memref<4x3x64x1xf32, #tpu.memory_space<vmem>>, vector<1x1x64x1xf32>
    %505 = vector.shape_cast %504 : vector<1x1x64x1xf32> to vector<64x1xf32>
    %506 = vector.broadcast %505 : vector<64x1xf32> to vector<64x128xf32>
    %507 = arith.addf %503, %506 : vector<64x128xf32>
    %508 = vector.extract_strided_slice %507 {offsets = [0, 0], sizes = [32, 128], strides = [1, 1]} : vector<64x128xf32> to vector<32x128xf32>
    %509 = arith.addf %468, %508 : vector<32x128xf32>
    %510 = vector.broadcast %0 : vector<1x128xf32> to vector<32x128xf32>
    %511 = arith.mulf %509, %510 : vector<32x128xf32>
    %512 = vector.extract_strided_slice %507 {offsets = [32, 0], sizes = [32, 128], strides = [1, 1]} : vector<64x128xf32> to vector<32x128xf32>
    %513 = arith.addf %469, %512 : vector<32x128xf32>
    %c1_i32_380 = arith.constant 1 : i32
    %514 = tpu.dynamic_rotate %511 by %c1_i32_380 dim 1 : vector<32x128xf32>, i32 -> vector<32x128xf32>
    %c1_381 = arith.constant 1 : index
    %c0_382 = arith.constant 0 : index
    %c0_383 = arith.constant 0 : index
    %c0_384 = arith.constant 0 : index
    %515 = vector.load %arg3[%c1_381, %c0_382, %c0_383, %c0_384] : memref<3x3x1x128xf32, #tpu.memory_space<vmem>>, vector<1x1x1x128xf32>
    %516 = vector.shape_cast %515 : vector<1x1x1x128xf32> to vector<1x128xf32>
    %517 = vector.broadcast %516 : vector<1x128xf32> to vector<32x128xf32>
    %518 = arith.mulf %514, %517 : vector<32x128xf32>
    %c1_385 = arith.constant 1 : index
    %c1_386 = arith.constant 1 : index
    %c0_387 = arith.constant 0 : index
    %c0_388 = arith.constant 0 : index
    %519 = vector.load %arg3[%c1_385, %c1_386, %c0_387, %c0_388] : memref<3x3x1x128xf32, #tpu.memory_space<vmem>>, vector<1x1x1x128xf32>
    %520 = vector.shape_cast %519 : vector<1x1x1x128xf32> to vector<1x128xf32>
    %521 = vector.broadcast %520 : vector<1x128xf32> to vector<32x128xf32>
    %522 = arith.mulf %511, %521 : vector<32x128xf32>
    %c127_i32_389 = arith.constant 127 : i32
    %523 = tpu.dynamic_rotate %511 by %c127_i32_389 dim 1 : vector<32x128xf32>, i32 -> vector<32x128xf32>
    %c1_390 = arith.constant 1 : index
    %c2_391 = arith.constant 2 : index
    %c0_392 = arith.constant 0 : index
    %c0_393 = arith.constant 0 : index
    %524 = vector.load %arg3[%c1_390, %c2_391, %c0_392, %c0_393] : memref<3x3x1x128xf32, #tpu.memory_space<vmem>>, vector<1x1x1x128xf32>
    %525 = vector.shape_cast %524 : vector<1x1x1x128xf32> to vector<1x128xf32>
    %526 = vector.broadcast %525 : vector<1x128xf32> to vector<32x128xf32>
    %527 = arith.mulf %523, %526 : vector<32x128xf32>
    %528 = tpu.concatenate %518, %522, %527 in 0 : vector<32x128xf32>, vector<32x128xf32>, vector<32x128xf32> -> vector<96x128xf32>
    %c3_394 = arith.constant 3 : index
    %c1_395 = arith.constant 1 : index
    %c0_396 = arith.constant 0 : index
    %c0_397 = arith.constant 0 : index
    %529 = vector.load %arg6[%c3_394, %c1_395, %c0_396, %c0_397] : memref<4x3x64x96xf32, #tpu.memory_space<vmem>>, vector<1x1x64x96xf32>
    %530 = vector.shape_cast %529 : vector<1x1x64x96xf32> to vector<64x96xf32>
    %cst_398 = arith.constant dense<0.000000e+00> : vector<64x128xf32>
    %531 = tpu.matmul %530, %528, %cst_398 {dimension_numbers = #tpu.dot_dimension_numbers<[1], [0], [0], [1], [0, 0, 1, 1], [], []>} : vector<64x96xf32>, vector<96x128xf32>, vector<64x128xf32> -> vector<64x128xf32>
    %c3_399 = arith.constant 3 : index
    %c1_400 = arith.constant 1 : index
    %c0_401 = arith.constant 0 : index
    %c0_402 = arith.constant 0 : index
    %532 = vector.load %arg7[%c3_399, %c1_400, %c0_401, %c0_402] : memref<4x3x64x1xf32, #tpu.memory_space<vmem>>, vector<1x1x64x1xf32>
    %533 = vector.shape_cast %532 : vector<1x1x64x1xf32> to vector<64x1xf32>
    %534 = vector.broadcast %533 : vector<64x1xf32> to vector<64x128xf32>
    %535 = arith.addf %531, %534 : vector<64x128xf32>
    %536 = vector.extract_strided_slice %535 {offsets = [0, 0], sizes = [32, 128], strides = [1, 1]} : vector<64x128xf32> to vector<32x128xf32>
    %537 = math.tanh %536 : vector<32x128xf32>
    %538 = vector.extract_strided_slice %535 {offsets = [32, 0], sizes = [32, 128], strides = [1, 1]} : vector<64x128xf32> to vector<32x128xf32>
    %539 = arith.negf %538 : vector<32x128xf32>
    %540 = math.exp %539 : vector<32x128xf32>
    %cst_403 = arith.constant 1.000000e+00 : f32
    %541 = vector.broadcast %cst_403 : f32 to vector<32x128xf32>
    %542 = arith.addf %541, %540 : vector<32x128xf32>
    %543 = arith.divf %541, %542 : vector<32x128xf32>
    %544 = arith.mulf %537, %543 : vector<32x128xf32>
    %c3_404 = arith.constant 3 : index
    %c1_405 = arith.constant 1 : index
    %c0_406 = arith.constant 0 : index
    %c0_407 = arith.constant 0 : index
    %545 = vector.load %arg8[%c3_404, %c1_405, %c0_406, %c0_407] : memref<4x3x64x32xf32, #tpu.memory_space<vmem>>, vector<1x1x64x32xf32>
    %546 = vector.shape_cast %545 : vector<1x1x64x32xf32> to vector<64x32xf32>
    %cst_408 = arith.constant dense<0.000000e+00> : vector<64x128xf32>
    %547 = tpu.matmul %546, %544, %cst_408 {dimension_numbers = #tpu.dot_dimension_numbers<[1], [0], [0], [1], [0, 0, 1, 1], [], []>} : vector<64x32xf32>, vector<32x128xf32>, vector<64x128xf32> -> vector<64x128xf32>
    %c3_409 = arith.constant 3 : index
    %c1_410 = arith.constant 1 : index
    %c0_411 = arith.constant 0 : index
    %c0_412 = arith.constant 0 : index
    %548 = vector.load %arg9[%c3_409, %c1_410, %c0_411, %c0_412] : memref<4x3x64x1xf32, #tpu.memory_space<vmem>>, vector<1x1x64x1xf32>
    %549 = vector.shape_cast %548 : vector<1x1x64x1xf32> to vector<64x1xf32>
    %550 = vector.broadcast %549 : vector<64x1xf32> to vector<64x128xf32>
    %551 = arith.addf %547, %550 : vector<64x128xf32>
    %552 = vector.extract_strided_slice %551 {offsets = [0, 0], sizes = [32, 128], strides = [1, 1]} : vector<64x128xf32> to vector<32x128xf32>
    %553 = arith.addf %511, %552 : vector<32x128xf32>
    %554 = vector.broadcast %0 : vector<1x128xf32> to vector<32x128xf32>
    %555 = arith.mulf %553, %554 : vector<32x128xf32>
    %556 = vector.extract_strided_slice %551 {offsets = [32, 0], sizes = [32, 128], strides = [1, 1]} : vector<64x128xf32> to vector<32x128xf32>
    %557 = arith.addf %513, %556 : vector<32x128xf32>
    %c1_i32_413 = arith.constant 1 : i32
    %558 = tpu.dynamic_rotate %555 by %c1_i32_413 dim 1 : vector<32x128xf32>, i32 -> vector<32x128xf32>
    %c2_414 = arith.constant 2 : index
    %c0_415 = arith.constant 0 : index
    %c0_416 = arith.constant 0 : index
    %c0_417 = arith.constant 0 : index
    %559 = vector.load %arg3[%c2_414, %c0_415, %c0_416, %c0_417] : memref<3x3x1x128xf32, #tpu.memory_space<vmem>>, vector<1x1x1x128xf32>
    %560 = vector.shape_cast %559 : vector<1x1x1x128xf32> to vector<1x128xf32>
    %561 = vector.broadcast %560 : vector<1x128xf32> to vector<32x128xf32>
    %562 = arith.mulf %558, %561 : vector<32x128xf32>
    %c2_418 = arith.constant 2 : index
    %c1_419 = arith.constant 1 : index
    %c0_420 = arith.constant 0 : index
    %c0_421 = arith.constant 0 : index
    %563 = vector.load %arg3[%c2_418, %c1_419, %c0_420, %c0_421] : memref<3x3x1x128xf32, #tpu.memory_space<vmem>>, vector<1x1x1x128xf32>
    %564 = vector.shape_cast %563 : vector<1x1x1x128xf32> to vector<1x128xf32>
    %565 = vector.broadcast %564 : vector<1x128xf32> to vector<32x128xf32>
    %566 = arith.mulf %555, %565 : vector<32x128xf32>
    %c127_i32_422 = arith.constant 127 : i32
    %567 = tpu.dynamic_rotate %555 by %c127_i32_422 dim 1 : vector<32x128xf32>, i32 -> vector<32x128xf32>
    %c2_423 = arith.constant 2 : index
    %c2_424 = arith.constant 2 : index
    %c0_425 = arith.constant 0 : index
    %c0_426 = arith.constant 0 : index
    %568 = vector.load %arg3[%c2_423, %c2_424, %c0_425, %c0_426] : memref<3x3x1x128xf32, #tpu.memory_space<vmem>>, vector<1x1x1x128xf32>
    %569 = vector.shape_cast %568 : vector<1x1x1x128xf32> to vector<1x128xf32>
    %570 = vector.broadcast %569 : vector<1x128xf32> to vector<32x128xf32>
    %571 = arith.mulf %567, %570 : vector<32x128xf32>
    %572 = tpu.concatenate %562, %566, %571 in 0 : vector<32x128xf32>, vector<32x128xf32>, vector<32x128xf32> -> vector<96x128xf32>
    %c3_427 = arith.constant 3 : index
    %c2_428 = arith.constant 2 : index
    %c0_429 = arith.constant 0 : index
    %c0_430 = arith.constant 0 : index
    %573 = vector.load %arg6[%c3_427, %c2_428, %c0_429, %c0_430] : memref<4x3x64x96xf32, #tpu.memory_space<vmem>>, vector<1x1x64x96xf32>
    %574 = vector.shape_cast %573 : vector<1x1x64x96xf32> to vector<64x96xf32>
    %cst_431 = arith.constant dense<0.000000e+00> : vector<64x128xf32>
    %575 = tpu.matmul %574, %572, %cst_431 {dimension_numbers = #tpu.dot_dimension_numbers<[1], [0], [0], [1], [0, 0, 1, 1], [], []>} : vector<64x96xf32>, vector<96x128xf32>, vector<64x128xf32> -> vector<64x128xf32>
    %c3_432 = arith.constant 3 : index
    %c2_433 = arith.constant 2 : index
    %c0_434 = arith.constant 0 : index
    %c0_435 = arith.constant 0 : index
    %576 = vector.load %arg7[%c3_432, %c2_433, %c0_434, %c0_435] : memref<4x3x64x1xf32, #tpu.memory_space<vmem>>, vector<1x1x64x1xf32>
    %577 = vector.shape_cast %576 : vector<1x1x64x1xf32> to vector<64x1xf32>
    %578 = vector.broadcast %577 : vector<64x1xf32> to vector<64x128xf32>
    %579 = arith.addf %575, %578 : vector<64x128xf32>
    %580 = vector.extract_strided_slice %579 {offsets = [0, 0], sizes = [32, 128], strides = [1, 1]} : vector<64x128xf32> to vector<32x128xf32>
    %581 = math.tanh %580 : vector<32x128xf32>
    %582 = vector.extract_strided_slice %579 {offsets = [32, 0], sizes = [32, 128], strides = [1, 1]} : vector<64x128xf32> to vector<32x128xf32>
    %583 = arith.negf %582 : vector<32x128xf32>
    %584 = math.exp %583 : vector<32x128xf32>
    %cst_436 = arith.constant 1.000000e+00 : f32
    %585 = vector.broadcast %cst_436 : f32 to vector<32x128xf32>
    %586 = arith.addf %585, %584 : vector<32x128xf32>
    %587 = arith.divf %585, %586 : vector<32x128xf32>
    %588 = arith.mulf %581, %587 : vector<32x128xf32>
    %c3_437 = arith.constant 3 : index
    %c2_438 = arith.constant 2 : index
    %c0_439 = arith.constant 0 : index
    %c0_440 = arith.constant 0 : index
    %589 = vector.load %arg8[%c3_437, %c2_438, %c0_439, %c0_440] : memref<4x3x64x32xf32, #tpu.memory_space<vmem>>, vector<1x1x64x32xf32>
    %590 = vector.shape_cast %589 : vector<1x1x64x32xf32> to vector<64x32xf32>
    %cst_441 = arith.constant dense<0.000000e+00> : vector<64x128xf32>
    %591 = tpu.matmul %590, %588, %cst_441 {dimension_numbers = #tpu.dot_dimension_numbers<[1], [0], [0], [1], [0, 0, 1, 1], [], []>} : vector<64x32xf32>, vector<32x128xf32>, vector<64x128xf32> -> vector<64x128xf32>
    %c3_442 = arith.constant 3 : index
    %c2_443 = arith.constant 2 : index
    %c0_444 = arith.constant 0 : index
    %c0_445 = arith.constant 0 : index
    %592 = vector.load %arg9[%c3_442, %c2_443, %c0_444, %c0_445] : memref<4x3x64x1xf32, #tpu.memory_space<vmem>>, vector<1x1x64x1xf32>
    %593 = vector.shape_cast %592 : vector<1x1x64x1xf32> to vector<64x1xf32>
    %594 = vector.broadcast %593 : vector<64x1xf32> to vector<64x128xf32>
    %595 = arith.addf %591, %594 : vector<64x128xf32>
    %596 = vector.extract_strided_slice %595 {offsets = [32, 0], sizes = [32, 128], strides = [1, 1]} : vector<64x128xf32> to vector<32x128xf32>
    %597 = arith.addf %557, %596 : vector<32x128xf32>
    %598 = vector.broadcast %0 : vector<1x128xf32> to vector<32x128xf32>
    %599 = arith.mulf %597, %598 : vector<32x128xf32>
    %c3_446 = arith.constant 3 : index
    %c0_447 = arith.constant 0 : index
    %c0_448 = arith.constant 0 : index
    %600 = vector.load %arg10[%c3_446, %c0_447, %c0_448] : memref<4x2x32xf32, #tpu.memory_space<vmem>>, vector<1x2x32xf32>
    %601 = vector.shape_cast %600 : vector<1x2x32xf32> to vector<2x32xf32>
    %cst_449 = arith.constant dense<0.000000e+00> : vector<2x128xf32>
    %602 = tpu.matmul %601, %599, %cst_449 {dimension_numbers = #tpu.dot_dimension_numbers<[1], [0], [0], [1], [0, 0, 1, 1], [], []>} : vector<2x32xf32>, vector<32x128xf32>, vector<2x128xf32> -> vector<2x128xf32>
    %c3_450 = arith.constant 3 : index
    %c0_451 = arith.constant 0 : index
    %c0_452 = arith.constant 0 : index
    %603 = vector.load %arg11[%c3_450, %c0_451, %c0_452] : memref<4x2x1xf32, #tpu.memory_space<vmem>>, vector<1x2x1xf32>
    %604 = vector.shape_cast %603 : vector<1x2x1xf32> to vector<2x1xf32>
    %605 = vector.broadcast %604 : vector<2x1xf32> to vector<2x128xf32>
    %606 = arith.addf %602, %605 : vector<2x128xf32>
    %607 = vector.broadcast %0 : vector<1x128xf32> to vector<2x128xf32>
    %608 = arith.mulf %606, %607 : vector<2x128xf32>
    %609 = vector.broadcast %0 : vector<1x128xf32> to vector<2x128xf32>
    %610 = arith.mulf %307, %609 : vector<2x128xf32>
    %611 = arith.addf %608, %610 : vector<2x128xf32>
    %612 = tpu.concatenate %611, %459 in 0 : vector<2x128xf32>, vector<2x128xf32> -> vector<4x128xf32>
    %c0_453 = arith.constant 0 : index
    %c0_454 = arith.constant 0 : index
    %613 = vector.load %arg12[%c0_453, %c0_454] : memref<4x128xf32, #tpu.memory_space<vmem>>, vector<4x128xf32>
    tpu.vector_store %arg12[%c0_453, %c0_454], %612 {strides = array<i32>} : memref<4x128xf32, #tpu.memory_space<vmem>>, vector<4x128xf32>,
    return
  }
  func.func @transform_0(%arg0: i32) -> (i32, i32) {
    %c0_i32 = arith.constant 0 : i32
    %c0_i32_0 = arith.constant 0 : i32
    %c0_i32_1 = arith.constant 0 : i32
    return %c0_i32, %c0_i32_0 : i32, i32
  }
  func.func @transform_1(%arg0: i32) -> (i32, i32) {
    %c0_i32 = arith.constant 0 : i32
    %c0_i32_0 = arith.constant 0 : i32
    %c0_i32_1 = arith.constant 0 : i32
    return %c0_i32, %c0_i32_0 : i32, i32
  }
  func.func @transform_2(%arg0: i32) -> (i32, i32, i32, i32) {
    %c0_i32 = arith.constant 0 : i32
    %c0_i32_0 = arith.constant 0 : i32
    %c0_i32_1 = arith.constant 0 : i32
    %c0_i32_2 = arith.constant 0 : i32
    %c0_i32_3 = arith.constant 0 : i32
    return %c0_i32, %c0_i32_0, %c0_i32_1, %c0_i32_2 : i32, i32, i32, i32
  }
  func.func @transform_3(%arg0: i32) -> (i32, i32, i32) {
    %c0_i32 = arith.constant 0 : i32
    %c0_i32_0 = arith.constant 0 : i32
    %c0_i32_1 = arith.constant 0 : i32
    %c0_i32_2 = arith.constant 0 : i32
    return %c0_i32, %c0_i32_0, %c0_i32_1 : i32, i32, i32
  }
  func.func @transform_4(%arg0: i32) -> (i32, i32, i32) {
    %c0_i32 = arith.constant 0 : i32
    %c0_i32_0 = arith.constant 0 : i32
    %c0_i32_1 = arith.constant 0 : i32
    %c0_i32_2 = arith.constant 0 : i32
    return %c0_i32, %c0_i32_0, %c0_i32_1 : i32, i32, i32
  }
  func.func @transform_5(%arg0: i32) -> (i32, i32, i32, i32) {
    %c0_i32 = arith.constant 0 : i32
    %c0_i32_0 = arith.constant 0 : i32
    %c0_i32_1 = arith.constant 0 : i32
    %c0_i32_2 = arith.constant 0 : i32
    %c0_i32_3 = arith.constant 0 : i32
    return %c0_i32, %c0_i32_0, %c0_i32_1, %c0_i32_2 : i32, i32, i32, i32
  }
  func.func @transform_6(%arg0: i32) -> (i32, i32, i32, i32) {
    %c0_i32 = arith.constant 0 : i32
    %c0_i32_0 = arith.constant 0 : i32
    %c0_i32_1 = arith.constant 0 : i32
    %c0_i32_2 = arith.constant 0 : i32
    %c0_i32_3 = arith.constant 0 : i32
    return %c0_i32, %c0_i32_0, %c0_i32_1, %c0_i32_2 : i32, i32, i32, i32
  }
  func.func @transform_7(%arg0: i32) -> (i32, i32, i32, i32) {
    %c0_i32 = arith.constant 0 : i32
    %c0_i32_0 = arith.constant 0 : i32
    %c0_i32_1 = arith.constant 0 : i32
    %c0_i32_2 = arith.constant 0 : i32
    %c0_i32_3 = arith.constant 0 : i32
    return %c0_i32, %c0_i32_0, %c0_i32_1, %c0_i32_2 : i32, i32, i32, i32
  }
  func.func @transform_8(%arg0: i32) -> (i32, i32, i32, i32) {
    %c0_i32 = arith.constant 0 : i32
    %c0_i32_0 = arith.constant 0 : i32
    %c0_i32_1 = arith.constant 0 : i32
    %c0_i32_2 = arith.constant 0 : i32
    %c0_i32_3 = arith.constant 0 : i32
    return %c0_i32, %c0_i32_0, %c0_i32_1, %c0_i32_2 : i32, i32, i32, i32
  }
  func.func @transform_9(%arg0: i32) -> (i32, i32, i32) {
    %c0_i32 = arith.constant 0 : i32
    %c0_i32_0 = arith.constant 0 : i32
    %c0_i32_1 = arith.constant 0 : i32
    %c0_i32_2 = arith.constant 0 : i32
    return %c0_i32, %c0_i32_0, %c0_i32_1 : i32, i32, i32
  }
  func.func @transform_10(%arg0: i32) -> (i32, i32, i32) {
    %c0_i32 = arith.constant 0 : i32
    %c0_i32_0 = arith.constant 0 : i32
    %c0_i32_1 = arith.constant 0 : i32
    %c0_i32_2 = arith.constant 0 : i32
    return %c0_i32, %c0_i32_0, %c0_i32_1 : i32, i32, i32
  }
  func.func @transform_11(%arg0: i32) -> (i32, i32) {
    %c0_i32 = arith.constant 0 : i32
    %c0_i32_0 = arith.constant 0 : i32
    %c0_i32_1 = arith.constant 0 : i32
    return %c0_i32, %c0_i32_0 : i32, i32
  }
}

</mosaic_0001>

<bundles_post_ra>
// kernel: residual_coupling_block_forward.1
= control target key start
LH: loop header
LB: loop body
LE: loop exit
PB: predicated region body
PF: predicated region fallthrough
CT: control target
= control target key end

     0   :  { %vm81_vm0 = vcmask 1041408   ;;  %vm68_vm1 = vcmask 15360   ;;  %v8959_v2 = vmov 0   ;;  %s8960_s18 = smov 1   ;;  %s8961_s19 = smov 127   ;;  %vm287_vm2 = vcmask 785408   ;;  %s11030_s0 = inlined_call_operand.vmem [shape: f32[4,128], index: 0, kind: input, shape index: {}]   ;;  %s11031_s3 = inlined_call_operand.vmem [shape: f32[4,32,2], index: 3, kind: input, shape index: {}]   ;;  %s11032_s4 = inlined_call_operand.vmem [shape: f32[4,32,1], index: 4, kind: input, shape index: {}]   ;;  %s11033_s1 = inlined_call_operand.vmem [shape: f32[1,128], index: 1, kind: input, shape index: {}]   ;;  %s11034_s6 = inlined_call_operand.vmem [shape: f32[4,3,64,1], index: 6, kind: input, shape index: {}]   ;;  %s11035_s5 = inlined_call_operand.vmem [shape: f32[4,3,64,96], index: 5, kind: input, shape index: {}]   ;;  %s11036_s8 = inlined_call_operand.vmem [shape: f32[4,3,64,1], index: 8, kind: input, shape index: {}]   ;;  %s11037_s2 = inlined_call_operand.vmem [shape: f32[3,3,1,128], index: 2, kind: input, shape index: {}]   ;;  %s11038_s7 = inlined_call_operand.vmem [shape: f32[4,3,64,32], index: 7, kind: input, shape index: {}]   ;;  %s11039_s10 = inlined_call_operand.vmem [shape: f32[4,2,1], index: 10, kind: input, shape index: {}]   ;;  %s11040_s9 = inlined_call_operand.vmem [shape: f32[4,2,32], index: 9, kind: input, shape index: {}]   ;;  %s11041_s11 = inlined_call_operand.vmem [shape: f32[4,128], index: 11, kind: output, shape index: {}]  }
   0x1   :  { %v39_v0 = vld [vmem:[%s11030_s0] sm:$0xf]  ;;  %8637 = vset.pattern.permute.xlu0 %v8959_v2  ;;  %8638 = vset.pattern.permute.xlu1 %v8959_v2  ;;  %v41_v3 = vld [vmem:[%s11031_s3 + $0x8] sm:$0xff]  ;;  %v42_v4 = vld [vmem:[%s11031_s3 + $0x10] sm:$0xff]  ;;  %vm505_vm3 = vcmask 261120   ;;  %vm8963_vm4 = vmmov 0  }
   0x2   :  { %v40_v1 = vld [vmem:[%s11031_s3] sm:$0xff]  ;;  %7391 = vmatprep.subr.msk.mxu0 %vm81_vm0, %v39_v0  ;;  %v46_v6 = vld [vmem:[%s11032_s4 + $0x10] sm:$0xff]  ;;  %v43_v7 = vld [vmem:[%s11031_s3 + $0x18] sm:$0xff] }
   0x3   :  { %7393 = vmatprep.mubr.msk.f32.mxu0 %vm68_vm1, %v40_v1  ;;  %7392 = vmatpush3.msk.msra.mxu0 %vm81_vm0, %v39_v0  ;;  %v44_v5 = vld [vmem:[%s11032_s4] sm:$0xff]  ;;  %v45_v8 = vld [vmem:[%s11032_s4 + $0x8] sm:$0xff]  ;;  %v47_v9 = vld [vmem:[%s11032_s4 + $0x18] sm:$0xff] }
   0x4   :  { %7394 = vmatmul.mubr.msk.f32.vlgmr.msra.gmra.mrb[0].mxu0 %vm68_vm1, %v41_v3  ;;  %50 = vperm.xlu0 %8637, %v44_v5   ;;  %v9061_v12 = vld [vmem:[%s11033_s1] ss:$0 sm:$0xff]  ;;  %v244_v27 = vld [vmem:[%s11034_s6 + $0x28] sm:$0xff]  ;;  %v246_v30 = vld [vmem:[%s11034_s6 + $0x38] sm:$0xff] }
   0x5   :  { %7396 = vmatprep.mubr.msk.f32.mxu0 %vm68_vm1, %v42_v4  ;;  %60 = vperm.xlu1 %8638, %v46_v6   ;;  %v243_v28 = vld [vmem:[%s11034_s6 + $0x20] sm:$0xff]  ;;  %v245_v31 = vld [vmem:[%s11034_s6 + $0x30] sm:$0xff]  ;;  %v240_v32 = vld [vmem:[%s11034_s6 + $0x8] sm:$0xff] }
   0x6   :  { %v231_v29 = vld [vmem:[%s11035_s5] sm:$0xff]  ;;  %v242_v34 = vld [vmem:[%s11034_s6 + $0x18] sm:$0xff]  ;;  %v241_v35 = vld [vmem:[%s11034_s6 + $0x10] sm:$0xff] }
   0x7   :  { %7423 = vmatprep.mubr.msk.f32.mxu1 %vm287_vm2, %v231_v29  ;;  %v239_v33 = vld [vmem:[%s11034_s6] sm:$0xff]  ;;  %v458_v36 = vld [vmem:[%s11036_s8 + $0x8] sm:$0xff]  ;;  %v460_v38 = vld [vmem:[%s11036_s8 + $0x18] sm:$0xff] }
   0x8   :  { %7397 = vmatmul.mubr.msk.f32.gmra.mrb[2].mxu0 %vm68_vm1, %v43_v7  ;;  %55 = vperm.xlu0 %8637, %v45_v8   ;;  %v457_v37 = vld [vmem:[%s11036_s8] sm:$0xff]  ;;  %v459_v39 = vld [vmem:[%s11036_s8 + $0x10] sm:$0xff]  ;;  %v232_v5 = vld [vmem:[%s11035_s5 + $0x8] sm:$0xff] }
   0x9   :  { %65 = vperm.xlu1 %8638, %v47_v9   ;;  %v6309_v40 = vld [vmem:[%s11037_s2] ss:$0 sm:$0xff]  ;;  %v6311_v45 = vld [vmem:[%s11037_s2 + $0x1] ss:$0 sm:$0xff]  ;;  %v6313_v59 = vld [vmem:[%s11037_s2 + $0x2] ss:$0 sm:$0xff] }
   0xa   :  { %v233_v6 = vld [vmem:[%s11035_s5 + $0x10] sm:$0xff]  ;;  %v234_v7 = vld [vmem:[%s11035_s5 + $0x18] sm:$0xff]  ;;  %v235_v8 = vld [vmem:[%s11035_s5 + $0x20] sm:$0xff] }
   0xb   :  { %v236_v9 = vld [vmem:[%s11035_s5 + $0x28] sm:$0xff] }
  0x83   :  { %v51_v10 = vpop.permute.xlu0 %50 }
  0x84   :  { %v61_v11 = vpop.permute.xlu1 %60 }
  0x87   :  { %v56_v13 = vpop.permute.xlu0 %55 }
  0x88   :  { %v66_v19 = vpop.permute.xlu1 %65 }
  0xd7   :  { %v7395_v14 = vpop.f32.mrb[0].mxu0 }
  0xd8   :  { %v157_v15 = vadd.f32 %v7395_v14, %v56_v13  ;;  %v151_v16 = vpop.f32.mrb[1].mxu0  ;;  %v449_v13 = vld [vmem:[%s11038_s7] sm:$0xff] }
  0xd9   :  { %v152_v17 = vadd.f32 %v151_v16, %v51_v10  ;;  %v237_v10 = vld [vmem:[%s11035_s5 + $0x30] sm:$0xff]  ;;  %7443 = vmatprep.mubr.msk.f32.mxu0 %vm505_vm3, %v449_v13 }
  0xda   :  { %v9064_v18 = vmul.f32 %v9061_v12, %v157_v15 }
  0xdb   :  { %v9067_v20 = vmul.f32 %v9061_v12, %v152_v17  ;;  %v7398_v21 = vpop.f32.mrb[2].mxu0 }
  0xdc   :  { %v167_v22 = vadd.f32 %v7398_v21, %v66_v19  ;;  %182 = vrot.lane.b32.xlu1 %v9064_v18, %s8960_s18  ;;  %v161_v23 = vpop.f32.mrb[3].mxu0  ;;  %v208_v52 = vmul.f32 %v6311_v45, %v9064_v18 }
  0xdd   :  { %v162_v24 = vadd.f32 %v161_v23, %v61_v11  ;;  %180 = vrot.lane.b32.xlu0 %v9067_v20, %s8960_s18  ;;  %v207_v51 = vmul.f32 %v6311_v45, %v9067_v20  ;;  %v238_v11 = vld [vmem:[%s11035_s5 + $0x38] sm:$0xff] }
  0xde   :  { %v9074_v25 = vmul.f32 %v9061_v12, %v167_v22 }
  0xdf   :  { %v9077_v26 = vmul.f32 %v9061_v12, %v162_v24  ;;  %v8147_v56 = vpack.c.bf16 %v208_v52, %v207_v51 }
  0xe0   :  { %186 = vrot.lane.b32.xlu1 %v9074_v25, %s8960_s18  ;;  %v210_v58 = vmul.f32 %v6311_v45, %v9074_v25 }
  0xe1   :  { %184 = vrot.lane.b32.xlu0 %v9077_v26, %s8960_s18  ;;  %v209_v57 = vmul.f32 %v6311_v45, %v9077_v26 }
  0xe3   :  { %v8151_v62 = vpack.c.bf16 %v210_v58, %v209_v57 }
  0xe4   :  { %213 = vrot.lane.b32.xlu1 %v9064_v18, %s8961_s19 }
  0xe5   :  { %211 = vrot.lane.b32.xlu0 %v9067_v20, %s8961_s19 }
  0xe8   :  { %217 = vrot.lane.b32.xlu1 %v9074_v25, %s8961_s19 }
  0xe9   :  { %215 = vrot.lane.b32.xlu0 %v9077_v26, %s8961_s19 }
  0xec   :  { %274 = vperm.xlu1 %8638, %v244_v27  }
  0xed   :  { %269 = vperm.xlu0 %8637, %v243_v28  }
  0xf0   :  { %284 = vperm.xlu1 %8638, %v246_v30  }
  0xf1   :  { %279 = vperm.xlu0 %8637, %v245_v31  }
  0xf4   :  { %254 = vperm.xlu1 %8638, %v240_v32  }
  0xf5   :  { %249 = vperm.xlu0 %8637, %v239_v33  }
  0xf8   :  { %264 = vperm.xlu1 %8638, %v242_v34  }
  0xf9   :  { %259 = vperm.xlu0 %8637, %v241_v35  }
  0xfc   :  { %472 = vperm.xlu1 %8638, %v458_v36  }
  0xfd   :  { %467 = vperm.xlu0 %8637, %v457_v37  }
 0x100   :  { %482 = vperm.xlu1 %8638, %v460_v38  }
 0x101   :  { %477 = vperm.xlu0 %8637, %v459_v39  }
 0x14e   :  { %v183_v41 = vpop.permute.xlu1 %182 }
 0x14f   :  { %v196_v42 = vmul.f32 %v6309_v40, %v183_v41  ;;  %v181_v43 = vpop.permute.xlu0 %180 }
 0x150   :  { %v195_v44 = vmul.f32 %v6309_v40, %v181_v43 }
 0x152   :  { %v187_v46 = vpop.permute.xlu1 %186  ;;  %v8139_v47 = vpack.c.bf16 %v196_v42, %v195_v44 }
 0x153   :  { %v198_v48 = vmul.f32 %v6309_v40, %v187_v46  ;;  %v185_v49 = vpop.permute.xlu0 %184 }
 0x154   :  { %v197_v50 = vmul.f32 %v6309_v40, %v185_v49  ;;  %8140 = vmatprep.subr.bf16.mxu1 %v8139_v47 }
 0x155   :  { %8142 = vmatpush3.bf16.msra.mxu1 %v8139_v47 }
 0x156   :  { %v8143_v53 = vpack.c.bf16 %v198_v48, %v197_v50  ;;  %v214_v54 = vpop.permute.xlu1 %213 }
 0x157   :  { %v212_v55 = vpop.permute.xlu0 %211  ;;  %v228_v60 = vmul.f32 %v6313_v59, %v214_v54 }
 0x158   :  { %8144 = vmatprep.subr.bf16.mxu1 %v8143_v53  ;;  %v227_v61 = vmul.f32 %v6313_v59, %v212_v55 }
 0x159   :  { %8146 = vmatpush3.bf16.msra.mxu1 %v8143_v53 }
 0x15a   :  { %8148 = vmatprep.subr.bf16.mxu1 %v8147_v56  ;;  %v218_v63 = vpop.permute.xlu1 %217  ;;  %v8155_v1 = vpack.c.bf16 %v228_v60, %v227_v61 }
 0x15b   :  { %v216_v0 = vpop.permute.xlu0 %215  ;;  %v230_v2 = vmul.f32 %v6313_v59, %v218_v63 }
 0x15c   :  { %v229_v3 = vmul.f32 %v6313_v59, %v216_v0 }
 0x15d   :  { %8150 = vmatpush3.bf16.msra.mxu1 %v8147_v56 }
 0x15e   :  { %8152 = vmatprep.subr.bf16.mxu1 %v8151_v62  ;;  %v8159_v4 = vpack.c.bf16 %v230_v2, %v229_v3 }
 0x161   :  { %8154 = vmatpush3.bf16.msra.mxu1 %v8151_v62 }
 0x162   :  { %8156 = vmatprep.subr.bf16.mxu1 %v8155_v1 }
 0x165   :  { %8158 = vmatpush3.bf16.msra.mxu1 %v8155_v1 }
 0x166   :  { %8160 = vmatprep.subr.bf16.mxu1 %v8159_v4 }
 0x169   :  { %8162 = vmatpush3.bf16.msra.mxu1 %v8159_v4  ;;  %v450_v4 = vld [vmem:[%s11038_s7 + $0x8] sm:$0xff] }
 0x16b   :  { %v275_v17 = vpop.permute.xlu1 %274 }
 0x16c   :  { %7424 = vmatmul.mubr.msk.f32.vlgmr.msra.gmra.mrb[0].mxu1 %vm287_vm2, %v232_v5  ;;  %v270_v21 = vpop.permute.xlu0 %269  ;;  %v451_v5 = vld [vmem:[%s11038_s7 + $0x10] sm:$0xff] }
 0x16d   :  { %7426 = vmatprep.mubr.msk.f32.mxu1 %vm287_vm2, %v233_v6  ;;  %v452_v6 = vld [vmem:[%s11038_s7 + $0x18] sm:$0xff] }
 0x16f   :  { %v285_v28 = vpop.permute.xlu1 %284 }
 0x170   :  { %7427 = vmatmul.mubr.msk.f32.gmra.mrb[2].mxu1 %vm287_vm2, %v234_v7  ;;  %v280_v30 = vpop.permute.xlu0 %279 }
 0x171   :  { %7429 = vmatprep.mubr.msk.f32.mxu1 %vm287_vm2, %v235_v8 }
 0x173   :  { %v255_v38 = vpop.permute.xlu1 %254 }
 0x174   :  { %7430 = vmatmul.mubr.msk.f32.gmra.mrb[4].mxu1 %vm287_vm2, %v236_v9  ;;  %v250_v39 = vpop.permute.xlu0 %249 }
 0x175   :  { %7432 = vmatprep.mubr.msk.f32.mxu1 %vm287_vm2, %v237_v10 }
 0x177   :  { %v265_v43 = vpop.permute.xlu1 %264 }
 0x178   :  { %7433 = vmatmul.mubr.msk.f32.gmra.mrb[6].mxu1 %vm287_vm2, %v238_v11  ;;  %v260_v45 = vpop.permute.xlu0 %259 }
 0x17b   :  { %v473_v7 = vpop.permute.xlu1 %472 }
 0x17c   :  { %v468_v8 = vpop.permute.xlu0 %467 }
 0x23f   :  { %v7425_v14 = vpop.f32.mrb[0].mxu1 }
 0x240   :  { %v378_v15 = vpop.f32.mrb[1].mxu1  ;;  %v384_v40 = vadd.f32 %v7425_v14, %v255_v38  ;;  %v6348_v38 = vld [vmem:[%s11034_s6 + $0x40] sm:$0xff] }
 0x241   :  { %v379_v41 = vadd.f32 %v378_v15, %v250_v39  ;;  %v483_v15 = vpop.permute.xlu1 %482  ;;  %v6351_v39 = vld [vmem:[%s11034_s6 + $0x58] sm:$0xff] }
 0x243   :  { %v7428_v16 = vpop.f32.mrb[2].mxu1 }
 0x244   :  { %v388_v19 = vpop.f32.mrb[3].mxu1  ;;  %v394_v46 = vadd.f32 %v7428_v16, %v265_v43  ;;  %v6379_v43 = vld [vmem:[%s11036_s8 + $0x58] sm:$0xff] }
 0x245   :  { %v389_v48 = vadd.f32 %v388_v19, %v260_v45  ;;  %v478_v19 = vpop.permute.xlu0 %477  ;;  %v6335_v45 = vld [vmem:[%s11037_s2 + $0x3] ss:$0 sm:$0xff] }
 0x247   :  { %v7431_v22 = vpop.f32.mrb[4].mxu1 }
 0x248   :  { %v404_v23 = vadd.f32 %v7431_v22, %v275_v17  ;;  %v398_v24 = vpop.f32.mrb[5].mxu1 }
 0x249   :  { %v399_v27 = vadd.f32 %v398_v24, %v270_v21 }
 0x24a   :  { %v6323_v29 = vmul.f32 -1.442695, %v404_v23 }
 0x24b   :  { %v6322_v31 = vmul.f32 -1.442695, %v399_v27  ;;  %v7434_v32 = vpop.f32.mrb[6].mxu1 }
 0x24c   :  { %8639 = vpow2.f32 %v6323_v29  ;;  %v414_v33 = vadd.f32 %v7434_v32, %v285_v28  ;;  %v408_v34 = vpop.f32.mrb[7].mxu1  ;;  %v6353_v32 = vld [vmem:[%s11034_s6 + $0x68] sm:$0xff] }
 0x24d   :  { %8641 = vpow2.f32 %v6322_v31  ;;  %v409_v35 = vadd.f32 %v408_v34, %v280_v30  ;;  %v455_v30 = vld [vmem:[%s11038_s7 + $0x30] sm:$0xff]  ;;  %v456_v31 = vld [vmem:[%s11038_s7 + $0x38] sm:$0xff]  ;;  %v6352_v34 = vld [vmem:[%s11034_s6 + $0x60] sm:$0xff] }
 0x24e   :  { %v6325_v36 = vmul.f32 -1.442695, %v414_v33  ;;  %v6340_v33 = vld [vmem:[%s11035_s5 + $0x40] sm:$0xff] }
 0x24f   :  { %v6324_v37 = vmul.f32 -1.442695, %v409_v35  ;;  %v6355_v35 = vld [vmem:[%s11034_s6 + $0x78] sm:$0xff] }
 0x250   :  { %8643 = vpow2.f32 %v6325_v36  ;;  %v6354_v36 = vld [vmem:[%s11034_s6 + $0x70] sm:$0xff] }
 0x251   :  { %8645 = vpow2.f32 %v6324_v37  ;;  %v6349_v37 = vld [vmem:[%s11034_s6 + $0x48] sm:$0xff] }
 0x252   :  { %8647 = vtanh.f32 %v384_v40  ;;  %v6350_v40 = vld [vmem:[%s11034_s6 + $0x50] sm:$0xff] }
 0x253   :  { %8649 = vtanh.f32 %v379_v41  ;;  %v6377_v41 = vld [vmem:[%s11036_s8 + $0x48] sm:$0xff] }
 0x256   :  { %v8640_v42 = vpop.eup %8639 }
 0x257   :  { %v8642_v44 = vpop.eup %8641  ;;  %v434_v47 = vadd.f32 1.0, %v8640_v42  ;;  %v6376_v42 = vld [vmem:[%s11036_s8 + $0x40] sm:$0xff] }
 0x258   :  { %v433_v49 = vadd.f32 1.0, %v8642_v44  ;;  %v6378_v44 = vld [vmem:[%s11036_s8 + $0x50] sm:$0xff] }
 0x259   :  { %8651 = vrcp.f32 %v434_v47 }
 0x25a   :  { %v8644_v50 = vpop.eup %8643  ;;  %8653 = vrcp.f32 %v433_v49 }
 0x25b   :  { %v8646_v51 = vpop.eup %8645  ;;  %8655 = vtanh.f32 %v394_v46  ;;  %v436_v52 = vadd.f32 1.0, %v8644_v50  ;;  %v6337_v50 = vld [vmem:[%s11037_s2 + $0x4] ss:$0 sm:$0xff] }
 0x25c   :  { %8657 = vtanh.f32 %v389_v48  ;;  %v435_v53 = vadd.f32 1.0, %v8646_v51  ;;  %v8648_v54 = vpop.eup %8647 }
 0x25d   :  { %8659 = vrcp.f32 %v436_v52  ;;  %v8650_v55 = vpop.eup %8649 }
 0x25e   :  { %8661 = vrcp.f32 %v435_v53 }
 0x263   :  { %v8652_v56 = vpop.eup %8651 }
 0x264   :  { %v8654_v57 = vpop.eup %8653  ;;  %v446_v58 = vmul.f32 %v8652_v56, %v8648_v54 }
 0x265   :  { %v8656_v59 = vpop.eup %8655  ;;  %v445_v60 = vmul.f32 %v8654_v57, %v8650_v55 }
 0x266   :  { %v8658_v61 = vpop.eup %8657 }
 0x267   :  { %v8660_v62 = vpop.eup %8659  ;;  %v8163_v63 = vpack.c.bf16 %v446_v58, %v445_v60 }
 0x268   :  { %v8662_v0 = vpop.eup %8661  ;;  %v448_v1 = vmul.f32 %v8660_v62, %v8656_v59 }
 0x269   :  { %8164 = vmatprep.subr.bf16.mxu0 %v8163_v63  ;;  %v447_v2 = vmul.f32 %v8662_v0, %v8658_v61  ;;  %v6339_v0 = vld [vmem:[%s11037_s2 + $0x5] ss:$0 sm:$0xff] }
 0x26a   :  { %8166 = vmatpush3.bf16.msra.mxu0 %v8163_v63 }
 0x26b   :  { %v8167_v3 = vpack.c.bf16 %v448_v1, %v447_v2 }
 0x26d   :  { %8168 = vmatprep.subr.bf16.mxu0 %v8167_v3 }
 0x26e   :  { %8170 = vmatpush3.bf16.msra.mxu0 %v8167_v3 }
 0x271   :  { %7444 = vmatmul.mubr.msk.f32.vlgmr.msra.gmra.mrb[4].mxu0 %vm505_vm3, %v450_v4 }
 0x272   :  { %7446 = vmatprep.mubr.msk.f32.mxu0 %vm505_vm3, %v451_v5 }
 0x275   :  { %7447 = vmatmul.mubr.msk.f32.gmra.mrb[6].mxu0 %vm505_vm3, %v452_v6 }
 0x344   :  { %v7445_v9 = vpop.f32.mrb[4].mxu0 }
 0x345   :  { %v602_v10 = vadd.f32 %v7445_v9, %v473_v7  ;;  %v596_v11 = vpop.f32.mrb[5].mxu0 }
 0x346   :  { %v597_v13 = vadd.f32 %v596_v11, %v468_v8  ;;  %v6342_v11 = vld [vmem:[%s11035_s5 + $0x50] sm:$0xff] }
 0x347   :  { %v636_v14 = vadd.f32 %v602_v10, %v9064_v18  ;;  %v6341_v10 = vld [vmem:[%s11035_s5 + $0x48] sm:$0xff] }
 0x348   :  { %v635_v16 = vadd.f32 %v597_v13, %v9067_v20  ;;  %v7448_v17 = vpop.f32.mrb[6].mxu0  ;;  %v6343_v13 = vld [vmem:[%s11035_s5 + $0x58] sm:$0xff] }
 0x349   :  { %v9191_v21 = vmul.f32 %v9061_v12, %v636_v14  ;;  %v612_v22 = vadd.f32 %v7448_v17, %v483_v15  ;;  %v606_v23 = vpop.f32.mrb[7].mxu0  ;;  %v6344_v14 = vld [vmem:[%s11035_s5 + $0x60] sm:$0xff]  ;;  %v6345_v15 = vld [vmem:[%s11035_s5 + $0x68] sm:$0xff]  ;;  %v6347_v17 = vld [vmem:[%s11035_s5 + $0x78] sm:$0xff] }
 0x34a   :  { %v9194_v24 = vmul.f32 %v9061_v12, %v635_v16  ;;  %v607_v27 = vadd.f32 %v606_v23, %v478_v19  ;;  %v6346_v16 = vld [vmem:[%s11035_s5 + $0x70] sm:$0xff]  ;;  %v6368_v19 = vld [vmem:[%s11038_s7 + $0x40] sm:$0xff] }
 0x34b   :  { %v638_v28 = vadd.f32 %v612_v22, %v9074_v25  ;;  %649 = vrot.lane.b32.xlu1 %v9191_v21, %s8960_s18  ;;  %v453_v25 = vld [vmem:[%s11038_s7 + $0x20] sm:$0xff]  ;;  %v676_v57 = vmul.f32 %v6337_v50, %v9191_v21 }
 0x34c   :  { %v637_v18 = vadd.f32 %v607_v27, %v9077_v26  ;;  %647 = vrot.lane.b32.xlu0 %v9194_v24, %s8960_s18  ;;  %v454_v26 = vld [vmem:[%s11038_s7 + $0x28] sm:$0xff]  ;;  %7449 = vmatprep.mubr.msk.f32.mxu0 %vm505_vm3, %v453_v25  ;;  %v675_v56 = vmul.f32 %v6337_v50, %v9194_v24 }
 0x34d   :  { %v9203_v20 = vmul.f32 %v9061_v12, %v638_v28  ;;  %7450 = vmatmul.mubr.msk.f32.gmra.mrb[8].mxu0 %vm505_vm3, %v454_v26 }
 0x34e   :  { %v9206_v29 = vmul.f32 %v9061_v12, %v637_v18  ;;  %7452 = vmatprep.mubr.msk.f32.mxu0 %vm505_vm3, %v455_v30  ;;  %v8179_v61 = vpack.c.bf16 %v676_v57, %v675_v56 }
 0x34f   :  { %653 = vrot.lane.b32.xlu1 %v9203_v20, %s8960_s18  ;;  %v678_v63 = vmul.f32 %v6337_v50, %v9203_v20 }
 0x350   :  { %651 = vrot.lane.b32.xlu0 %v9206_v29, %s8960_s18  ;;  %v677_v62 = vmul.f32 %v6337_v50, %v9206_v29 }
 0x351   :  { %7453 = vmatmul.mubr.msk.f32.gmra.mrb[10].mxu0 %vm505_vm3, %v456_v31 }
 0x352   :  { %7479 = vmatprep.mubr.msk.f32.mxu0 %vm287_vm2, %v6340_v33  ;;  %v8183_v3 = vpack.c.bf16 %v678_v63, %v677_v62 }
 0x353   :  { %681 = vrot.lane.b32.xlu1 %v9191_v21, %s8961_s19 }
 0x354   :  { %679 = vrot.lane.b32.xlu0 %v9194_v24, %s8961_s19 }
 0x357   :  { %685 = vrot.lane.b32.xlu1 %v9203_v20, %s8961_s19 }
 0x358   :  { %683 = vrot.lane.b32.xlu0 %v9206_v29, %s8961_s19 }
 0x35b   :  { %744 = vperm.xlu1 %8638, %v6353_v32  }
 0x35c   :  { %739 = vperm.xlu0 %8637, %v6352_v34  }
 0x35f   :  { %754 = vperm.xlu1 %8638, %v6355_v35  }
 0x360   :  { %749 = vperm.xlu0 %8637, %v6354_v36  }
 0x363   :  { %724 = vperm.xlu1 %8638, %v6349_v37  }
 0x364   :  { %719 = vperm.xlu0 %8637, %v6348_v38  }
 0x367   :  { %734 = vperm.xlu1 %8638, %v6351_v39  }
 0x368   :  { %729 = vperm.xlu0 %8637, %v6350_v40  }
 0x36b   :  { %943 = vperm.xlu1 %8638, %v6377_v41  }
 0x36c   :  { %938 = vperm.xlu0 %8637, %v6376_v42  }
 0x36f   :  { %953 = vperm.xlu1 %8638, %v6379_v43  }
 0x370   :  { %948 = vperm.xlu0 %8637, %v6378_v44  }
 0x3bd   :  { %v650_v46 = vpop.permute.xlu1 %649 }
 0x3be   :  { %v664_v47 = vmul.f32 %v6335_v45, %v650_v46  ;;  %v648_v48 = vpop.permute.xlu0 %647 }
 0x3bf   :  { %v663_v49 = vmul.f32 %v6335_v45, %v648_v48 }
 0x3c1   :  { %v8171_v51 = vpack.c.bf16 %v664_v47, %v663_v49  ;;  %v654_v52 = vpop.permute.xlu1 %653 }
 0x3c2   :  { %v666_v53 = vmul.f32 %v6335_v45, %v654_v52  ;;  %v652_v54 = vpop.permute.xlu0 %651 }
 0x3c3   :  { %v665_v55 = vmul.f32 %v6335_v45, %v652_v54  ;;  %8172 = vmatprep.subr.bf16.mxu0 %v8171_v51 }
 0x3c4   :  { %8174 = vmatpush3.bf16.msra.mxu0 %v8171_v51 }
 0x3c5   :  { %v8175_v58 = vpack.c.bf16 %v666_v53, %v665_v55  ;;  %v682_v59 = vpop.permute.xlu1 %681 }
 0x3c6   :  { %v680_v60 = vpop.permute.xlu0 %679  ;;  %v696_v1 = vmul.f32 %v6339_v0, %v682_v59 }
 0x3c7   :  { %8176 = vmatprep.subr.bf16.mxu0 %v8175_v58  ;;  %v695_v2 = vmul.f32 %v6339_v0, %v680_v60 }
 0x3c8   :  { %8178 = vmatpush3.bf16.msra.mxu0 %v8175_v58 }
 0x3c9   :  { %8180 = vmatprep.subr.bf16.mxu0 %v8179_v61  ;;  %v686_v4 = vpop.permute.xlu1 %685  ;;  %v8187_v6 = vpack.c.bf16 %v696_v1, %v695_v2 }
 0x3ca   :  { %v684_v5 = vpop.permute.xlu0 %683  ;;  %v698_v7 = vmul.f32 %v6339_v0, %v686_v4 }
 0x3cb   :  { %v697_v8 = vmul.f32 %v6339_v0, %v684_v5 }
 0x3cc   :  { %8182 = vmatpush3.bf16.msra.mxu0 %v8179_v61 }
 0x3cd   :  { %8184 = vmatprep.subr.bf16.mxu0 %v8183_v3  ;;  %v8191_v9 = vpack.c.bf16 %v698_v7, %v697_v8 }
 0x3d0   :  { %8186 = vmatpush3.bf16.msra.mxu0 %v8183_v3 }
 0x3d1   :  { %8188 = vmatprep.subr.bf16.mxu0 %v8187_v6 }
 0x3d4   :  { %8190 = vmatpush3.bf16.msra.mxu0 %v8187_v6 }
 0x3d5   :  { %8192 = vmatprep.subr.bf16.mxu0 %v8191_v9 }
 0x3d8   :  { %8194 = vmatpush3.bf16.msra.mxu0 %v8191_v9  ;;  %v6369_v9 = vld [vmem:[%s11038_s7 + $0x48] sm:$0xff] }
 0x3da   :  { %v745_v28 = vpop.permute.xlu1 %744 }
 0x3db   :  { %7480 = vmatmul.mubr.msk.f32.vlgmr.msra.gmra.mrb[12].mxu0 %vm287_vm2, %v6341_v10  ;;  %v740_v25 = vpop.permute.xlu0 %739  ;;  %v6370_v10 = vld [vmem:[%s11038_s7 + $0x50] sm:$0xff] }
 0x3dc   :  { %7482 = vmatprep.mubr.msk.f32.mxu0 %vm287_vm2, %v6342_v11  ;;  %v6371_v11 = vld [vmem:[%s11038_s7 + $0x58] sm:$0xff] }
 0x3de   :  { %v755_v33 = vpop.permute.xlu1 %754 }
 0x3df   :  { %7483 = vmatmul.mubr.msk.f32.gmra.mrb[14].mxu0 %vm287_vm2, %v6343_v13  ;;  %v750_v35 = vpop.permute.xlu0 %749 }
 0x3e0   :  { %7485 = vmatprep.mubr.msk.f32.mxu0 %vm287_vm2, %v6344_v14 }
 0x3e2   :  { %v725_v43 = vpop.permute.xlu1 %724 }
 0x3e3   :  { %7486 = vmatmul.mubr.msk.f32.gmra.mrb[16].mxu0 %vm287_vm2, %v6345_v15  ;;  %v720_v44 = vpop.permute.xlu0 %719 }
 0x3e4   :  { %7488 = vmatprep.mubr.msk.f32.mxu0 %vm287_vm2, %v6346_v16 }
 0x3e6   :  { %v735_v48 = vpop.permute.xlu1 %734 }
 0x3e7   :  { %7489 = vmatmul.mubr.msk.f32.gmra.mrb[18].mxu0 %vm287_vm2, %v6347_v17  ;;  %v730_v50 = vpop.permute.xlu0 %729 }
 0x3e8   :  { %7499 = vmatprep.mubr.msk.f32.mxu0 %vm505_vm3, %v6368_v19 }
 0x3ea   :  { %v944_v13 = vpop.permute.xlu1 %943 }
 0x3eb   :  { %v939_v14 = vpop.permute.xlu0 %938 }
 0x4ae   :  { %v7481_v22 = vpop.f32.mrb[12].mxu0 }
 0x4af   :  { %v847_v23 = vpop.f32.mrb[13].mxu0  ;;  %v853_v45 = vadd.f32 %v7481_v22, %v725_v43  ;;  %v6412_v43 = vld [vmem:[%s11034_s6 + $0xb0] sm:$0xff] }
 0x4b0   :  { %v848_v46 = vadd.f32 %v847_v23, %v720_v44  ;;  %v954_v23 = vpop.permute.xlu1 %953  ;;  %v6407_v44 = vld [vmem:[%s11034_s6 + $0x88] sm:$0xff] }
 0x4b2   :  { %v7484_v27 = vpop.f32.mrb[14].mxu0 }
 0x4b3   :  { %v857_v18 = vpop.f32.mrb[15].mxu0  ;;  %v863_v51 = vadd.f32 %v7484_v27, %v735_v48  ;;  %v462_v48 = vld [vmem:[%s11036_s8 + $0x28] sm:$0xff] }
 0x4b4   :  { %v858_v53 = vadd.f32 %v857_v18, %v730_v50  ;;  %v6395_v18 = vld [vmem:[%s11037_s2 + $0x7] ss:$0 sm:$0xff]  ;;  %v6381_v50 = vld [vmem:[%s11036_s8 + $0x68] sm:$0xff] }
 0x4b6   :  { %v7487_v26 = vpop.f32.mrb[16].mxu0 }
 0x4b7   :  { %v873_v30 = vadd.f32 %v7487_v26, %v745_v28  ;;  %v867_v31 = vpop.f32.mrb[17].mxu0 }
 0x4b8   :  { %v868_v32 = vadd.f32 %v867_v31, %v740_v25  ;;  %v949_v25 = vpop.permute.xlu0 %948 }
 0x4b9   :  { %v6365_v34 = vmul.f32 -1.442695, %v873_v30 }
 0x4ba   :  { %v6364_v36 = vmul.f32 -1.442695, %v868_v32  ;;  %v7490_v37 = vpop.f32.mrb[18].mxu0 }
 0x4bb   :  { %8663 = vpow2.f32 %v6365_v34  ;;  %v883_v38 = vadd.f32 %v7490_v37, %v755_v33  ;;  %v877_v39 = vpop.f32.mrb[19].mxu0 }
 0x4bc   :  { %8665 = vpow2.f32 %v6364_v36  ;;  %v878_v40 = vadd.f32 %v877_v39, %v750_v35 }
 0x4bd   :  { %v6367_v41 = vmul.f32 -1.442695, %v883_v38 }
 0x4be   :  { %v6366_v42 = vmul.f32 -1.442695, %v878_v40 }
 0x4bf   :  { %8667 = vpow2.f32 %v6367_v41  ;;  %v6410_v41 = vld [vmem:[%s11034_s6 + $0xa0] sm:$0xff] }
 0x4c0   :  { %8669 = vpow2.f32 %v6366_v42  ;;  %v6413_v42 = vld [vmem:[%s11034_s6 + $0xb8] sm:$0xff] }
 0x4c1   :  { %8671 = vtanh.f32 %v853_v45  ;;  %v6406_v45 = vld [vmem:[%s11034_s6 + $0x80] sm:$0xff] }
 0x4c2   :  { %8673 = vtanh.f32 %v848_v46  ;;  %v6409_v46 = vld [vmem:[%s11034_s6 + $0x98] sm:$0xff] }
 0x4c5   :  { %v8664_v47 = vpop.eup %8663 }
 0x4c6   :  { %v8666_v49 = vpop.eup %8665  ;;  %v903_v52 = vadd.f32 1.0, %v8664_v47  ;;  %v6408_v47 = vld [vmem:[%s11034_s6 + $0x90] sm:$0xff] }
 0x4c7   :  { %v902_v54 = vadd.f32 1.0, %v8666_v49  ;;  %v461_v49 = vld [vmem:[%s11036_s8 + $0x20] sm:$0xff] }
 0x4c8   :  { %8675 = vrcp.f32 %v903_v52  ;;  %v6439_v52 = vld [vmem:[%s11036_s8 + $0xa8] sm:$0xff] }
 0x4c9   :  { %v8668_v55 = vpop.eup %8667  ;;  %8677 = vrcp.f32 %v902_v54  ;;  %v464_v54 = vld [vmem:[%s11036_s8 + $0x38] sm:$0xff] }
 0x4ca   :  { %v8670_v56 = vpop.eup %8669  ;;  %8679 = vtanh.f32 %v863_v51  ;;  %v905_v57 = vadd.f32 1.0, %v8668_v55  ;;  %v6380_v51 = vld [vmem:[%s11036_s8 + $0x60] sm:$0xff]  ;;  %v463_v55 = vld [vmem:[%s11036_s8 + $0x30] sm:$0xff] }
 0x4cb   :  { %8681 = vtanh.f32 %v858_v53  ;;  %v904_v58 = vadd.f32 1.0, %v8670_v56  ;;  %v8672_v59 = vpop.eup %8671  ;;  %v6438_v53 = vld [vmem:[%s11036_s8 + $0xa0] sm:$0xff]  ;;  %v6383_v56 = vld [vmem:[%s11036_s8 + $0x78] sm:$0xff] }
 0x4cc   :  { %8683 = vrcp.f32 %v905_v57  ;;  %v8674_v60 = vpop.eup %8673  ;;  %v6382_v57 = vld [vmem:[%s11036_s8 + $0x70] sm:$0xff] }
 0x4cd   :  { %8685 = vrcp.f32 %v904_v58  ;;  %v6441_v58 = vld [vmem:[%s11036_s8 + $0xb8] sm:$0xff] }
 0x4d2   :  { %v8676_v61 = vpop.eup %8675 }
 0x4d3   :  { %v8678_v62 = vpop.eup %8677  ;;  %v915_v63 = vmul.f32 %v8676_v61, %v8672_v59  ;;  %v6440_v59 = vld [vmem:[%s11036_s8 + $0xb0] sm:$0xff]  ;;  %v1576_v61 = vld [vmem:[%s11039_s10] sm:$0x3] }
 0x4d4   :  { %v8680_v0 = vpop.eup %8679  ;;  %v914_v1 = vmul.f32 %v8678_v62, %v8674_v60  ;;  %v6455_v60 = vld [vmem:[%s11032_s4 + $0x20] sm:$0xff]  ;;  %v6457_v62 = vld [vmem:[%s11032_s4 + $0x30] sm:$0xff] }
 0x4d5   :  { %v8682_v2 = vpop.eup %8681 }
 0x4d6   :  { %v8684_v3 = vpop.eup %8683  ;;  %v8195_v4 = vpack.c.bf16 %v915_v63, %v914_v1  ;;  %v6456_v63 = vld [vmem:[%s11032_s4 + $0x28] sm:$0xff]  ;;  %v6393_v1 = vld [vmem:[%s11037_s2 + $0x6] ss:$0 sm:$0xff] }
 0x4d7   :  { %v8686_v5 = vpop.eup %8685  ;;  %v917_v6 = vmul.f32 %v8684_v3, %v8680_v0  ;;  %v6458_v0 = vld [vmem:[%s11032_s4 + $0x38] sm:$0xff] }
 0x4d8   :  { %8196 = vmatprep.subr.bf16.mxu0 %v8195_v4  ;;  %v916_v7 = vmul.f32 %v8686_v5, %v8682_v2 }
 0x4d9   :  { %8198 = vmatpush3.bf16.msra.mxu0 %v8195_v4 }
 0x4da   :  { %v8199_v8 = vpack.c.bf16 %v917_v6, %v916_v7 }
 0x4dc   :  { %8200 = vmatprep.subr.bf16.mxu0 %v8199_v8 }
 0x4dd   :  { %8202 = vmatpush3.bf16.msra.mxu0 %v8199_v8 }
 0x4e0   :  { %7500 = vmatmul.mubr.msk.f32.vlgmr.msra.gmra.mrb[20].mxu0 %vm505_vm3, %v6369_v9 }
 0x4e1   :  { %7502 = vmatprep.mubr.msk.f32.mxu0 %vm505_vm3, %v6370_v10 }
 0x4e4   :  { %7503 = vmatmul.mubr.msk.f32.gmra.mrb[22].mxu0 %vm505_vm3, %v6371_v11 }
 0x5b3   :  { %v7501_v15 = vpop.f32.mrb[20].mxu0 }
 0x5b4   :  { %v1072_v16 = vadd.f32 %v7501_v15, %v944_v13  ;;  %v1066_v17 = vpop.f32.mrb[21].mxu0  ;;  %v6397_v15 = vld [vmem:[%s11037_s2 + $0x8] ss:$0 sm:$0xff] }
 0x5b5   :  { %v1067_v19 = vadd.f32 %v1066_v17, %v939_v14 }
 0x5b6   :  { %v1106_v22 = vadd.f32 %v1072_v16, %v9191_v21 }
 0x5b7   :  { %v1105_v27 = vadd.f32 %v1067_v19, %v9194_v24  ;;  %v7504_v28 = vpop.f32.mrb[22].mxu0 }
 0x5b8   :  { %v1082_v26 = vadd.f32 %v7504_v28, %v954_v23  ;;  %v1076_v30 = vpop.f32.mrb[23].mxu0  ;;  %v1110_v31 = vmul.f32 %v9061_v12, %v1106_v22 }
 0x5b9   :  { %v1077_v32 = vadd.f32 %v1076_v30, %v949_v25  ;;  %v1109_v33 = vmul.f32 %v9061_v12, %v1105_v27  ;;  %v6399_v25 = vld [vmem:[%s11035_s5 + $0x88] sm:$0xff]  ;;  %v6401_v30 = vld [vmem:[%s11035_s5 + $0x98] sm:$0xff] }
 0x5ba   :  { %v1108_v34 = vadd.f32 %v1082_v26, %v9203_v20  ;;  %1119 = vrot.lane.b32.xlu1 %v1110_v31, %s8960_s18  ;;  %v1146_v21 = vmul.f32 %v6395_v18, %v1110_v31  ;;  %v6400_v26 = vld [vmem:[%s11035_s5 + $0x90] sm:$0xff] }
 0x5bb   :  { %v1107_v24 = vadd.f32 %v1077_v32, %v9206_v29  ;;  %1117 = vrot.lane.b32.xlu0 %v1109_v33, %s8960_s18  ;;  %v1145_v35 = vmul.f32 %v6395_v18, %v1109_v33  ;;  %v6398_v29 = vld [vmem:[%s11035_s5 + $0x80] sm:$0xff]  ;;  %v6403_v32 = vld [vmem:[%s11035_s5 + $0xa8] sm:$0xff] }
 0x5bc   :  { %v1112_v36 = vmul.f32 %v9061_v12, %v1108_v34  ;;  %7535 = vmatprep.mubr.msk.f32.mxu1 %vm287_vm2, %v6398_v29  ;;  %v6405_v34 = vld [vmem:[%s11035_s5 + $0xb8] sm:$0xff] }
 0x5bd   :  { %v1111_v37 = vmul.f32 %v9061_v12, %v1107_v24  ;;  %v9346_v38 = vpack.c.bf16 %v1146_v21, %v1145_v35  ;;  %v6411_v12 = vld [vmem:[%s11034_s6 + $0xa8] sm:$0xff]  ;;  %v6372_v21 = vld [vmem:[%s11038_s7 + $0x60] sm:$0xff]  ;;  %v6374_v35 = vld [vmem:[%s11038_s7 + $0x70] sm:$0xff] }
 0x5be   :  { %1123 = vrot.lane.b32.xlu1 %v1112_v36, %s8960_s18  ;;  %v1148_v39 = vmul.f32 %v6395_v18, %v1112_v36  ;;  %v6373_v24 = vld [vmem:[%s11038_s7 + $0x68] sm:$0xff]  ;;  %7505 = vmatprep.mubr.msk.f32.mxu0 %vm505_vm3, %v6372_v21 }
 0x5bf   :  { %1121 = vrot.lane.b32.xlu0 %v1111_v37, %s8960_s18  ;;  %v1147_v20 = vmul.f32 %v6395_v18, %v1111_v37  ;;  %7506 = vmatmul.mubr.msk.f32.gmra.mrb[8].mxu0 %vm505_vm3, %v6373_v24 }
 0x5c0   :  { %7508 = vmatprep.mubr.msk.f32.mxu0 %vm505_vm3, %v6374_v35 }
 0x5c1   :  { %v9350_v40 = vpack.c.bf16 %v1148_v39, %v1147_v20 }
 0x5c2   :  { %1151 = vrot.lane.b32.xlu1 %v1110_v31, %s8961_s19  ;;  %v6402_v31 = vld [vmem:[%s11035_s5 + $0xa0] sm:$0xff] }
 0x5c3   :  { %1149 = vrot.lane.b32.xlu0 %v1109_v33, %s8961_s19  ;;  %v6404_v33 = vld [vmem:[%s11035_s5 + $0xb0] sm:$0xff] }
 0x5c6   :  { %1155 = vrot.lane.b32.xlu1 %v1112_v36, %s8961_s19  ;;  %v6375_v36 = vld [vmem:[%s11038_s7 + $0x78] sm:$0xff] }
 0x5c7   :  { %1153 = vrot.lane.b32.xlu0 %v1111_v37, %s8961_s19  ;;  %7509 = vmatmul.mubr.msk.f32.gmra.mrb[10].mxu0 %vm505_vm3, %v6375_v36  ;;  %v6426_v37 = vld [vmem:[%s11038_s7 + $0x80] sm:$0xff] }
 0x5c8   :  { %7555 = vmatprep.mubr.msk.f32.mxu0 %vm505_vm3, %v6426_v37 }
 0x5ca   :  { %1214 = vperm.xlu1 %8638, %v6411_v12  }
 0x5cb   :  { %1209 = vperm.xlu0 %8637, %v6410_v41  }
 0x5ce   :  { %1224 = vperm.xlu1 %8638, %v6413_v42  }
 0x5cf   :  { %1219 = vperm.xlu0 %8637, %v6412_v43  }
 0x5d2   :  { %1194 = vperm.xlu1 %8638, %v6407_v44  }
 0x5d3   :  { %1189 = vperm.xlu0 %8637, %v6406_v45  }
 0x5d6   :  { %1204 = vperm.xlu1 %8638, %v6409_v46  }
 0x5d7   :  { %1199 = vperm.xlu0 %8637, %v6408_v47  }
 0x5da   :  { %492 = vperm.xlu1 %8638, %v462_v48  }
 0x5db   :  { %487 = vperm.xlu0 %8637, %v461_v49  }
 0x5de   :  { %963 = vperm.xlu1 %8638, %v6381_v50  }
 0x5df   :  { %958 = vperm.xlu0 %8637, %v6380_v51  }
 0x5e2   :  { %1429 = vperm.xlu1 %8638, %v6439_v52  }
 0x5e3   :  { %1424 = vperm.xlu0 %8637, %v6438_v53  }
 0x5e6   :  { %502 = vperm.xlu1 %8638, %v464_v54  }
 0x5e7   :  { %497 = vperm.xlu0 %8637, %v463_v55  }
 0x5ea   :  { %973 = vperm.xlu1 %8638, %v6383_v56  }
 0x5eb   :  { %968 = vperm.xlu0 %8637, %v6382_v57  }
 0x5ee   :  { %1439 = vperm.xlu1 %8638, %v6441_v58  }
 0x5ef   :  { %1434 = vperm.xlu0 %8637, %v6440_v59  }
 0x5f2   :  { %1673 = vperm.xlu1 %8638, %v6455_v60  }
 0x5f3   :  { %1579 = vperm.xlu0 %8637, %v1576_v61  }
 0x5f6   :  { %1683 = vperm.xlu1 %8638, %v6457_v62  }
 0x5f7   :  { %1678 = vperm.xlu0 %8637, %v6456_v63  }
 0x5fb   :  { %1688 = vperm.xlu0 %8637, %v6458_v0  }
 0x62c   :  { %v1120_v2 = vpop.permute.xlu1 %1119 }
 0x62d   :  { %v1134_v3 = vmul.f32 %v6393_v1, %v1120_v2  ;;  %v1118_v4 = vpop.permute.xlu0 %1117 }
 0x62e   :  { %v1133_v5 = vmul.f32 %v6393_v1, %v1118_v4 }
 0x630   :  { %v8203_v6 = vpack.c.bf16 %v1134_v3, %v1133_v5  ;;  %v1124_v7 = vpop.permute.xlu1 %1123 }
 0x631   :  { %v1136_v8 = vmul.f32 %v6393_v1, %v1124_v7  ;;  %v1122_v9 = vpop.permute.xlu0 %1121 }
 0x632   :  { %v1135_v10 = vmul.f32 %v6393_v1, %v1122_v9  ;;  %8204 = vmatprep.subr.bf16.mxu1 %v8203_v6 }
 0x633   :  { %8206 = vmatpush3.bf16.msra.mxu1 %v8203_v6 }
 0x634   :  { %v8207_v11 = vpack.c.bf16 %v1136_v8, %v1135_v10  ;;  %v1152_v13 = vpop.permute.xlu1 %1151 }
 0x635   :  { %v1150_v14 = vpop.permute.xlu0 %1149  ;;  %v1166_v16 = vmul.f32 %v6397_v15, %v1152_v13 }
 0x636   :  { %8208 = vmatprep.subr.bf16.mxu1 %v8207_v11  ;;  %v1165_v17 = vmul.f32 %v6397_v15, %v1150_v14 }
 0x637   :  { %8210 = vmatpush3.bf16.msra.mxu1 %v8207_v11 }
 0x638   :  { %8212 = vmatprep.subr.bf16.mxu1 %v9346_v38  ;;  %v1156_v19 = vpop.permute.xlu1 %1155  ;;  %v8219_v23 = vpack.c.bf16 %v1166_v16, %v1165_v17 }
 0x639   :  { %v1154_v22 = vpop.permute.xlu0 %1153  ;;  %v1168_v27 = vmul.f32 %v6397_v15, %v1156_v19 }
 0x63a   :  { %v1167_v28 = vmul.f32 %v6397_v15, %v1154_v22 }
 0x63b   :  { %8214 = vmatpush3.bf16.msra.mxu1 %v9346_v38 }
 0x63c   :  { %8216 = vmatprep.subr.bf16.mxu1 %v9350_v40  ;;  %v8223_v18 = vpack.c.bf16 %v1168_v27, %v1167_v28  ;;  %v6427_v28 = vld [vmem:[%s11038_s7 + $0x88] sm:$0xff] }
 0x63f   :  { %8218 = vmatpush3.bf16.msra.mxu1 %v9350_v40 }
 0x640   :  { %8220 = vmatprep.subr.bf16.mxu1 %v8219_v23 }
 0x643   :  { %8222 = vmatpush3.bf16.msra.mxu1 %v8219_v23 }
 0x644   :  { %8224 = vmatprep.subr.bf16.mxu1 %v8223_v18 }
 0x647   :  { %8226 = vmatpush3.bf16.msra.mxu1 %v8223_v18  ;;  %v6428_v18 = vld [vmem:[%s11038_s7 + $0x90] sm:$0xff] }
 0x649   :  { %v1215_v40 = vpop.permute.xlu1 %1214 }
 0x64a   :  { %7536 = vmatmul.mubr.msk.f32.vlgmr.msra.gmra.mrb[8].mxu1 %vm287_vm2, %v6399_v25  ;;  %v1210_v29 = vpop.permute.xlu0 %1209  ;;  %v6429_v25 = vld [vmem:[%s11038_s7 + $0x98] sm:$0xff] }
 0x64b   :  { %7538 = vmatprep.mubr.msk.f32.mxu1 %vm287_vm2, %v6400_v26  ;;  %v6430_v26 = vld [vmem:[%s11038_s7 + $0xa0] sm:$0xff] }
 0x64d   :  { %v1225_v45 = vpop.permute.xlu1 %1224 }
 0x64e   :  { %7539 = vmatmul.mubr.msk.f32.gmra.mrb[10].mxu1 %vm287_vm2, %v6401_v30  ;;  %v1220_v47 = vpop.permute.xlu0 %1219  ;;  %v6431_v30 = vld [vmem:[%s11038_s7 + $0xa8] sm:$0xff] }
 0x64f   :  { %7541 = vmatprep.mubr.msk.f32.mxu1 %vm287_vm2, %v6402_v31  ;;  %v6432_v31 = vld [vmem:[%s11038_s7 + $0xb0] sm:$0xff] }
 0x651   :  { %v1195_v55 = vpop.permute.xlu1 %1194 }
 0x652   :  { %7542 = vmatmul.mubr.msk.f32.gmra.mrb[12].mxu1 %vm287_vm2, %v6403_v32  ;;  %v1190_v56 = vpop.permute.xlu0 %1189  ;;  %v6433_v32 = vld [vmem:[%s11038_s7 + $0xb8] sm:$0xff] }
 0x653   :  { %7544 = vmatprep.mubr.msk.f32.mxu1 %vm287_vm2, %v6404_v33  ;;  %v8962_v33 = vmov 0.0|0.0  }
 0x654   :  { %8235 = vmatprep.subr.bf16.mxu1 %v8962_v33 }
 0x655   :  { %v1205_v60 = vpop.permute.xlu1 %1204 }
 0x656   :  { %7545 = vmatmul.mubr.msk.f32.gmra.mrb[14].mxu1 %vm287_vm2, %v6405_v34  ;;  %v1200_v62 = vpop.permute.xlu0 %1199  ;;  %v8964_v34 = vmov 0.0  }
 0x657   :  { %7575 = vmatprep.mubr.msk.f32.mxu1 %vm8963_vm4, %v8964_v34 }
 0x659   :  { %v493_v21 = vpop.permute.xlu1 %492 }
 0x65a   :  { %v488_v24 = vpop.permute.xlu0 %487 }
 0x65d   :  { %v964_v35 = vpop.permute.xlu1 %963 }
 0x65e   :  { %v959_v36 = vpop.permute.xlu0 %958 }
 0x661   :  { %v1430_v37 = vpop.permute.xlu1 %1429 }
 0x71d   :  { %v7537_v38 = vpop.f32.mrb[8].mxu1 }
 0x71e   :  { %v1317_v39 = vpop.f32.mrb[9].mxu1  ;;  %v1323_v57 = vadd.f32 %v7537_v38, %v1195_v55  ;;  %v1425_v38 = vpop.permute.xlu0 %1424 }
 0x71f   :  { %v1318_v58 = vadd.f32 %v1317_v39, %v1190_v56  ;;  %v503_v39 = vpop.permute.xlu1 %502 }
 0x721   :  { %v7540_v20 = vpop.f32.mrb[10].mxu1 }
 0x722   :  { %v1327_v12 = vpop.f32.mrb[11].mxu1  ;;  %v1333_v63 = vadd.f32 %v7540_v20, %v1205_v60  ;;  %v498_v20 = vpop.permute.xlu0 %497 }
 0x723   :  { %v1328_v1 = vadd.f32 %v1327_v12, %v1200_v62 }
 0x725   :  { %v7543_v41 = vpop.f32.mrb[12].mxu1 }
 0x726   :  { %v1343_v42 = vadd.f32 %v7543_v41, %v1215_v40  ;;  %v1337_v43 = vpop.f32.mrb[13].mxu1  ;;  %v969_v41 = vpop.permute.xlu0 %968 }
 0x727   :  { %v1338_v44 = vadd.f32 %v1337_v43, %v1210_v29  ;;  %v974_v29 = vpop.permute.xlu1 %973  ;;  %v8551_v43 = vadd.f32 %v964_v35, %v493_v21 }
 0x728   :  { %v6423_v46 = vmul.f32 -1.442695, %v1343_v42 }
 0x729   :  { %v6422_v48 = vmul.f32 -1.442695, %v1338_v44  ;;  %v7546_v49 = vpop.f32.mrb[14].mxu1 }
 0x72a   :  { %8687 = vpow2.f32 %v6423_v46  ;;  %v1353_v50 = vadd.f32 %v7546_v49, %v1225_v45  ;;  %v1347_v51 = vpop.f32.mrb[15].mxu1  ;;  %v8554_v45 = vadd.f32 %v959_v36, %v488_v24  ;;  %v8552_v46 = vadd.f32 %v8551_v43, %v1430_v37  ;;  %v6472_v43 = vld [vmem:[%s11034_s6 + $0xc0] sm:$0xff] }
 0x72b   :  { %8689 = vpow2.f32 %v6422_v48  ;;  %v1348_v52 = vadd.f32 %v1347_v51, %v1220_v47  ;;  %v1440_v48 = vpop.permute.xlu1 %1439  ;;  %v1435_v51 = vpop.permute.xlu0 %1434 }
 0x72c   :  { %v6425_v53 = vmul.f32 -1.442695, %v1353_v50  ;;  %v8555_v47 = vadd.f32 %v8554_v45, %v1425_v38  ;;  %v8557_v50 = vadd.f32 %v974_v29, %v503_v39  ;;  %v6479_v29 = vld [vmem:[%s11034_s6 + $0xf8] sm:$0xff]  ;;  %v6474_v45 = vld [vmem:[%s11034_s6 + $0xd0] sm:$0xff] }
 0x72d   :  { %v6424_v54 = vmul.f32 -1.442695, %v1348_v52 }
 0x72e   :  { %8691 = vpow2.f32 %v6425_v53  ;;  %v8558_v56 = vadd.f32 %v8557_v50, %v1440_v48  ;;  %v6503_v48 = vld [vmem:[%s11036_s8 + $0xd8] sm:$0xff] }
 0x72f   :  { %8693 = vpow2.f32 %v6424_v54  ;;  %v8560_v54 = vadd.f32 %v969_v41, %v498_v20  ;;  %v6477_v20 = vld [vmem:[%s11034_s6 + $0xe8] sm:$0xff]  ;;  %v6478_v41 = vld [vmem:[%s11034_s6 + $0xf0] sm:$0xff] }
 0x730   :  { %8695 = vtanh.f32 %v1323_v57  ;;  %v9527_v57 = vld [vmem:[%s11033_s1] ss:$0 sm:$0xff] }
 0x731   :  { %8697 = vtanh.f32 %v1318_v58 }
 0x734   :  { %v8688_v59 = vpop.eup %8687 }
 0x735   :  { %v8690_v61 = vpop.eup %8689  ;;  %v1373_v0 = vadd.f32 1.0, %v8688_v59  ;;  %v8561_v59 = vadd.f32 %v8560_v54, %v1435_v51  ;;  %v8929_v51 = vld [vmem:[%s11037_s2] ss:$0 sm:$0xff] }
 0x736   :  { %v1372_v2 = vadd.f32 1.0, %v8690_v61 }
 0x737   :  { %8699 = vrcp.f32 %v1373_v0 }
 0x738   :  { %v8692_v3 = vpop.eup %8691  ;;  %8701 = vrcp.f32 %v1372_v2 }
 0x739   :  { %v8694_v4 = vpop.eup %8693  ;;  %8703 = vtanh.f32 %v1333_v63  ;;  %v1375_v5 = vadd.f32 1.0, %v8692_v3 }
 0x73a   :  { %8705 = vtanh.f32 %v1328_v1  ;;  %v1374_v6 = vadd.f32 1.0, %v8694_v4  ;;  %v8696_v7 = vpop.eup %8695 }
 0x73b   :  { %8707 = vrcp.f32 %v1375_v5  ;;  %v8698_v8 = vpop.eup %8697  ;;  %v1575_v5 = vld [vmem:[%s11040_s9] sm:$0x3] }
 0x73c   :  { %8709 = vrcp.f32 %v1374_v6  ;;  %v6451_v6 = vld [vmem:[%s11031_s3 + $0x20] sm:$0xff] }
 0x741   :  { %v8700_v9 = vpop.eup %8699 }
 0x742   :  { %v8702_v10 = vpop.eup %8701  ;;  %v1385_v11 = vmul.f32 %v8700_v9, %v8696_v7  ;;  %v8928_v7 = vld [vmem:[%s11030_s0] sm:$0xf]  ;;  %v1580_v9 = vpop.permute.xlu0 %1579 }
 0x743   :  { %v8704_v13 = vpop.eup %8703  ;;  %v1384_v14 = vmul.f32 %v8702_v10, %v8698_v8  ;;  %v9546_v8 = vmul.f32 %v8928_v7, %v9527_v57 }
 0x744   :  { %v8706_v15 = vpop.eup %8705 }
 0x745   :  { %v8708_v16 = vpop.eup %8707  ;;  %v8227_v17 = vpack.c.bf16 %v1385_v11, %v1384_v14  ;;  %v1658_v11 = vrot.slane %v9546_v8, 2 }
 0x746   :  { %v8710_v19 = vpop.eup %8709  ;;  %v1387_v22 = vmul.f32 %v8708_v16, %v8704_v13 }
 0x747   :  { %8228 = vmatprep.subr.bf16.mxu0 %v8227_v17  ;;  %v1386_v23 = vmul.f32 %v8710_v19, %v8706_v15  ;;  %v6453_v19 = vld [vmem:[%s11031_s3 + $0x30] sm:$0xff] }
 0x748   :  { %8230 = vmatpush3.bf16.msra.mxu0 %v8227_v17  ;;  %v6452_v17 = vld [vmem:[%s11031_s3 + $0x28] sm:$0xff] }
 0x749   :  { %v8231_v27 = vpack.c.bf16 %v1387_v22, %v1386_v23  ;;  %v6454_v22 = vld [vmem:[%s11031_s3 + $0x38] sm:$0xff]  ;;  %v1679_v23 = vpop.permute.xlu0 %1678 }
 0x74b   :  { %8232 = vmatprep.subr.bf16.mxu0 %v8231_v27 }
 0x74c   :  { %8234 = vmatpush3.bf16.msra.mxu0 %v8231_v27  ;;  %v1674_v27 = vpop.permute.xlu1 %1673 }
 0x74f   :  { %7556 = vmatmul.mubr.msk.f32.vlgmr.msra.gmra.mrb[24].mxu0 %vm505_vm3, %v6427_v28 }
 0x750   :  { %7558 = vmatprep.mubr.msk.f32.mxu0 %vm505_vm3, %v6428_v18  ;;  %v1684_v24 = vpop.permute.xlu1 %1683 }
 0x753   :  { %7559 = vmatmul.mubr.msk.f32.gmra.mrb[26].mxu0 %vm505_vm3, %v6429_v25 }
 0x754   :  { %7561 = vmatprep.mubr.msk.f32.mxu0 %vm505_vm3, %v6430_v26 }
 0x757   :  { %7562 = vmatmul.mubr.msk.f32.gmra.mrb[8].mxu0 %vm505_vm3, %v6431_v30 }
 0x758   :  { %7564 = vmatprep.mubr.msk.f32.mxu0 %vm505_vm3, %v6432_v31  ;;  %v1689_v31 = vpop.permute.xlu0 %1688 }
 0x75b   :  { %7565 = vmatmul.mubr.msk.f32.gmra.mrb[10].mxu0 %vm505_vm3, %v6433_v32 }
 0x822   :  { %v7557_v40 = vpop.f32.mrb[24].mxu0 }
 0x823   :  { %v1532_v12 = vpop.f32.mrb[25].mxu0  ;;  %v6464_v40 = vld [vmem:[%s11035_s5 + $0xc0] sm:$0xff] }
 0x824   :  { %v6476_v12 = vld [vmem:[%s11034_s6 + $0xe0] sm:$0xff]  ;;  %7610 = vmatprep.mubr.msk.f32.mxu0 %vm287_vm2, %v6464_v40 }
 0x826   :  { %v7560_v42 = vpop.f32.mrb[26].mxu0 }
 0x827   :  { %v1540_v44 = vpop.f32.mrb[27].mxu0  ;;  %v6473_v42 = vld [vmem:[%s11034_s6 + $0xc8] sm:$0xff] }
 0x828   :  { %v6475_v44 = vld [vmem:[%s11034_s6 + $0xd8] sm:$0xff] }
 0x82a   :  { %v7563_v49 = vpop.f32.mrb[8].mxu0 }
 0x82b   :  { %v8553_v52 = vadd.f32 %v8552_v46, %v7563_v49  ;;  %v1548_v53 = vpop.f32.mrb[9].mxu0  ;;  %v6501_v46 = vld [vmem:[%s11036_s8 + $0xc8] sm:$0xff]  ;;  %v6502_v49 = vld [vmem:[%s11036_s8 + $0xd0] sm:$0xff] }
 0x82c   :  { %v8556_v55 = vadd.f32 %v8555_v47, %v1548_v53  ;;  %v6500_v47 = vld [vmem:[%s11036_s8 + $0xc0] sm:$0xff] }
 0x82d   :  { %v1572_v58 = vmul.f32 %v9527_v57, %v8553_v52 }
 0x82e   :  { %v1571_v60 = vmul.f32 %v9527_v57, %v8556_v55  ;;  %v7566_v61 = vpop.f32.mrb[10].mxu0 }
 0x82f   :  { %v8559_v62 = vadd.f32 %v8558_v56, %v7566_v61  ;;  %v1558_v63 = vpop.f32.mrb[11].mxu0  ;;  %v8930_v61 = vld [vmem:[%s11037_s2 + $0x1] ss:$0 sm:$0xff] }
 0x830   :  { %v8236_v0 = vpack.c.bf16 %v1572_v58, %v1571_v60  ;;  %v8562_v1 = vadd.f32 %v8561_v59, %v1558_v63 }
 0x831   :  { %v1574_v2 = vmul.f32 %v9527_v57, %v8559_v62 }
 0x832   :  { %v1573_v3 = vmul.f32 %v9527_v57, %v8562_v1  ;;  %8237 = vmatpush3.bf16.msra.mxu1 %v8236_v0 }
 0x833   :  { %8238 = vmatprep.subr.bf16.mxu1 %v8962_v33 }
 0x834   :  { %v8239_v4 = vpack.c.bf16 %v1574_v2, %v1573_v3 }
 0x836   :  { %8240 = vmatpush3.bf16.msra.mxu1 %v8239_v4 }
 0x839   :  { %7576 = vmatmul.mubr.msk.f32.vlgmr.msra.gmra.mrb[16].mxu1 %vm505_vm3, %v1575_v5 }
 0x83a   :  { %7580 = vmatprep.mubr.msk.f32.mxu1 %vm68_vm1, %v6451_v6  ;;  %v8931_v6 = vld [vmem:[%s11037_s2 + $0x2] ss:$0 sm:$0xff] }
 0x90c   :  { %v1651_v10 = vpop.f32.mrb[16].mxu1 }
 0x90d   :  { %v1652_v13 = vadd.f32 %v1651_v10, %v1580_v9  ;;  %v7577_v14 = vpop.f32.mrb[17].mxu1 }
 0x90f   :  { %v1655_v15 = vmul.f32 %v9527_v57, %v1652_v13 }
 0x911   :  { %v9550_v16 = vadd.f32 %v1658_v11, %v1655_v15 }
 0x913   :  { %7578 = vmatprep.subr.msk.mxu1 %vm81_vm0, %v9550_v16 }
 0x914   :  { %7579 = vmatpush3.msk.msra.mxu1 %vm81_vm0, %v9550_v16 }
 0x915   :  { %7581 = vmatmul.mubr.msk.f32.vlgmr.msra.gmra.mrb[18].mxu1 %vm68_vm1, %v6452_v17 }
 0x916   :  { %7583 = vmatprep.mubr.msk.f32.mxu1 %vm68_vm1, %v6453_v19 }
 0x919   :  { %7584 = vmatmul.mubr.msk.f32.gmra.mrb[20].mxu1 %vm68_vm1, %v6454_v22  ;;  %v6465_v22 = vld [vmem:[%s11035_s5 + $0xc8] sm:$0xff] }
 0x9e8   :  { %v7582_v28 = vpop.f32.mrb[18].mxu1 }
 0x9e9   :  { %v1778_v18 = vadd.f32 %v7582_v28, %v1679_v23  ;;  %v1772_v25 = vpop.f32.mrb[19].mxu1  ;;  %v6466_v23 = vld [vmem:[%s11035_s5 + $0xd0] sm:$0xff]  ;;  %v6468_v28 = vld [vmem:[%s11035_s5 + $0xe0] sm:$0xff] }
 0x9ea   :  { %v1773_v26 = vadd.f32 %v1772_v25, %v1674_v27  ;;  %v6467_v27 = vld [vmem:[%s11035_s5 + $0xd8] sm:$0xff]  ;;  %v6470_v25 = vld [vmem:[%s11035_s5 + $0xf0] sm:$0xff] }
 0x9eb   :  { %v9569_v30 = vmul.f32 %v9527_v57, %v1778_v18  ;;  %v6469_v18 = vld [vmem:[%s11035_s5 + $0xe8] sm:$0xff] }
 0x9ec   :  { %v9572_v32 = vmul.f32 %v9527_v57, %v1773_v26  ;;  %v7585_v21 = vpop.f32.mrb[20].mxu1  ;;  %v6471_v26 = vld [vmem:[%s11035_s5 + $0xf8] sm:$0xff] }
 0x9ed   :  { %v1788_v35 = vadd.f32 %v7585_v21, %v1689_v31  ;;  %1797 = vrot.lane.b32.xlu0 %v9569_v30, %s8960_s18  ;;  %v1782_v36 = vpop.f32.mrb[21].mxu1  ;;  %v1808_v63 = vmul.f32 %v8930_v61, %v9569_v30  ;;  %v6492_v31 = vld [vmem:[%s11038_s7 + $0xc0] sm:$0xff] }
 0x9ee   :  { %v1783_v37 = vadd.f32 %v1782_v36, %v1684_v24  ;;  %1795 = vrot.lane.b32.xlu1 %v9572_v32, %s8960_s18  ;;  %v1807_v62 = vmul.f32 %v8930_v61, %v9572_v32  ;;  %7630 = vmatprep.mubr.msk.f32.mxu1 %vm505_vm3, %v6492_v31 }
 0x9ef   :  { %v9579_v38 = vmul.f32 %v9527_v57, %v1788_v35 }
 0x9f0   :  { %v9582_v39 = vmul.f32 %v9527_v57, %v1783_v37  ;;  %v8249_v3 = vpack.c.bf16 %v1808_v63, %v1807_v62 }
 0x9f1   :  { %1801 = vrot.lane.b32.xlu0 %v9579_v38, %s8960_s18  ;;  %v1810_v5 = vmul.f32 %v8930_v61, %v9579_v38 }
 0x9f2   :  { %1799 = vrot.lane.b32.xlu1 %v9582_v39, %s8960_s18  ;;  %v1809_v4 = vmul.f32 %v8930_v61, %v9582_v39 }
 0x9f4   :  { %v8253_v10 = vpack.c.bf16 %v1810_v5, %v1809_v4 }
 0x9f5   :  { %1813 = vrot.lane.b32.xlu0 %v9569_v30, %s8961_s19 }
 0x9f6   :  { %1811 = vrot.lane.b32.xlu1 %v9572_v32, %s8961_s19 }
 0x9f9   :  { %1817 = vrot.lane.b32.xlu0 %v9579_v38, %s8961_s19 }
 0x9fa   :  { %1815 = vrot.lane.b32.xlu1 %v9582_v39, %s8961_s19 }
 0x9fd   :  { %1868 = vperm.xlu0 %8637, %v6477_v20  }
 0x9fe   :  { %1863 = vperm.xlu1 %8638, %v6476_v12  }
 0xa01   :  { %1878 = vperm.xlu0 %8637, %v6479_v29  }
 0xa02   :  { %1873 = vperm.xlu1 %8638, %v6478_v41  }
 0xa05   :  { %1848 = vperm.xlu0 %8637, %v6473_v42  }
 0xa06   :  { %1843 = vperm.xlu1 %8638, %v6472_v43  }
 0xa09   :  { %1858 = vperm.xlu0 %8637, %v6475_v44  }
 0xa0a   :  { %1853 = vperm.xlu1 %8638, %v6474_v45  }
 0xa0d   :  { %2067 = vperm.xlu0 %8637, %v6501_v46  }
 0xa0e   :  { %2062 = vperm.xlu1 %8638, %v6500_v47  }
 0xa11   :  { %2077 = vperm.xlu0 %8637, %v6503_v48  }
 0xa12   :  { %2072 = vperm.xlu1 %8638, %v6502_v49  }
 0xa5f   :  { %v1798_v50 = vpop.permute.xlu0 %1797 }
 0xa60   :  { %v1804_v52 = vmul.f32 %v8929_v51, %v1798_v50  ;;  %v1796_v53 = vpop.permute.xlu1 %1795 }
 0xa61   :  { %v1803_v54 = vmul.f32 %v8929_v51, %v1796_v53 }
 0xa63   :  { %v8241_v55 = vpack.c.bf16 %v1804_v52, %v1803_v54  ;;  %v1802_v56 = vpop.permute.xlu0 %1801 }
 0xa64   :  { %v1806_v58 = vmul.f32 %v8929_v51, %v1802_v56  ;;  %v1800_v59 = vpop.permute.xlu1 %1799 }
 0xa65   :  { %v1805_v60 = vmul.f32 %v8929_v51, %v1800_v59  ;;  %8242 = vmatprep.subr.bf16.mxu0 %v8241_v55 }
 0xa66   :  { %8244 = vmatpush3.bf16.msra.mxu0 %v8241_v55 }
 0xa67   :  { %v8245_v0 = vpack.c.bf16 %v1806_v58, %v1805_v60  ;;  %v1814_v1 = vpop.permute.xlu0 %1813 }
 0xa68   :  { %v1812_v2 = vpop.permute.xlu1 %1811  ;;  %v1820_v7 = vmul.f32 %v8931_v6, %v1814_v1 }
 0xa69   :  { %8246 = vmatprep.subr.bf16.mxu0 %v8245_v0  ;;  %v1819_v9 = vmul.f32 %v8931_v6, %v1812_v2 }
 0xa6a   :  { %8248 = vmatpush3.bf16.msra.mxu0 %v8245_v0 }
 0xa6b   :  { %8250 = vmatprep.subr.bf16.mxu0 %v8249_v3  ;;  %v1818_v11 = vpop.permute.xlu0 %1817  ;;  %v8257_v14 = vpack.c.bf16 %v1820_v7, %v1819_v9 }
 0xa6c   :  { %v1816_v13 = vpop.permute.xlu1 %1815  ;;  %v1822_v15 = vmul.f32 %v8931_v6, %v1818_v11 }
 0xa6d   :  { %v1821_v17 = vmul.f32 %v8931_v6, %v1816_v13 }
 0xa6e   :  { %8252 = vmatpush3.bf16.msra.mxu0 %v8249_v3 }
 0xa6f   :  { %8254 = vmatprep.subr.bf16.mxu0 %v8253_v10  ;;  %v8261_v19 = vpack.c.bf16 %v1822_v15, %v1821_v17 }
 0xa72   :  { %8256 = vmatpush3.bf16.msra.mxu0 %v8253_v10 }
 0xa73   :  { %8258 = vmatprep.subr.bf16.mxu0 %v8257_v14 }
 0xa76   :  { %8260 = vmatpush3.bf16.msra.mxu0 %v8257_v14 }
 0xa77   :  { %8262 = vmatprep.subr.bf16.mxu0 %v8261_v19 }
 0xa7a   :  { %8264 = vmatpush3.bf16.msra.mxu0 %v8261_v19 }
 0xa7c   :  { %v1869_v36 = vpop.permute.xlu0 %1868 }
 0xa7d   :  { %7611 = vmatmul.mubr.msk.f32.vlgmr.msra.gmra.mrb[28].mxu0 %vm287_vm2, %v6465_v22  ;;  %v1864_v20 = vpop.permute.xlu1 %1863 }
 0xa7e   :  { %7613 = vmatprep.mubr.msk.f32.mxu0 %vm287_vm2, %v6466_v23 }
 0xa80   :  { %v1879_v42 = vpop.permute.xlu0 %1878 }
 0xa81   :  { %7614 = vmatmul.mubr.msk.f32.gmra.mrb[30].mxu0 %vm287_vm2, %v6467_v27  ;;  %v1874_v44 = vpop.permute.xlu1 %1873 }
 0xa82   :  { %7616 = vmatprep.mubr.msk.f32.mxu0 %vm287_vm2, %v6468_v28  ;;  %v6493_v28 = vld [vmem:[%s11038_s7 + $0xc8] sm:$0xff] }
 0xa84   :  { %v1849_v52 = vpop.permute.xlu0 %1848 }
 0xa85   :  { %7617 = vmatmul.mubr.msk.f32.gmra.mrb[32].mxu0 %vm287_vm2, %v6469_v18  ;;  %v1844_v53 = vpop.permute.xlu1 %1843  ;;  %v6494_v18 = vld [vmem:[%s11038_s7 + $0xd0] sm:$0xff] }
 0xa86   :  { %7619 = vmatprep.mubr.msk.f32.mxu0 %vm287_vm2, %v6470_v25  ;;  %v6495_v25 = vld [vmem:[%s11038_s7 + $0xd8] sm:$0xff] }
 0xa88   :  { %v1859_v58 = vpop.permute.xlu0 %1858 }
 0xa89   :  { %7620 = vmatmul.mubr.msk.f32.gmra.mrb[34].mxu0 %vm287_vm2, %v6471_v26  ;;  %v1854_v60 = vpop.permute.xlu1 %1853 }
 0xa8c   :  { %v2068_v26 = vpop.permute.xlu0 %2067 }
 0xa8d   :  { %v2063_v31 = vpop.permute.xlu1 %2062 }
 0xb50   :  { %v7612_v21 = vpop.f32.mrb[28].mxu0 }
 0xb51   :  { %v1971_v24 = vpop.f32.mrb[29].mxu0  ;;  %v1977_v54 = vadd.f32 %v7612_v21, %v1849_v52  ;;  %v6528_v52 = vld [vmem:[%s11034_s6 + $0x120] sm:$0xff] }
 0xb52   :  { %v1972_v55 = vadd.f32 %v1971_v24, %v1844_v53  ;;  %v6531_v53 = vld [vmem:[%s11034_s6 + $0x138] sm:$0xff] }
 0xb54   :  { %v7615_v35 = vpop.f32.mrb[30].mxu0 }
 0xb55   :  { %v1981_v37 = vpop.f32.mrb[31].mxu0  ;;  %v1987_v61 = vadd.f32 %v7615_v35, %v1859_v58  ;;  %v6527_v58 = vld [vmem:[%s11034_s6 + $0x118] sm:$0xff] }
 0xb56   :  { %v1982_v63 = vadd.f32 %v1981_v37, %v1854_v60  ;;  %v6553_v60 = vld [vmem:[%s11036_s8 + $0x108] sm:$0xff] }
 0xb58   :  { %v7618_v40 = vpop.f32.mrb[32].mxu0 }
 0xb59   :  { %v1997_v12 = vadd.f32 %v7618_v40, %v1869_v36  ;;  %v1991_v29 = vpop.f32.mrb[33].mxu0 }
 0xb5a   :  { %v1992_v41 = vadd.f32 %v1991_v29, %v1864_v20  ;;  %v2078_v20 = vpop.permute.xlu0 %2077  ;;  %v2073_v29 = vpop.permute.xlu1 %2072 }
 0xb5b   :  { %v6489_v43 = vmul.f32 -1.442695, %v1997_v12 }
 0xb5c   :  { %v6488_v45 = vmul.f32 -1.442695, %v1992_v41  ;;  %v7621_v46 = vpop.f32.mrb[34].mxu0 }
 0xb5d   :  { %8711 = vpow2.f32 %v6489_v43  ;;  %v2007_v47 = vadd.f32 %v7621_v46, %v1879_v42  ;;  %v2001_v48 = vpop.f32.mrb[35].mxu0 }
 0xb5e   :  { %8713 = vpow2.f32 %v6488_v45  ;;  %v2002_v49 = vadd.f32 %v2001_v48, %v1874_v44  ;;  %v6498_v48 = vld [vmem:[%s11038_s7 + $0xf0] sm:$0xff] }
 0xb5f   :  { %v6491_v50 = vmul.f32 -1.442695, %v2007_v47 }
 0xb60   :  { %v6490_v51 = vmul.f32 -1.442695, %v2002_v49  ;;  %v6499_v49 = vld [vmem:[%s11038_s7 + $0xf8] sm:$0xff] }
 0xb61   :  { %8715 = vpow2.f32 %v6491_v50  ;;  %v6529_v50 = vld [vmem:[%s11034_s6 + $0x128] sm:$0xff] }
 0xb62   :  { %8717 = vpow2.f32 %v6490_v51  ;;  %v6516_v51 = vld [vmem:[%s11035_s5 + $0x100] sm:$0xff] }
 0xb63   :  { %8719 = vtanh.f32 %v1977_v54  ;;  %v6530_v54 = vld [vmem:[%s11034_s6 + $0x130] sm:$0xff] }
 0xb64   :  { %8721 = vtanh.f32 %v1972_v55  ;;  %v6525_v55 = vld [vmem:[%s11034_s6 + $0x108] sm:$0xff] }
 0xb67   :  { %v8712_v56 = vpop.eup %8711 }
 0xb68   :  { %v8714_v59 = vpop.eup %8713  ;;  %v2027_v62 = vadd.f32 1.0, %v8712_v56  ;;  %v6524_v56 = vld [vmem:[%s11034_s6 + $0x100] sm:$0xff] }
 0xb69   :  { %v2026_v0 = vadd.f32 1.0, %v8714_v59  ;;  %v6526_v59 = vld [vmem:[%s11034_s6 + $0x110] sm:$0xff] }
 0xb6a   :  { %8723 = vrcp.f32 %v2027_v62  ;;  %v6555_v62 = vld [vmem:[%s11036_s8 + $0x118] sm:$0xff] }
 0xb6b   :  { %v8716_v1 = vpop.eup %8715  ;;  %8725 = vrcp.f32 %v2026_v0 }
 0xb6c   :  { %v8718_v2 = vpop.eup %8717  ;;  %8727 = vtanh.f32 %v1987_v61  ;;  %v2029_v3 = vadd.f32 1.0, %v8716_v1  ;;  %v6552_v61 = vld [vmem:[%s11036_s8 + $0x100] sm:$0xff] }
 0xb6d   :  { %8729 = vtanh.f32 %v1982_v63  ;;  %v2028_v4 = vadd.f32 1.0, %v8718_v2  ;;  %v8720_v5 = vpop.eup %8719  ;;  %v6554_v63 = vld [vmem:[%s11036_s8 + $0x110] sm:$0xff]  ;;  %v8932_v1 = vld [vmem:[%s11037_s2 + $0x3] ss:$0 sm:$0xff] }
 0xb6e   :  { %8731 = vrcp.f32 %v2029_v3  ;;  %v8722_v6 = vpop.eup %8721 }
 0xb6f   :  { %8733 = vrcp.f32 %v2028_v4 }
 0xb74   :  { %v8724_v7 = vpop.eup %8723 }
 0xb75   :  { %v8726_v9 = vpop.eup %8725  ;;  %v2039_v10 = vmul.f32 %v8724_v7, %v8720_v5 }
 0xb76   :  { %v8728_v11 = vpop.eup %8727  ;;  %v2038_v13 = vmul.f32 %v8726_v9, %v8722_v6 }
 0xb77   :  { %v8730_v14 = vpop.eup %8729 }
 0xb78   :  { %v8732_v15 = vpop.eup %8731  ;;  %v8265_v17 = vpack.c.bf16 %v2039_v10, %v2038_v13 }
 0xb79   :  { %v8734_v19 = vpop.eup %8733  ;;  %v2041_v22 = vmul.f32 %v8732_v15, %v8728_v11  ;;  %v8933_v11 = vld [vmem:[%s11037_s2 + $0x4] ss:$0 sm:$0xff] }
 0xb7a   :  { %8266 = vmatprep.subr.bf16.mxu1 %v8265_v17  ;;  %v2040_v23 = vmul.f32 %v8734_v19, %v8730_v14 }
 0xb7b   :  { %8268 = vmatpush3.bf16.msra.mxu1 %v8265_v17 }
 0xb7c   :  { %v8269_v27 = vpack.c.bf16 %v2041_v22, %v2040_v23 }
 0xb7e   :  { %8270 = vmatprep.subr.bf16.mxu1 %v8269_v27 }
 0xb7f   :  { %8272 = vmatpush3.bf16.msra.mxu1 %v8269_v27 }
 0xb82   :  { %7631 = vmatmul.mubr.msk.f32.vlgmr.msra.gmra.mrb[22].mxu1 %vm505_vm3, %v6493_v28  ;;  %v8934_v28 = vld [vmem:[%s11037_s2 + $0x5] ss:$0 sm:$0xff] }
 0xb83   :  { %7633 = vmatprep.mubr.msk.f32.mxu1 %vm505_vm3, %v6494_v18 }
 0xb86   :  { %7634 = vmatmul.mubr.msk.f32.gmra.mrb[24].mxu1 %vm505_vm3, %v6495_v25 }
 0xc55   :  { %v7632_v21 = vpop.f32.mrb[22].mxu1 }
 0xc56   :  { %v2196_v24 = vadd.f32 %v7632_v21, %v2068_v26  ;;  %v2190_v35 = vpop.f32.mrb[23].mxu1 }
 0xc57   :  { %v2191_v36 = vadd.f32 %v2190_v35, %v2063_v31 }
 0xc58   :  { %v2230_v37 = vadd.f32 %v2196_v24, %v9569_v30 }
 0xc59   :  { %v2229_v40 = vadd.f32 %v2191_v36, %v9572_v32  ;;  %v7635_v12 = vpop.f32.mrb[24].mxu1 }
 0xc5a   :  { %v9696_v41 = vmul.f32 %v9527_v57, %v2230_v37  ;;  %v2206_v42 = vadd.f32 %v7635_v12, %v2078_v20  ;;  %v2200_v43 = vpop.f32.mrb[25].mxu1  ;;  %v6517_v20 = vld [vmem:[%s11035_s5 + $0x108] sm:$0xff]  ;;  %v6519_v12 = vld [vmem:[%s11035_s5 + $0x118] sm:$0xff] }
 0xc5b   :  { %v9699_v44 = vmul.f32 %v9527_v57, %v2229_v40  ;;  %v2201_v45 = vadd.f32 %v2200_v43, %v2073_v29  ;;  %v6518_v40 = vld [vmem:[%s11035_s5 + $0x110] sm:$0xff]  ;;  %v6520_v29 = vld [vmem:[%s11035_s5 + $0x120] sm:$0xff] }
 0xc5c   :  { %v2232_v46 = vadd.f32 %v2206_v42, %v9579_v38  ;;  %2243 = vrot.lane.b32.xlu0 %v9696_v41, %s8960_s18  ;;  %v6496_v38 = vld [vmem:[%s11038_s7 + $0xe0] sm:$0xff]  ;;  %v2254_v14 = vmul.f32 %v8933_v11, %v9696_v41  ;;  %v6521_v42 = vld [vmem:[%s11035_s5 + $0x128] sm:$0xff]  ;;  %v6522_v43 = vld [vmem:[%s11035_s5 + $0x130] sm:$0xff] }
 0xc5d   :  { %v2231_v30 = vadd.f32 %v2201_v45, %v9582_v39  ;;  %2241 = vrot.lane.b32.xlu1 %v9699_v44, %s8960_s18  ;;  %v6497_v39 = vld [vmem:[%s11038_s7 + $0xe8] sm:$0xff]  ;;  %7636 = vmatprep.mubr.msk.f32.mxu1 %vm505_vm3, %v6496_v38  ;;  %v2253_v13 = vmul.f32 %v8933_v11, %v9699_v44  ;;  %v6523_v45 = vld [vmem:[%s11035_s5 + $0x138] sm:$0xff] }
 0xc5e   :  { %v9708_v32 = vmul.f32 %v9527_v57, %v2232_v46  ;;  %7637 = vmatmul.mubr.msk.f32.gmra.mrb[26].mxu1 %vm505_vm3, %v6497_v39  ;;  %v6544_v46 = vld [vmem:[%s11038_s7 + $0x100] sm:$0xff] }
 0xc5f   :  { %v9711_v47 = vmul.f32 %v9527_v57, %v2231_v30  ;;  %7639 = vmatprep.mubr.msk.f32.mxu1 %vm505_vm3, %v6498_v48  ;;  %v8281_v22 = vpack.c.bf16 %v2254_v14, %v2253_v13 }
 0xc60   :  { %2247 = vrot.lane.b32.xlu0 %v9708_v32, %s8960_s18  ;;  %v2256_v27 = vmul.f32 %v8933_v11, %v9708_v32 }
 0xc61   :  { %2245 = vrot.lane.b32.xlu1 %v9711_v47, %s8960_s18  ;;  %v2255_v23 = vmul.f32 %v8933_v11, %v9711_v47 }
 0xc62   :  { %7640 = vmatmul.mubr.msk.f32.gmra.mrb[28].mxu1 %vm505_vm3, %v6499_v49 }
 0xc63   :  { %7666 = vmatprep.mubr.msk.f32.mxu1 %vm287_vm2, %v6516_v51  ;;  %v8285_v26 = vpack.c.bf16 %v2256_v27, %v2255_v23 }
 0xc64   :  { %2259 = vrot.lane.b32.xlu0 %v9696_v41, %s8961_s19 }
 0xc65   :  { %2257 = vrot.lane.b32.xlu1 %v9699_v44, %s8961_s19 }
 0xc68   :  { %2263 = vrot.lane.b32.xlu0 %v9708_v32, %s8961_s19 }
 0xc69   :  { %2261 = vrot.lane.b32.xlu1 %v9711_v47, %s8961_s19 }
 0xc6c   :  { %2314 = vperm.xlu0 %8637, %v6529_v50  }
 0xc6d   :  { %2309 = vperm.xlu1 %8638, %v6528_v52  }
 0xc70   :  { %2324 = vperm.xlu0 %8637, %v6531_v53  }
 0xc71   :  { %2319 = vperm.xlu1 %8638, %v6530_v54  }
 0xc74   :  { %2294 = vperm.xlu0 %8637, %v6525_v55  }
 0xc75   :  { %2289 = vperm.xlu1 %8638, %v6524_v56  }
 0xc78   :  { %2304 = vperm.xlu0 %8637, %v6527_v58  }
 0xc79   :  { %2299 = vperm.xlu1 %8638, %v6526_v59  }
 0xc7c   :  { %2513 = vperm.xlu0 %8637, %v6553_v60  }
 0xc7d   :  { %2508 = vperm.xlu1 %8638, %v6552_v61  }
 0xc80   :  { %2523 = vperm.xlu0 %8637, %v6555_v62  }
 0xc81   :  { %2518 = vperm.xlu1 %8638, %v6554_v63  }
 0xcce   :  { %v2244_v0 = vpop.permute.xlu0 %2243 }
 0xccf   :  { %v2250_v2 = vmul.f32 %v8932_v1, %v2244_v0  ;;  %v2242_v3 = vpop.permute.xlu1 %2241 }
 0xcd0   :  { %v2249_v4 = vmul.f32 %v8932_v1, %v2242_v3 }
 0xcd2   :  { %v8273_v5 = vpack.c.bf16 %v2250_v2, %v2249_v4  ;;  %v2248_v6 = vpop.permute.xlu0 %2247 }
 0xcd3   :  { %v2252_v7 = vmul.f32 %v8932_v1, %v2248_v6  ;;  %v2246_v9 = vpop.permute.xlu1 %2245 }
 0xcd4   :  { %v2251_v10 = vmul.f32 %v8932_v1, %v2246_v9  ;;  %8274 = vmatprep.subr.bf16.mxu1 %v8273_v5 }
 0xcd5   :  { %8276 = vmatpush3.bf16.msra.mxu1 %v8273_v5 }
 0xcd6   :  { %v8277_v15 = vpack.c.bf16 %v2252_v7, %v2251_v10  ;;  %v2260_v17 = vpop.permute.xlu0 %2259 }
 0xcd7   :  { %v2258_v19 = vpop.permute.xlu1 %2257  ;;  %v2266_v18 = vmul.f32 %v8934_v28, %v2260_v17 }
 0xcd8   :  { %8278 = vmatprep.subr.bf16.mxu1 %v8277_v15  ;;  %v2265_v25 = vmul.f32 %v8934_v28, %v2258_v19 }
 0xcd9   :  { %8280 = vmatpush3.bf16.msra.mxu1 %v8277_v15 }
 0xcda   :  { %8282 = vmatprep.subr.bf16.mxu1 %v8281_v22  ;;  %v2264_v31 = vpop.permute.xlu0 %2263  ;;  %v8289_v24 = vpack.c.bf16 %v2266_v18, %v2265_v25 }
 0xcdb   :  { %v2262_v21 = vpop.permute.xlu1 %2261  ;;  %v2268_v35 = vmul.f32 %v8934_v28, %v2264_v31 }
 0xcdc   :  { %v2267_v36 = vmul.f32 %v8934_v28, %v2262_v21 }
 0xcdd   :  { %8284 = vmatpush3.bf16.msra.mxu1 %v8281_v22 }
 0xcde   :  { %8286 = vmatprep.subr.bf16.mxu1 %v8285_v26  ;;  %v8293_v37 = vpack.c.bf16 %v2268_v35, %v2267_v36 }
 0xce1   :  { %8288 = vmatpush3.bf16.msra.mxu1 %v8285_v26 }
 0xce2   :  { %8290 = vmatprep.subr.bf16.mxu1 %v8289_v24 }
 0xce5   :  { %8292 = vmatpush3.bf16.msra.mxu1 %v8289_v24 }
 0xce6   :  { %8294 = vmatprep.subr.bf16.mxu1 %v8293_v37 }
 0xce9   :  { %8296 = vmatpush3.bf16.msra.mxu1 %v8293_v37 }
 0xceb   :  { %v2315_v48 = vpop.permute.xlu0 %2314 }
 0xcec   :  { %7667 = vmatmul.mubr.msk.f32.vlgmr.msra.gmra.mrb[30].mxu1 %vm287_vm2, %v6517_v20  ;;  %v2310_v50 = vpop.permute.xlu1 %2309 }
 0xced   :  { %7669 = vmatprep.mubr.msk.f32.mxu1 %vm287_vm2, %v6518_v40 }
 0xcef   :  { %v2325_v55 = vpop.permute.xlu0 %2324 }
 0xcf0   :  { %7670 = vmatmul.mubr.msk.f32.gmra.mrb[32].mxu1 %vm287_vm2, %v6519_v12  ;;  %v2320_v58 = vpop.permute.xlu1 %2319 }
 0xcf1   :  { %7672 = vmatprep.mubr.msk.f32.mxu1 %vm287_vm2, %v6520_v29  ;;  %v6545_v29 = vld [vmem:[%s11038_s7 + $0x108] sm:$0xff] }
 0xcf3   :  { %v2295_v2 = vpop.permute.xlu0 %2294 }
 0xcf4   :  { %7673 = vmatmul.mubr.msk.f32.gmra.mrb[34].mxu1 %vm287_vm2, %v6521_v42  ;;  %v2290_v3 = vpop.permute.xlu1 %2289  ;;  %v6546_v42 = vld [vmem:[%s11038_s7 + $0x110] sm:$0xff] }
 0xcf5   :  { %7675 = vmatprep.mubr.msk.f32.mxu1 %vm287_vm2, %v6522_v43  ;;  %v6547_v43 = vld [vmem:[%s11038_s7 + $0x118] sm:$0xff] }
 0xcf7   :  { %v2305_v7 = vpop.permute.xlu0 %2304 }
 0xcf8   :  { %7676 = vmatmul.mubr.msk.f32.gmra.mrb[36].mxu1 %vm287_vm2, %v6523_v45  ;;  %v2300_v10 = vpop.permute.xlu1 %2299 }
 0xcf9   :  { %7686 = vmatprep.mubr.msk.f32.mxu1 %vm505_vm3, %v6544_v46 }
 0xcfb   :  { %v2514_v45 = vpop.permute.xlu0 %2513 }
 0xcfc   :  { %v2509_v46 = vpop.permute.xlu1 %2508 }
 0xdbf   :  { %v7668_v30 = vpop.f32.mrb[30].mxu1 }
 0xdc0   :  { %v2417_v38 = vpop.f32.mrb[31].mxu1  ;;  %v2423_v4 = vadd.f32 %v7668_v30, %v2295_v2 }
 0xdc1   :  { %v2418_v5 = vadd.f32 %v2417_v38, %v2290_v3 }
 0xdc3   :  { %v7671_v39 = vpop.f32.mrb[32].mxu1 }
 0xdc4   :  { %v2427_v49 = vpop.f32.mrb[33].mxu1  ;;  %v2433_v11 = vadd.f32 %v7671_v39, %v2305_v7  ;;  %v6577_v7 = vld [vmem:[%s11034_s6 + $0x148] sm:$0xff] }
 0xdc5   :  { %v2428_v14 = vadd.f32 %v2427_v49, %v2300_v10  ;;  %v6579_v10 = vld [vmem:[%s11034_s6 + $0x158] sm:$0xff] }
 0xdc7   :  { %v7674_v51 = vpop.f32.mrb[34].mxu1 }
 0xdc8   :  { %v2443_v52 = vadd.f32 %v7674_v51, %v2315_v48  ;;  %v2437_v53 = vpop.f32.mrb[35].mxu1 }
 0xdc9   :  { %v2438_v54 = vadd.f32 %v2437_v53, %v2310_v50  ;;  %v2524_v50 = vpop.permute.xlu0 %2523  ;;  %v2519_v53 = vpop.permute.xlu1 %2518 }
 0xdca   :  { %v6541_v56 = vmul.f32 -1.442695, %v2443_v52 }
 0xdcb   :  { %v6540_v59 = vmul.f32 -1.442695, %v2438_v54  ;;  %v7677_v60 = vpop.f32.mrb[36].mxu1 }
 0xdcc   :  { %8735 = vpow2.f32 %v6541_v56  ;;  %v2453_v61 = vadd.f32 %v7677_v60, %v2325_v55  ;;  %v2447_v62 = vpop.f32.mrb[37].mxu1 }
 0xdcd   :  { %8737 = vpow2.f32 %v6540_v59  ;;  %v2448_v63 = vadd.f32 %v2447_v62, %v2320_v58 }
 0xdce   :  { %v6543_v0 = vmul.f32 -1.442695, %v2453_v61 }
 0xdcf   :  { %v6542_v1 = vmul.f32 -1.442695, %v2448_v63 }
 0xdd0   :  { %8739 = vpow2.f32 %v6543_v0 }
 0xdd1   :  { %8741 = vpow2.f32 %v6542_v1 }
 0xdd2   :  { %8743 = vtanh.f32 %v2423_v4  ;;  %v6580_v4 = vld [vmem:[%s11034_s6 + $0x160] sm:$0xff] }
 0xdd3   :  { %8745 = vtanh.f32 %v2418_v5  ;;  %v6583_v5 = vld [vmem:[%s11034_s6 + $0x178] sm:$0xff] }
 0xdd6   :  { %v8736_v6 = vpop.eup %8735 }
 0xdd7   :  { %v8738_v9 = vpop.eup %8737  ;;  %v2473_v13 = vadd.f32 1.0, %v8736_v6  ;;  %v6582_v6 = vld [vmem:[%s11034_s6 + $0x170] sm:$0xff] }
 0xdd8   :  { %v2472_v15 = vadd.f32 1.0, %v8738_v9  ;;  %v6576_v9 = vld [vmem:[%s11034_s6 + $0x140] sm:$0xff] }
 0xdd9   :  { %8747 = vrcp.f32 %v2473_v13  ;;  %v6505_v13 = vld [vmem:[%s11036_s8 + $0xe8] sm:$0xff] }
 0xdda   :  { %v8740_v17 = vpop.eup %8739  ;;  %8749 = vrcp.f32 %v2472_v15  ;;  %v6557_v15 = vld [vmem:[%s11036_s8 + $0x128] sm:$0xff] }
 0xddb   :  { %v8742_v19 = vpop.eup %8741  ;;  %8751 = vtanh.f32 %v2433_v11  ;;  %v2475_v22 = vadd.f32 1.0, %v8740_v17  ;;  %v6578_v11 = vld [vmem:[%s11034_s6 + $0x150] sm:$0xff]  ;;  %v6556_v17 = vld [vmem:[%s11036_s8 + $0x120] sm:$0xff] }
 0xddc   :  { %8753 = vtanh.f32 %v2428_v14  ;;  %v2474_v23 = vadd.f32 1.0, %v8742_v19  ;;  %v8744_v27 = vpop.eup %8743  ;;  %v6504_v14 = vld [vmem:[%s11036_s8 + $0xe0] sm:$0xff]  ;;  %v6609_v19 = vld [vmem:[%s11036_s8 + $0x168] sm:$0xff] }
 0xddd   :  { %8755 = vrcp.f32 %v2475_v22  ;;  %v8746_v28 = vpop.eup %8745  ;;  %v6608_v22 = vld [vmem:[%s11036_s8 + $0x160] sm:$0xff] }
 0xdde   :  { %8757 = vrcp.f32 %v2474_v23  ;;  %v6507_v23 = vld [vmem:[%s11036_s8 + $0xf8] sm:$0xff] }
 0xde3   :  { %v8748_v18 = vpop.eup %8747 }
 0xde4   :  { %v8750_v25 = vpop.eup %8749  ;;  %v2485_v26 = vmul.f32 %v8748_v18, %v8744_v27  ;;  %v6506_v27 = vld [vmem:[%s11036_s8 + $0xf0] sm:$0xff] }
 0xde5   :  { %v8752_v31 = vpop.eup %8751  ;;  %v2484_v21 = vmul.f32 %v8750_v25, %v8746_v28  ;;  %v6559_v28 = vld [vmem:[%s11036_s8 + $0x138] sm:$0xff]  ;;  %v6558_v18 = vld [vmem:[%s11036_s8 + $0x130] sm:$0xff] }
 0xde6   :  { %v8754_v24 = vpop.eup %8753  ;;  %v6611_v25 = vld [vmem:[%s11036_s8 + $0x178] sm:$0xff] }
 0xde7   :  { %v8756_v35 = vpop.eup %8755  ;;  %v8297_v36 = vpack.c.bf16 %v2485_v26, %v2484_v21  ;;  %v6610_v26 = vld [vmem:[%s11036_s8 + $0x170] sm:$0xff]  ;;  %v6621_v21 = vld [vmem:[%s11039_s10 + $0x2] sm:$0x3] }
 0xde8   :  { %v8758_v37 = vpop.eup %8757  ;;  %v2487_v20 = vmul.f32 %v8756_v35, %v8752_v31  ;;  %v6627_v31 = vld [vmem:[%s11032_s4 + $0x40] sm:$0xff]  ;;  %v6628_v35 = vld [vmem:[%s11032_s4 + $0x48] sm:$0xff] }
 0xde9   :  { %8298 = vmatprep.subr.bf16.mxu1 %v8297_v36  ;;  %v2486_v40 = vmul.f32 %v8758_v37, %v8754_v24  ;;  %v6629_v24 = vld [vmem:[%s11032_s4 + $0x50] sm:$0xff] }
 0xdea   :  { %8300 = vmatpush3.bf16.msra.mxu1 %v8297_v36  ;;  %v6630_v36 = vld [vmem:[%s11032_s4 + $0x58] sm:$0xff] }
 0xdeb   :  { %v8301_v12 = vpack.c.bf16 %v2487_v20, %v2486_v40  ;;  %v8936_v20 = vld [vmem:[%s11037_s2 + $0x6] ss:$0 sm:$0xff] }
 0xded   :  { %8302 = vmatprep.subr.bf16.mxu1 %v8301_v12 }
 0xdee   :  { %8304 = vmatpush3.bf16.msra.mxu1 %v8301_v12 }
 0xdf1   :  { %7687 = vmatmul.mubr.msk.f32.vlgmr.msra.gmra.mrb[38].mxu1 %vm505_vm3, %v6545_v29 }
 0xdf2   :  { %7689 = vmatprep.mubr.msk.f32.mxu1 %vm505_vm3, %v6546_v42 }
 0xdf5   :  { %7690 = vmatmul.mubr.msk.f32.gmra.mrb[40].mxu1 %vm505_vm3, %v6547_v43 }
 0xec4   :  { %v7688_v30 = vpop.f32.mrb[38].mxu1 }
 0xec5   :  { %v2642_v38 = vadd.f32 %v7688_v30, %v2514_v45  ;;  %v2636_v39 = vpop.f32.mrb[39].mxu1 }
 0xec6   :  { %v2637_v48 = vadd.f32 %v2636_v39, %v2509_v46 }
 0xec7   :  { %v2676_v49 = vadd.f32 %v2642_v38, %v9696_v41  ;;  %v8935_v41 = vld [vmem:[%s11037_s2 + $0x7] ss:$0 sm:$0xff] }
 0xec8   :  { %v2675_v51 = vadd.f32 %v2637_v48, %v9699_v44  ;;  %v7691_v52 = vpop.f32.mrb[40].mxu1 }
 0xec9   :  { %v2680_v54 = vmul.f32 %v9527_v57, %v2676_v49  ;;  %v2652_v55 = vadd.f32 %v7691_v52, %v2524_v50  ;;  %v2646_v56 = vpop.f32.mrb[41].mxu1  ;;  %v8937_v49 = vld [vmem:[%s11037_s2 + $0x8] ss:$0 sm:$0xff] }
 0xeca   :  { %v2679_v58 = vmul.f32 %v9527_v57, %v2675_v51  ;;  %v2647_v59 = vadd.f32 %v2646_v56, %v2519_v53 }
 0xecb   :  { %v2678_v60 = vadd.f32 %v2652_v55, %v9708_v32  ;;  %2689 = vrot.lane.b32.xlu0 %v2680_v54, %s8960_s18  ;;  %v2700_v61 = vmul.f32 %v8935_v41, %v2680_v54 }
 0xecc   :  { %v2677_v44 = vadd.f32 %v2647_v59, %v9711_v47  ;;  %2687 = vrot.lane.b32.xlu1 %v2679_v58, %s8960_s18  ;;  %v2699_v62 = vmul.f32 %v8935_v41, %v2679_v58  ;;  %v6568_v47 = vld [vmem:[%s11035_s5 + $0x140] sm:$0xff]  ;;  %v6569_v59 = vld [vmem:[%s11035_s5 + $0x148] sm:$0xff] }
 0xecd   :  { %v2682_v63 = vmul.f32 %v9527_v57, %v2678_v60  ;;  %7722 = vmatprep.mubr.msk.f32.mxu0 %vm287_vm2, %v6568_v47  ;;  %v6570_v60 = vld [vmem:[%s11035_s5 + $0x150] sm:$0xff] }
 0xece   :  { %v2681_v0 = vmul.f32 %v9527_v57, %v2677_v44  ;;  %v9851_v1 = vpack.c.bf16 %v2700_v61, %v2699_v62  ;;  %v6581_v57 = vld [vmem:[%s11034_s6 + $0x168] sm:$0xff]  ;;  %v6572_v61 = vld [vmem:[%s11035_s5 + $0x160] sm:$0xff]  ;;  %v6574_v62 = vld [vmem:[%s11035_s5 + $0x170] sm:$0xff] }
 0xecf   :  { %2693 = vrot.lane.b32.xlu0 %v2682_v63, %s8960_s18  ;;  %v2702_v32 = vmul.f32 %v8935_v41, %v2682_v63  ;;  %v6573_v44 = vld [vmem:[%s11035_s5 + $0x168] sm:$0xff] }
 0xed0   :  { %2691 = vrot.lane.b32.xlu1 %v2681_v0, %s8960_s18  ;;  %v2701_v2 = vmul.f32 %v8935_v41, %v2681_v0  ;;  %v6571_v41 = vld [vmem:[%s11035_s5 + $0x158] sm:$0xff] }
 0xed2   :  { %v9855_v3 = vpack.c.bf16 %v2702_v32, %v2701_v2  ;;  %v6550_v32 = vld [vmem:[%s11038_s7 + $0x130] sm:$0xff]  ;;  %v6551_v2 = vld [vmem:[%s11038_s7 + $0x138] sm:$0xff] }
 0xed3   :  { %2705 = vrot.lane.b32.xlu0 %v2680_v54, %s8961_s19 }
 0xed4   :  { %2703 = vrot.lane.b32.xlu1 %v2679_v58, %s8961_s19 }
 0xed7   :  { %2709 = vrot.lane.b32.xlu0 %v2682_v63, %s8961_s19  ;;  %v6575_v63 = vld [vmem:[%s11035_s5 + $0x178] sm:$0xff] }
 0xed8   :  { %2707 = vrot.lane.b32.xlu1 %v2681_v0, %s8961_s19  ;;  %v6548_v0 = vld [vmem:[%s11038_s7 + $0x120] sm:$0xff] }
 0xed9   :  { %7692 = vmatprep.mubr.msk.f32.mxu1 %vm505_vm3, %v6548_v0  ;;  %v6602_v0 = vld [vmem:[%s11038_s7 + $0x170] sm:$0xff] }
 0xedb   :  { %2760 = vperm.xlu0 %8637, %v6581_v57  }
 0xedc   :  { %2755 = vperm.xlu1 %8638, %v6580_v4  }
 0xedf   :  { %2770 = vperm.xlu0 %8637, %v6583_v5  }
 0xee0   :  { %2765 = vperm.xlu1 %8638, %v6582_v6  }
 0xee3   :  { %2740 = vperm.xlu0 %8637, %v6577_v7  }
 0xee4   :  { %2735 = vperm.xlu1 %8638, %v6576_v9  }
 0xee7   :  { %2750 = vperm.xlu0 %8637, %v6579_v10  }
 0xee8   :  { %2745 = vperm.xlu1 %8638, %v6578_v11  }
 0xeeb   :  { %2087 = vperm.xlu0 %8637, %v6505_v13  }
 0xeec   :  { %2082 = vperm.xlu1 %8638, %v6504_v14  }
 0xeef   :  { %2533 = vperm.xlu0 %8637, %v6557_v15  }
 0xef0   :  { %2528 = vperm.xlu1 %8638, %v6556_v17  }
 0xef3   :  { %2975 = vperm.xlu0 %8637, %v6609_v19  }
 0xef4   :  { %2970 = vperm.xlu1 %8638, %v6608_v22  }
 0xef7   :  { %2097 = vperm.xlu0 %8637, %v6507_v23  }
 0xef8   :  { %2092 = vperm.xlu1 %8638, %v6506_v27  }
 0xefb   :  { %2543 = vperm.xlu0 %8637, %v6559_v28  }
 0xefc   :  { %2538 = vperm.xlu1 %8638, %v6558_v18  }
 0xeff   :  { %2985 = vperm.xlu0 %8637, %v6611_v25  }
 0xf00   :  { %2980 = vperm.xlu1 %8638, %v6610_v26  }
 0xf03   :  { %3217 = vperm.xlu0 %8637, %v6627_v31  }
 0xf04   :  { %3127 = vperm.xlu1 %8638, %v6621_v21  }
 0xf07   :  { %3227 = vperm.xlu0 %8637, %v6629_v24  }
 0xf08   :  { %3222 = vperm.xlu1 %8638, %v6628_v35  }
 0xf0c   :  { %3232 = vperm.xlu1 %8638, %v6630_v36  }
 0xf3d   :  { %v2690_v37 = vpop.permute.xlu0 %2689 }
 0xf3e   :  { %v2696_v40 = vmul.f32 %v8936_v20, %v2690_v37  ;;  %v2688_v12 = vpop.permute.xlu1 %2687 }
 0xf3f   :  { %v2695_v29 = vmul.f32 %v8936_v20, %v2688_v12 }
 0xf41   :  { %v8305_v42 = vpack.c.bf16 %v2696_v40, %v2695_v29  ;;  %v2694_v43 = vpop.permute.xlu0 %2693 }
 0xf42   :  { %v2698_v45 = vmul.f32 %v8936_v20, %v2694_v43  ;;  %v2692_v46 = vpop.permute.xlu1 %2691 }
 0xf43   :  { %v2697_v30 = vmul.f32 %v8936_v20, %v2692_v46  ;;  %8306 = vmatprep.subr.bf16.mxu0 %v8305_v42 }
 0xf44   :  { %8308 = vmatpush3.bf16.msra.mxu0 %v8305_v42 }
 0xf45   :  { %v8309_v38 = vpack.c.bf16 %v2698_v45, %v2697_v30  ;;  %v2706_v39 = vpop.permute.xlu0 %2705 }
 0xf46   :  { %v2704_v48 = vpop.permute.xlu1 %2703  ;;  %v2712_v50 = vmul.f32 %v8937_v49, %v2706_v39 }
 0xf47   :  { %8310 = vmatprep.subr.bf16.mxu0 %v8309_v38  ;;  %v2711_v51 = vmul.f32 %v8937_v49, %v2704_v48 }
 0xf48   :  { %8312 = vmatpush3.bf16.msra.mxu0 %v8309_v38 }
 0xf49   :  { %8314 = vmatprep.subr.bf16.mxu0 %v9851_v1  ;;  %v2710_v52 = vpop.permute.xlu0 %2709  ;;  %v8321_v54 = vpack.c.bf16 %v2712_v50, %v2711_v51 }
 0xf4a   :  { %v2708_v53 = vpop.permute.xlu1 %2707  ;;  %v2714_v55 = vmul.f32 %v8937_v49, %v2710_v52 }
 0xf4b   :  { %v2713_v56 = vmul.f32 %v8937_v49, %v2708_v53 }
 0xf4c   :  { %8316 = vmatpush3.bf16.msra.mxu0 %v9851_v1  ;;  %v6549_v1 = vld [vmem:[%s11038_s7 + $0x128] sm:$0xff] }
 0xf4d   :  { %8318 = vmatprep.subr.bf16.mxu0 %v9855_v3  ;;  %v8325_v58 = vpack.c.bf16 %v2714_v55, %v2713_v56  ;;  %7693 = vmatmul.mubr.msk.f32.gmra.mrb[26].mxu1 %vm505_vm3, %v6549_v1  ;;  %v6603_v1 = vld [vmem:[%s11038_s7 + $0x178] sm:$0xff] }
 0xf4e   :  { %7695 = vmatprep.mubr.msk.f32.mxu1 %vm505_vm3, %v6550_v32 }
 0xf50   :  { %8320 = vmatpush3.bf16.msra.mxu0 %v9855_v3  ;;  %v6596_v3 = vld [vmem:[%s11038_s7 + $0x140] sm:$0xff] }
 0xf51   :  { %8322 = vmatprep.subr.bf16.mxu0 %v8321_v54  ;;  %7696 = vmatmul.mubr.msk.f32.gmra.mrb[28].mxu1 %vm505_vm3, %v6551_v2 }
 0xf52   :  { %7742 = vmatprep.mubr.msk.f32.mxu1 %vm505_vm3, %v6596_v3 }
 0xf54   :  { %8324 = vmatpush3.bf16.msra.mxu0 %v8321_v54 }
 0xf55   :  { %8326 = vmatprep.subr.bf16.mxu0 %v8325_v58 }
 0xf58   :  { %8328 = vmatpush3.bf16.msra.mxu0 %v8325_v58 }
 0xf59   :  { %8337 = vmatprep.subr.bf16.mxu0 %v8962_v33 }
 0xf5a   :  { %v2761_v5 = vpop.permute.xlu0 %2760 }
 0xf5b   :  { %7723 = vmatmul.mubr.msk.f32.vlgmr.msra.gmra.mrb[36].mxu0 %vm287_vm2, %v6569_v59  ;;  %v2756_v7 = vpop.permute.xlu1 %2755 }
 0xf5c   :  { %7725 = vmatprep.mubr.msk.f32.mxu0 %vm287_vm2, %v6570_v60 }
 0xf5e   :  { %v2771_v14 = vpop.permute.xlu0 %2770 }
 0xf5f   :  { %7726 = vmatmul.mubr.msk.f32.gmra.mrb[38].mxu0 %vm287_vm2, %v6571_v41  ;;  %v2766_v17 = vpop.permute.xlu1 %2765  ;;  %v6597_v41 = vld [vmem:[%s11038_s7 + $0x148] sm:$0xff] }
 0xf60   :  { %7728 = vmatprep.mubr.msk.f32.mxu0 %vm287_vm2, %v6572_v61  ;;  %v6598_v61 = vld [vmem:[%s11038_s7 + $0x150] sm:$0xff] }
 0xf62   :  { %v2741_v26 = vpop.permute.xlu0 %2740 }
 0xf63   :  { %7729 = vmatmul.mubr.msk.f32.gmra.mrb[40].mxu0 %vm287_vm2, %v6573_v44  ;;  %v2736_v31 = vpop.permute.xlu1 %2735  ;;  %v6599_v44 = vld [vmem:[%s11038_s7 + $0x158] sm:$0xff] }
 0xf64   :  { %7731 = vmatprep.mubr.msk.f32.mxu0 %vm287_vm2, %v6574_v62  ;;  %v6600_v62 = vld [vmem:[%s11038_s7 + $0x160] sm:$0xff] }
 0xf66   :  { %v2751_v36 = vpop.permute.xlu0 %2750 }
 0xf67   :  { %7732 = vmatmul.mubr.msk.f32.gmra.mrb[42].mxu0 %vm287_vm2, %v6575_v63  ;;  %v2746_v20 = vpop.permute.xlu1 %2745  ;;  %v6601_v63 = vld [vmem:[%s11038_s7 + $0x168] sm:$0xff] }
 0xf68   :  { %7762 = vmatprep.mubr.msk.f32.mxu0 %vm8963_vm4, %v8964_v34 }
 0xf6a   :  { %v2088_v32 = vpop.permute.xlu0 %2087 }
 0xf6b   :  { %v2083_v2 = vpop.permute.xlu1 %2082 }
 0xf6e   :  { %v2534_v3 = vpop.permute.xlu0 %2533 }
0x102e   :  { %v7724_v57 = vpop.f32.mrb[36].mxu0 }
0x102f   :  { %v2863_v47 = vpop.f32.mrb[37].mxu0  ;;  %v2869_v21 = vadd.f32 %v7724_v57, %v2741_v26  ;;  %v2529_v57 = vpop.permute.xlu1 %2528 }
0x1030   :  { %v2864_v24 = vadd.f32 %v2863_v47, %v2736_v31  ;;  %v2976_v47 = vpop.permute.xlu0 %2975 }
0x1032   :  { %v7727_v4 = vpop.f32.mrb[38].mxu0 }
0x1033   :  { %v2873_v6 = vpop.f32.mrb[39].mxu0  ;;  %v2879_v40 = vadd.f32 %v7727_v4, %v2751_v36  ;;  %v2971_v4 = vpop.permute.xlu1 %2970 }
0x1034   :  { %v2874_v29 = vadd.f32 %v2873_v6, %v2746_v20 }
0x1036   :  { %v7730_v9 = vpop.f32.mrb[40].mxu0 }
0x1037   :  { %v2889_v10 = vadd.f32 %v7730_v9, %v2761_v5  ;;  %v2883_v11 = vpop.f32.mrb[41].mxu0  ;;  %v2098_v5 = vpop.permute.xlu0 %2097 }
0x1038   :  { %v2884_v13 = vadd.f32 %v2883_v11, %v2756_v7  ;;  %v2093_v6 = vpop.permute.xlu1 %2092 }
0x1039   :  { %v6593_v15 = vmul.f32 -1.442695, %v2889_v10 }
0x103a   :  { %v6592_v19 = vmul.f32 -1.442695, %v2884_v13  ;;  %v7733_v22 = vpop.f32.mrb[42].mxu0 }
0x103b   :  { %8759 = vpow2.f32 %v6593_v15  ;;  %v2899_v23 = vadd.f32 %v7733_v22, %v2771_v14  ;;  %v2893_v27 = vpop.f32.mrb[43].mxu0  ;;  %v2544_v10 = vpop.permute.xlu0 %2543  ;;  %v8563_v14 = vadd.f32 %v2534_v3, %v2088_v32 }
0x103c   :  { %8761 = vpow2.f32 %v6592_v19  ;;  %v2894_v28 = vadd.f32 %v2893_v27, %v2766_v17  ;;  %v2539_v11 = vpop.permute.xlu1 %2538  ;;  %v8566_v17 = vadd.f32 %v2529_v57, %v2083_v2 }
0x103d   :  { %v6595_v18 = vmul.f32 -1.442695, %v2899_v23  ;;  %v8564_v19 = vadd.f32 %v8563_v14, %v2976_v47  ;;  %v8572_v31 = vadd.f32 %v2539_v11, %v2093_v6  ;;  %v6648_v6 = vld [vmem:[%s11034_s6 + $0x1a0] sm:$0xff]  ;;  %v6646_v14 = vld [vmem:[%s11034_s6 + $0x190] sm:$0xff] }
0x103e   :  { %v6594_v25 = vmul.f32 -1.442695, %v2894_v28  ;;  %v8567_v22 = vadd.f32 %v8566_v17, %v2971_v4  ;;  %v8569_v28 = vadd.f32 %v2544_v10, %v2098_v5  ;;  %v6649_v4 = vld [vmem:[%s11034_s6 + $0x1a8] sm:$0xff]  ;;  %v6636_v5 = vld [vmem:[%s11035_s5 + $0x180] sm:$0xff] }
0x103f   :  { %8763 = vpow2.f32 %v6595_v18  ;;  %v2986_v23 = vpop.permute.xlu0 %2985  ;;  %v6645_v10 = vld [vmem:[%s11034_s6 + $0x188] sm:$0xff]  ;;  %v6644_v11 = vld [vmem:[%s11034_s6 + $0x180] sm:$0xff] }
0x1040   :  { %8765 = vpow2.f32 %v6594_v25  ;;  %v2981_v18 = vpop.permute.xlu1 %2980  ;;  %v6672_v17 = vld [vmem:[%s11036_s8 + $0x180] sm:$0xff] }
0x1041   :  { %8767 = vtanh.f32 %v2869_v21 }
0x1042   :  { %8769 = vtanh.f32 %v2864_v24  ;;  %v8570_v24 = vadd.f32 %v8569_v28, %v2986_v23 }
0x1045   :  { %v8760_v35 = vpop.eup %8759 }
0x1046   :  { %v8762_v37 = vpop.eup %8761  ;;  %v2919_v12 = vadd.f32 1.0, %v8760_v35  ;;  %v10032_v35 = vld [vmem:[%s11033_s1] ss:$0 sm:$0xff] }
0x1047   :  { %v2918_v42 = vadd.f32 1.0, %v8762_v37  ;;  %v8573_v37 = vadd.f32 %v8572_v31, %v2981_v18 }
0x1048   :  { %8771 = vrcp.f32 %v2919_v12 }
0x1049   :  { %v8764_v43 = vpop.eup %8763  ;;  %8773 = vrcp.f32 %v2918_v42 }
0x104a   :  { %v8766_v45 = vpop.eup %8765  ;;  %8775 = vtanh.f32 %v2879_v40  ;;  %v2921_v46 = vadd.f32 1.0, %v8764_v43 }
0x104b   :  { %8777 = vtanh.f32 %v2874_v29  ;;  %v2920_v30 = vadd.f32 1.0, %v8766_v45  ;;  %v8768_v38 = vpop.eup %8767 }
0x104c   :  { %8779 = vrcp.f32 %v2921_v46  ;;  %v8770_v39 = vpop.eup %8769 }
0x104d   :  { %8781 = vrcp.f32 %v2920_v30 }
0x1052   :  { %v8772_v48 = vpop.eup %8771 }
0x1053   :  { %v8774_v49 = vpop.eup %8773  ;;  %v2931_v50 = vmul.f32 %v8772_v48, %v8768_v38  ;;  %v6620_v38 = vld [vmem:[%s11040_s9 + $0x2] sm:$0x3]  ;;  %v3128_v48 = vpop.permute.xlu1 %3127 }
0x1054   :  { %v8776_v51 = vpop.eup %8775  ;;  %v2930_v52 = vmul.f32 %v8774_v49, %v8770_v39  ;;  %v6623_v39 = vld [vmem:[%s11031_s3 + $0x40] sm:$0xff] }
0x1055   :  { %v8778_v53 = vpop.eup %8777 }
0x1056   :  { %v8780_v54 = vpop.eup %8779  ;;  %v8329_v55 = vpack.c.bf16 %v2931_v50, %v2930_v52 }
0x1057   :  { %v8782_v56 = vpop.eup %8781  ;;  %v2933_v58 = vmul.f32 %v8780_v54, %v8776_v51  ;;  %v6624_v54 = vld [vmem:[%s11031_s3 + $0x48] sm:$0xff] }
0x1058   :  { %8330 = vmatprep.subr.bf16.mxu1 %v8329_v55  ;;  %v2932_v59 = vmul.f32 %v8782_v56, %v8778_v53  ;;  %v3223_v56 = vpop.permute.xlu1 %3222 }
0x1059   :  { %8332 = vmatpush3.bf16.msra.mxu1 %v8329_v55  ;;  %v6625_v55 = vld [vmem:[%s11031_s3 + $0x50] sm:$0xff] }
0x105a   :  { %v8333_v60 = vpack.c.bf16 %v2933_v58, %v2932_v59  ;;  %v3218_v58 = vpop.permute.xlu0 %3217 }
0x105c   :  { %8334 = vmatprep.subr.bf16.mxu1 %v8333_v60 }
0x105d   :  { %8336 = vmatpush3.bf16.msra.mxu1 %v8333_v60 }
0x1060   :  { %7743 = vmatmul.mubr.msk.f32.vlgmr.msra.gmra.mrb[42].mxu1 %vm505_vm3, %v6597_v41 }
0x1061   :  { %7745 = vmatprep.mubr.msk.f32.mxu1 %vm505_vm3, %v6598_v61 }
0x1064   :  { %7746 = vmatmul.mubr.msk.f32.gmra.mrb[44].mxu1 %vm505_vm3, %v6599_v44 }
0x1065   :  { %7748 = vmatprep.mubr.msk.f32.mxu1 %vm505_vm3, %v6600_v62  ;;  %v3233_v62 = vpop.permute.xlu1 %3232 }
0x1068   :  { %7749 = vmatmul.mubr.msk.f32.gmra.mrb[26].mxu1 %vm505_vm3, %v6601_v63 }
0x1069   :  { %7751 = vmatprep.mubr.msk.f32.mxu1 %vm505_vm3, %v6602_v0 }
0x106c   :  { %7752 = vmatmul.mubr.msk.f32.gmra.mrb[28].mxu1 %vm505_vm3, %v6603_v1  ;;  %v3228_v1 = vpop.permute.xlu0 %3227 }
0x106d   :  { %7797 = vmatprep.mubr.msk.f32.mxu1 %vm287_vm2, %v6636_v5 }
0x1133   :  { %v7744_v7 = vpop.f32.mrb[42].mxu1 }
0x1134   :  { %v3078_v9 = vpop.f32.mrb[43].mxu1  ;;  %v6651_v7 = vld [vmem:[%s11034_s6 + $0x1b8] sm:$0xff] }
0x1135   :  { %v6650_v9 = vld [vmem:[%s11034_s6 + $0x1b0] sm:$0xff] }
0x1137   :  { %v7747_v13 = vpop.f32.mrb[44].mxu1 }
0x1138   :  { %v3086_v15 = vpop.f32.mrb[45].mxu1  ;;  %v6647_v13 = vld [vmem:[%s11034_s6 + $0x198] sm:$0xff] }
0x1139   :  { %v6673_v15 = vld [vmem:[%s11036_s8 + $0x188] sm:$0xff] }
0x113b   :  { %v7750_v27 = vpop.f32.mrb[26].mxu1 }
0x113c   :  { %v8565_v25 = vadd.f32 %v8564_v19, %v7750_v27  ;;  %v3094_v26 = vpop.f32.mrb[27].mxu1  ;;  %v6675_v19 = vld [vmem:[%s11036_s8 + $0x198] sm:$0xff]  ;;  %v8939_v27 = vld [vmem:[%s11037_s2] ss:$0 sm:$0xff] }
0x113d   :  { %v8568_v21 = vadd.f32 %v8567_v22, %v3094_v26  ;;  %v6674_v22 = vld [vmem:[%s11036_s8 + $0x190] sm:$0xff] }
0x113e   :  { %v3118_v36 = vmul.f32 %v10032_v35, %v8565_v25 }
0x113f   :  { %v3117_v20 = vmul.f32 %v10032_v35, %v8568_v21  ;;  %v7753_v40 = vpop.f32.mrb[28].mxu1 }
0x1140   :  { %v8571_v12 = vadd.f32 %v8570_v24, %v7753_v40  ;;  %v3104_v29 = vpop.f32.mrb[29].mxu1 }
0x1141   :  { %v8338_v42 = vpack.c.bf16 %v3118_v36, %v3117_v20  ;;  %v8574_v43 = vadd.f32 %v8573_v37, %v3104_v29  ;;  %v8940_v37 = vld [vmem:[%s11037_s2 + $0x1] ss:$0 sm:$0xff] }
0x1142   :  { %v3120_v45 = vmul.f32 %v10032_v35, %v8571_v12 }
0x1143   :  { %v3119_v46 = vmul.f32 %v10032_v35, %v8574_v43  ;;  %8339 = vmatpush3.bf16.msra.mxu0 %v8338_v42 }
0x1144   :  { %8340 = vmatprep.subr.bf16.mxu0 %v8962_v33 }
0x1145   :  { %v8341_v30 = vpack.c.bf16 %v3120_v45, %v3119_v46 }
0x1147   :  { %8342 = vmatpush3.bf16.msra.mxu0 %v8341_v30  ;;  %v8941_v30 = vld [vmem:[%s11037_s2 + $0x2] ss:$0 sm:$0xff] }
0x114a   :  { %7763 = vmatmul.mubr.msk.f32.vlgmr.msra.gmra.mrb[44].mxu0 %vm505_vm3, %v6620_v38 }
0x114b   :  { %7767 = vmatprep.mubr.msk.f32.mxu0 %vm68_vm1, %v6623_v39 }
0x121d   :  { %v3199_v49 = vpop.f32.mrb[44].mxu0 }
0x121e   :  { %v3200_v50 = vadd.f32 %v3199_v49, %v3128_v48  ;;  %v7764_v51 = vpop.f32.mrb[45].mxu0 }
0x1220   :  { %v3203_v52 = vmul.f32 %v10032_v35, %v3200_v50 }
0x1222   :  { %v10049_v53 = vadd.f32 %v3203_v52, %v9546_v8  ;;  %v6626_v8 = vld [vmem:[%s11031_s3 + $0x58] sm:$0xff] }
0x1224   :  { %7765 = vmatprep.subr.msk.mxu0 %vm81_vm0, %v10049_v53 }
0x1225   :  { %7766 = vmatpush3.msk.msra.mxu0 %vm81_vm0, %v10049_v53 }
0x1226   :  { %7768 = vmatmul.mubr.msk.f32.vlgmr.msra.gmra.mrb[46].mxu0 %vm68_vm1, %v6624_v54 }
0x1227   :  { %7770 = vmatprep.mubr.msk.f32.mxu0 %vm68_vm1, %v6625_v55 }
0x122a   :  { %7771 = vmatmul.mubr.msk.f32.gmra.mrb[48].mxu0 %vm68_vm1, %v6626_v8  ;;  %v6637_v8 = vld [vmem:[%s11035_s5 + $0x188] sm:$0xff] }
0x12f9   :  { %v7769_v59 = vpop.f32.mrb[46].mxu0 }
0x12fa   :  { %v3322_v60 = vadd.f32 %v7769_v59, %v3223_v56  ;;  %v3316_v41 = vpop.f32.mrb[47].mxu0  ;;  %v6638_v56 = vld [vmem:[%s11035_s5 + $0x190] sm:$0xff]  ;;  %v6640_v59 = vld [vmem:[%s11035_s5 + $0x1a0] sm:$0xff] }
0x12fb   :  { %v3317_v61 = vadd.f32 %v3316_v41, %v3218_v58  ;;  %v6639_v58 = vld [vmem:[%s11035_s5 + $0x198] sm:$0xff]  ;;  %v6642_v41 = vld [vmem:[%s11035_s5 + $0x1b0] sm:$0xff] }
0x12fc   :  { %v10068_v44 = vmul.f32 %v10032_v35, %v3322_v60  ;;  %v6641_v60 = vld [vmem:[%s11035_s5 + $0x1a8] sm:$0xff] }
0x12fd   :  { %v10071_v63 = vmul.f32 %v10032_v35, %v3317_v61  ;;  %v7772_v0 = vpop.f32.mrb[48].mxu0  ;;  %v6643_v61 = vld [vmem:[%s11035_s5 + $0x1b8] sm:$0xff] }
0x12fe   :  { %v3332_v32 = vadd.f32 %v7772_v0, %v3233_v62  ;;  %3341 = vrot.lane.b32.xlu1 %v10068_v44, %s8960_s18  ;;  %v3326_v2 = vpop.f32.mrb[49].mxu0  ;;  %v3352_v40 = vmul.f32 %v8940_v37, %v10068_v44  ;;  %v6664_v62 = vld [vmem:[%s11038_s7 + $0x180] sm:$0xff] }
0x12ff   :  { %v3327_v3 = vadd.f32 %v3326_v2, %v3228_v1  ;;  %3339 = vrot.lane.b32.xlu0 %v10071_v63, %s8960_s18  ;;  %v3351_v20 = vmul.f32 %v8940_v37, %v10071_v63  ;;  %7817 = vmatprep.mubr.msk.f32.mxu0 %vm505_vm3, %v6664_v62 }
0x1300   :  { %v10078_v57 = vmul.f32 %v10032_v35, %v3332_v32 }
0x1301   :  { %v10081_v47 = vmul.f32 %v10032_v35, %v3327_v3  ;;  %v8351_v43 = vpack.c.bf16 %v3352_v40, %v3351_v20 }
0x1302   :  { %3345 = vrot.lane.b32.xlu1 %v10078_v57, %s8960_s18  ;;  %v3354_v46 = vmul.f32 %v8940_v37, %v10078_v57 }
0x1303   :  { %3343 = vrot.lane.b32.xlu0 %v10081_v47, %s8960_s18  ;;  %v3353_v45 = vmul.f32 %v8940_v37, %v10081_v47 }
0x1305   :  { %v8355_v48 = vpack.c.bf16 %v3354_v46, %v3353_v45 }
0x1306   :  { %3357 = vrot.lane.b32.xlu1 %v10068_v44, %s8961_s19 }
0x1307   :  { %3355 = vrot.lane.b32.xlu0 %v10071_v63, %s8961_s19 }
0x130a   :  { %3361 = vrot.lane.b32.xlu1 %v10078_v57, %s8961_s19 }
0x130b   :  { %3359 = vrot.lane.b32.xlu0 %v10081_v47, %s8961_s19 }
0x130e   :  { %3412 = vperm.xlu1 %8638, %v6649_v4  }
0x130f   :  { %3407 = vperm.xlu0 %8637, %v6648_v6  }
0x1312   :  { %3422 = vperm.xlu1 %8638, %v6651_v7  }
0x1313   :  { %3417 = vperm.xlu0 %8637, %v6650_v9  }
0x1316   :  { %3392 = vperm.xlu1 %8638, %v6645_v10  }
0x1317   :  { %3387 = vperm.xlu0 %8637, %v6644_v11  }
0x131a   :  { %3402 = vperm.xlu1 %8638, %v6647_v13  }
0x131b   :  { %3397 = vperm.xlu0 %8637, %v6646_v14  }
0x131e   :  { %3611 = vperm.xlu1 %8638, %v6673_v15  }
0x131f   :  { %3606 = vperm.xlu0 %8637, %v6672_v17  }
0x1322   :  { %3621 = vperm.xlu1 %8638, %v6675_v19  }
0x1323   :  { %3616 = vperm.xlu0 %8637, %v6674_v22  }
0x1370   :  { %v3342_v23 = vpop.permute.xlu1 %3341 }
0x1371   :  { %v3348_v28 = vmul.f32 %v8939_v27, %v3342_v23  ;;  %v3340_v18 = vpop.permute.xlu0 %3339 }
0x1372   :  { %v3347_v25 = vmul.f32 %v8939_v27, %v3340_v18 }
0x1374   :  { %v8343_v26 = vpack.c.bf16 %v3348_v28, %v3347_v25  ;;  %v3346_v31 = vpop.permute.xlu1 %3345 }
0x1375   :  { %v3350_v21 = vmul.f32 %v8939_v27, %v3346_v31  ;;  %v3344_v24 = vpop.permute.xlu0 %3343 }
0x1376   :  { %v3349_v36 = vmul.f32 %v8939_v27, %v3344_v24  ;;  %8344 = vmatprep.subr.bf16.mxu1 %v8343_v26 }
0x1377   :  { %8346 = vmatpush3.bf16.msra.mxu1 %v8343_v26 }
0x1378   :  { %v8347_v12 = vpack.c.bf16 %v3350_v21, %v3349_v36  ;;  %v3358_v29 = vpop.permute.xlu1 %3357 }
0x1379   :  { %v3356_v42 = vpop.permute.xlu0 %3355  ;;  %v3364_v38 = vmul.f32 %v8941_v30, %v3358_v29 }
0x137a   :  { %8348 = vmatprep.subr.bf16.mxu1 %v8347_v12  ;;  %v3363_v39 = vmul.f32 %v8941_v30, %v3356_v42 }
0x137b   :  { %8350 = vmatpush3.bf16.msra.mxu1 %v8347_v12 }
0x137c   :  { %8352 = vmatprep.subr.bf16.mxu1 %v8351_v43  ;;  %v3362_v49 = vpop.permute.xlu1 %3361  ;;  %v8359_v51 = vpack.c.bf16 %v3364_v38, %v3363_v39 }
0x137d   :  { %v3360_v50 = vpop.permute.xlu0 %3359  ;;  %v3366_v52 = vmul.f32 %v8941_v30, %v3362_v49 }
0x137e   :  { %v3365_v54 = vmul.f32 %v8941_v30, %v3360_v50 }
0x137f   :  { %8354 = vmatpush3.bf16.msra.mxu1 %v8351_v43 }
0x1380   :  { %8356 = vmatprep.subr.bf16.mxu1 %v8355_v48  ;;  %v8363_v55 = vpack.c.bf16 %v3366_v52, %v3365_v54 }
0x1383   :  { %8358 = vmatpush3.bf16.msra.mxu1 %v8355_v48 }
0x1384   :  { %8360 = vmatprep.subr.bf16.mxu1 %v8359_v51 }
0x1387   :  { %8362 = vmatpush3.bf16.msra.mxu1 %v8359_v51 }
0x1388   :  { %8364 = vmatprep.subr.bf16.mxu1 %v8363_v55 }
0x138b   :  { %8366 = vmatpush3.bf16.msra.mxu1 %v8363_v55 }
0x138d   :  { %v3413_v2 = vpop.permute.xlu1 %3412 }
0x138e   :  { %7798 = vmatmul.mubr.msk.f32.vlgmr.msra.gmra.mrb[46].mxu1 %vm287_vm2, %v6637_v8  ;;  %v3408_v4 = vpop.permute.xlu0 %3407 }
0x138f   :  { %7800 = vmatprep.mubr.msk.f32.mxu1 %vm287_vm2, %v6638_v56 }
0x1391   :  { %v3423_v10 = vpop.permute.xlu1 %3422 }
0x1392   :  { %7801 = vmatmul.mubr.msk.f32.gmra.mrb[48].mxu1 %vm287_vm2, %v6639_v58  ;;  %v3418_v13 = vpop.permute.xlu0 %3417 }
0x1393   :  { %7803 = vmatprep.mubr.msk.f32.mxu1 %vm287_vm2, %v6640_v59  ;;  %v6665_v59 = vld [vmem:[%s11038_s7 + $0x188] sm:$0xff] }
0x1395   :  { %v3393_v28 = vpop.permute.xlu1 %3392 }
0x1396   :  { %7804 = vmatmul.mubr.msk.f32.gmra.mrb[50].mxu1 %vm287_vm2, %v6641_v60  ;;  %v3388_v18 = vpop.permute.xlu0 %3387  ;;  %v6666_v60 = vld [vmem:[%s11038_s7 + $0x190] sm:$0xff] }
0x1397   :  { %7806 = vmatprep.mubr.msk.f32.mxu1 %vm287_vm2, %v6642_v41  ;;  %v6667_v41 = vld [vmem:[%s11038_s7 + $0x198] sm:$0xff] }
0x1399   :  { %v3403_v21 = vpop.permute.xlu1 %3402 }
0x139a   :  { %7807 = vmatmul.mubr.msk.f32.gmra.mrb[52].mxu1 %vm287_vm2, %v6643_v61  ;;  %v3398_v36 = vpop.permute.xlu0 %3397 }
0x139d   :  { %v3612_v61 = vpop.permute.xlu1 %3611 }
0x139e   :  { %v3607_v62 = vpop.permute.xlu0 %3606 }
0x1461   :  { %v7799_v0 = vpop.f32.mrb[46].mxu1 }
0x1462   :  { %v3515_v1 = vpop.f32.mrb[47].mxu1  ;;  %v3521_v25 = vadd.f32 %v7799_v0, %v3393_v28  ;;  %v6700_v28 = vld [vmem:[%s11034_s6 + $0x1e0] sm:$0xff] }
0x1463   :  { %v3516_v26 = vadd.f32 %v3515_v1, %v3388_v18  ;;  %v6703_v18 = vld [vmem:[%s11034_s6 + $0x1f8] sm:$0xff] }
0x1465   :  { %v7802_v32 = vpop.f32.mrb[48].mxu1 }
0x1466   :  { %v3525_v3 = vpop.f32.mrb[49].mxu1  ;;  %v3531_v37 = vadd.f32 %v7802_v32, %v3403_v21  ;;  %v6699_v21 = vld [vmem:[%s11034_s6 + $0x1d8] sm:$0xff] }
0x1467   :  { %v3526_v40 = vadd.f32 %v3525_v3, %v3398_v36  ;;  %v6725_v36 = vld [vmem:[%s11036_s8 + $0x1c8] sm:$0xff] }
0x1469   :  { %v7805_v5 = vpop.f32.mrb[50].mxu1 }
0x146a   :  { %v3541_v6 = vadd.f32 %v7805_v5, %v3413_v2  ;;  %v3535_v7 = vpop.f32.mrb[51].mxu1 }
0x146b   :  { %v3536_v9 = vadd.f32 %v3535_v7, %v3408_v4  ;;  %v3622_v4 = vpop.permute.xlu1 %3621  ;;  %v3617_v7 = vpop.permute.xlu0 %3616 }
0x146c   :  { %v6661_v11 = vmul.f32 -1.442695, %v3541_v6 }
0x146d   :  { %v6660_v14 = vmul.f32 -1.442695, %v3536_v9  ;;  %v7808_v15 = vpop.f32.mrb[52].mxu1 }
0x146e   :  { %8783 = vpow2.f32 %v6661_v11  ;;  %v3551_v17 = vadd.f32 %v7808_v15, %v3423_v10  ;;  %v3545_v19 = vpop.f32.mrb[53].mxu1 }
0x146f   :  { %8785 = vpow2.f32 %v6660_v14  ;;  %v3546_v22 = vadd.f32 %v3545_v19, %v3418_v13  ;;  %v6670_v19 = vld [vmem:[%s11038_s7 + $0x1b0] sm:$0xff] }
0x1470   :  { %v6663_v23 = vmul.f32 -1.442695, %v3551_v17 }
0x1471   :  { %v6662_v27 = vmul.f32 -1.442695, %v3546_v22  ;;  %v6671_v22 = vld [vmem:[%s11038_s7 + $0x1b8] sm:$0xff] }
0x1472   :  { %8787 = vpow2.f32 %v6663_v23  ;;  %v6701_v23 = vld [vmem:[%s11034_s6 + $0x1e8] sm:$0xff] }
0x1473   :  { %8789 = vpow2.f32 %v6662_v27  ;;  %v6688_v27 = vld [vmem:[%s11035_s5 + $0x1c0] sm:$0xff] }
0x1474   :  { %8791 = vtanh.f32 %v3521_v25  ;;  %v6702_v25 = vld [vmem:[%s11034_s6 + $0x1f0] sm:$0xff] }
0x1475   :  { %8793 = vtanh.f32 %v3516_v26  ;;  %v6697_v26 = vld [vmem:[%s11034_s6 + $0x1c8] sm:$0xff] }
0x1478   :  { %v8784_v31 = vpop.eup %8783 }
0x1479   :  { %v8786_v24 = vpop.eup %8785  ;;  %v3571_v20 = vadd.f32 1.0, %v8784_v31  ;;  %v6696_v31 = vld [vmem:[%s11034_s6 + $0x1c0] sm:$0xff] }
0x147a   :  { %v3570_v12 = vadd.f32 1.0, %v8786_v24  ;;  %v6698_v24 = vld [vmem:[%s11034_s6 + $0x1d0] sm:$0xff] }
0x147b   :  { %8795 = vrcp.f32 %v3571_v20  ;;  %v6727_v20 = vld [vmem:[%s11036_s8 + $0x1d8] sm:$0xff] }
0x147c   :  { %v8788_v29 = vpop.eup %8787  ;;  %8797 = vrcp.f32 %v3570_v12 }
0x147d   :  { %v8790_v42 = vpop.eup %8789  ;;  %8799 = vtanh.f32 %v3531_v37  ;;  %v3573_v43 = vadd.f32 1.0, %v8788_v29  ;;  %v6724_v37 = vld [vmem:[%s11036_s8 + $0x1c0] sm:$0xff] }
0x147e   :  { %8801 = vtanh.f32 %v3526_v40  ;;  %v3572_v45 = vadd.f32 1.0, %v8790_v42  ;;  %v8792_v46 = vpop.eup %8791  ;;  %v6726_v40 = vld [vmem:[%s11036_s8 + $0x1d0] sm:$0xff]  ;;  %v8942_v29 = vld [vmem:[%s11037_s2 + $0x3] ss:$0 sm:$0xff] }
0x147f   :  { %8803 = vrcp.f32 %v3573_v43  ;;  %v8794_v30 = vpop.eup %8793 }
0x1480   :  { %8805 = vrcp.f32 %v3572_v45 }
0x1485   :  { %v8796_v38 = vpop.eup %8795 }
0x1486   :  { %v8798_v39 = vpop.eup %8797  ;;  %v3583_v48 = vmul.f32 %v8796_v38, %v8792_v46 }
0x1487   :  { %v8800_v49 = vpop.eup %8799  ;;  %v3582_v50 = vmul.f32 %v8798_v39, %v8794_v30 }
0x1488   :  { %v8802_v51 = vpop.eup %8801 }
0x1489   :  { %v8804_v52 = vpop.eup %8803  ;;  %v8367_v54 = vpack.c.bf16 %v3583_v48, %v3582_v50 }
0x148a   :  { %v8806_v55 = vpop.eup %8805  ;;  %v3585_v8 = vmul.f32 %v8804_v52, %v8800_v49  ;;  %v8943_v49 = vld [vmem:[%s11037_s2 + $0x4] ss:$0 sm:$0xff] }
0x148b   :  { %8368 = vmatprep.subr.bf16.mxu0 %v8367_v54  ;;  %v3584_v56 = vmul.f32 %v8806_v55, %v8802_v51 }
0x148c   :  { %8370 = vmatpush3.bf16.msra.mxu0 %v8367_v54 }
0x148d   :  { %v8371_v58 = vpack.c.bf16 %v3585_v8, %v3584_v56 }
0x148f   :  { %8372 = vmatprep.subr.bf16.mxu0 %v8371_v58 }
0x1490   :  { %8374 = vmatpush3.bf16.msra.mxu0 %v8371_v58 }
0x1493   :  { %7818 = vmatmul.mubr.msk.f32.vlgmr.msra.gmra.mrb[50].mxu0 %vm505_vm3, %v6665_v59  ;;  %v8944_v59 = vld [vmem:[%s11037_s2 + $0x5] ss:$0 sm:$0xff] }
0x1494   :  { %7820 = vmatprep.mubr.msk.f32.mxu0 %vm505_vm3, %v6666_v60 }
0x1497   :  { %7821 = vmatmul.mubr.msk.f32.gmra.mrb[52].mxu0 %vm505_vm3, %v6667_v41 }
0x1566   :  { %v7819_v0 = vpop.f32.mrb[50].mxu0 }
0x1567   :  { %v3740_v1 = vadd.f32 %v7819_v0, %v3612_v61  ;;  %v3734_v32 = vpop.f32.mrb[51].mxu0 }
0x1568   :  { %v3735_v2 = vadd.f32 %v3734_v32, %v3607_v62 }
0x1569   :  { %v3774_v3 = vadd.f32 %v3740_v1, %v10068_v44 }
0x156a   :  { %v3773_v5 = vadd.f32 %v3735_v2, %v10071_v63  ;;  %v7822_v6 = vpop.f32.mrb[52].mxu0 }
0x156b   :  { %v10195_v9 = vmul.f32 %v10032_v35, %v3774_v3  ;;  %v3750_v10 = vadd.f32 %v7822_v6, %v3622_v4  ;;  %v3744_v11 = vpop.f32.mrb[53].mxu0  ;;  %v6689_v4 = vld [vmem:[%s11035_s5 + $0x1c8] sm:$0xff]  ;;  %v6691_v6 = vld [vmem:[%s11035_s5 + $0x1d8] sm:$0xff] }
0x156c   :  { %v10198_v13 = vmul.f32 %v10032_v35, %v3773_v5  ;;  %v3745_v14 = vadd.f32 %v3744_v11, %v3617_v7  ;;  %v6690_v5 = vld [vmem:[%s11035_s5 + $0x1d0] sm:$0xff]  ;;  %v6692_v7 = vld [vmem:[%s11035_s5 + $0x1e0] sm:$0xff] }
0x156d   :  { %v3776_v15 = vadd.f32 %v3750_v10, %v10078_v57  ;;  %3787 = vrot.lane.b32.xlu1 %v10195_v9, %s8960_s18  ;;  %v6668_v57 = vld [vmem:[%s11038_s7 + $0x1a0] sm:$0xff]  ;;  %v3798_v51 = vmul.f32 %v8943_v49, %v10195_v9  ;;  %v6693_v10 = vld [vmem:[%s11035_s5 + $0x1e8] sm:$0xff]  ;;  %v6694_v11 = vld [vmem:[%s11035_s5 + $0x1f0] sm:$0xff] }
0x156e   :  { %v3775_v44 = vadd.f32 %v3745_v14, %v10081_v47  ;;  %3785 = vrot.lane.b32.xlu0 %v10198_v13, %s8960_s18  ;;  %v6669_v47 = vld [vmem:[%s11038_s7 + $0x1a8] sm:$0xff]  ;;  %7823 = vmatprep.mubr.msk.f32.mxu0 %vm505_vm3, %v6668_v57  ;;  %v3797_v50 = vmul.f32 %v8943_v49, %v10198_v13  ;;  %v6695_v14 = vld [vmem:[%s11035_s5 + $0x1f8] sm:$0xff] }
0x156f   :  { %v10207_v63 = vmul.f32 %v10032_v35, %v3776_v15  ;;  %7824 = vmatmul.mubr.msk.f32.gmra.mrb[54].mxu0 %vm505_vm3, %v6669_v47  ;;  %v6716_v15 = vld [vmem:[%s11038_s7 + $0x1c0] sm:$0xff] }
0x1570   :  { %v10210_v17 = vmul.f32 %v10032_v35, %v3775_v44  ;;  %7826 = vmatprep.mubr.msk.f32.mxu0 %vm505_vm3, %v6670_v19  ;;  %v8383_v8 = vpack.c.bf16 %v3798_v51, %v3797_v50 }
0x1571   :  { %3791 = vrot.lane.b32.xlu1 %v10207_v63, %s8960_s18  ;;  %v3800_v58 = vmul.f32 %v8943_v49, %v10207_v63 }
0x1572   :  { %3789 = vrot.lane.b32.xlu0 %v10210_v17, %s8960_s18  ;;  %v3799_v56 = vmul.f32 %v8943_v49, %v10210_v17 }
0x1573   :  { %7827 = vmatmul.mubr.msk.f32.gmra.mrb[56].mxu0 %vm505_vm3, %v6671_v22 }
0x1574   :  { %7853 = vmatprep.mubr.msk.f32.mxu0 %vm287_vm2, %v6688_v27  ;;  %v8387_v61 = vpack.c.bf16 %v3800_v58, %v3799_v56 }
0x1575   :  { %3803 = vrot.lane.b32.xlu1 %v10195_v9, %s8961_s19 }
0x1576   :  { %3801 = vrot.lane.b32.xlu0 %v10198_v13, %s8961_s19 }
0x1579   :  { %3807 = vrot.lane.b32.xlu1 %v10207_v63, %s8961_s19 }
0x157a   :  { %3805 = vrot.lane.b32.xlu0 %v10210_v17, %s8961_s19 }
0x157d   :  { %3858 = vperm.xlu1 %8638, %v6701_v23  }
0x157e   :  { %3853 = vperm.xlu0 %8637, %v6700_v28  }
0x1581   :  { %3868 = vperm.xlu1 %8638, %v6703_v18  }
0x1582   :  { %3863 = vperm.xlu0 %8637, %v6702_v25  }
0x1585   :  { %3838 = vperm.xlu1 %8638, %v6697_v26  }
0x1586   :  { %3833 = vperm.xlu0 %8637, %v6696_v31  }
0x1589   :  { %3848 = vperm.xlu1 %8638, %v6699_v21  }
0x158a   :  { %3843 = vperm.xlu0 %8637, %v6698_v24  }
0x158d   :  { %4057 = vperm.xlu1 %8638, %v6725_v36  }
0x158e   :  { %4052 = vperm.xlu0 %8637, %v6724_v37  }
0x1591   :  { %4067 = vperm.xlu1 %8638, %v6727_v20  }
0x1592   :  { %4062 = vperm.xlu0 %8637, %v6726_v40  }
0x15df   :  { %v3788_v12 = vpop.permute.xlu1 %3787 }
0x15e0   :  { %v3794_v42 = vmul.f32 %v8942_v29, %v3788_v12  ;;  %v3786_v43 = vpop.permute.xlu0 %3785 }
0x15e1   :  { %v3793_v45 = vmul.f32 %v8942_v29, %v3786_v43 }
0x15e3   :  { %v8375_v46 = vpack.c.bf16 %v3794_v42, %v3793_v45  ;;  %v3792_v30 = vpop.permute.xlu1 %3791 }
0x15e4   :  { %v3796_v38 = vmul.f32 %v8942_v29, %v3792_v30  ;;  %v3790_v39 = vpop.permute.xlu0 %3789 }
0x15e5   :  { %v3795_v48 = vmul.f32 %v8942_v29, %v3790_v39  ;;  %8376 = vmatprep.subr.bf16.mxu0 %v8375_v46 }
0x15e6   :  { %8378 = vmatpush3.bf16.msra.mxu0 %v8375_v46 }
0x15e7   :  { %v8379_v52 = vpack.c.bf16 %v3796_v38, %v3795_v48  ;;  %v3804_v54 = vpop.permute.xlu1 %3803 }
0x15e8   :  { %v3802_v55 = vpop.permute.xlu0 %3801  ;;  %v3810_v60 = vmul.f32 %v8944_v59, %v3804_v54 }
0x15e9   :  { %8380 = vmatprep.subr.bf16.mxu0 %v8379_v52  ;;  %v3809_v41 = vmul.f32 %v8944_v59, %v3802_v55 }
0x15ea   :  { %8382 = vmatpush3.bf16.msra.mxu0 %v8379_v52 }
0x15eb   :  { %8384 = vmatprep.subr.bf16.mxu0 %v8383_v8  ;;  %v3808_v62 = vpop.permute.xlu1 %3807  ;;  %v8391_v1 = vpack.c.bf16 %v3810_v60, %v3809_v41 }
0x15ec   :  { %v3806_v0 = vpop.permute.xlu0 %3805  ;;  %v3812_v32 = vmul.f32 %v8944_v59, %v3808_v62 }
0x15ed   :  { %v3811_v2 = vmul.f32 %v8944_v59, %v3806_v0 }
0x15ee   :  { %8386 = vmatpush3.bf16.msra.mxu0 %v8383_v8 }
0x15ef   :  { %8388 = vmatprep.subr.bf16.mxu0 %v8387_v61  ;;  %v8395_v3 = vpack.c.bf16 %v3812_v32, %v3811_v2 }
0x15f2   :  { %8390 = vmatpush3.bf16.msra.mxu0 %v8387_v61 }
0x15f3   :  { %8392 = vmatprep.subr.bf16.mxu0 %v8391_v1 }
0x15f6   :  { %8394 = vmatpush3.bf16.msra.mxu0 %v8391_v1 }
0x15f7   :  { %8396 = vmatprep.subr.bf16.mxu0 %v8395_v3 }
0x15fa   :  { %8398 = vmatpush3.bf16.msra.mxu0 %v8395_v3 }
0x15fc   :  { %v3859_v19 = vpop.permute.xlu1 %3858 }
0x15fd   :  { %7854 = vmatmul.mubr.msk.f32.vlgmr.msra.gmra.mrb[58].mxu0 %vm287_vm2, %v6689_v4  ;;  %v3854_v23 = vpop.permute.xlu0 %3853 }
0x15fe   :  { %7856 = vmatprep.mubr.msk.f32.mxu0 %vm287_vm2, %v6690_v5 }
0x1600   :  { %v3869_v26 = vpop.permute.xlu1 %3868 }
0x1601   :  { %7857 = vmatmul.mubr.msk.f32.gmra.mrb[60].mxu0 %vm287_vm2, %v6691_v6  ;;  %v3864_v21 = vpop.permute.xlu0 %3863 }
0x1602   :  { %7859 = vmatprep.mubr.msk.f32.mxu0 %vm287_vm2, %v6692_v7  ;;  %v6717_v7 = vld [vmem:[%s11038_s7 + $0x1c8] sm:$0xff] }
0x1604   :  { %v3839_v42 = vpop.permute.xlu1 %3838 }
0x1605   :  { %7860 = vmatmul.mubr.msk.f32.gmra.mrb[62].mxu0 %vm287_vm2, %v6693_v10  ;;  %v3834_v43 = vpop.permute.xlu0 %3833  ;;  %v6718_v10 = vld [vmem:[%s11038_s7 + $0x1d0] sm:$0xff] }
0x1606   :  { %7862 = vmatprep.mubr.msk.f32.mxu0 %vm287_vm2, %v6694_v11  ;;  %v6719_v11 = vld [vmem:[%s11038_s7 + $0x1d8] sm:$0xff] }
0x1608   :  { %v3849_v38 = vpop.permute.xlu1 %3848 }
0x1609   :  { %7863 = vmatmul.mubr.msk.f32.gmra.mrb[64].mxu0 %vm287_vm2, %v6695_v14  ;;  %v3844_v48 = vpop.permute.xlu0 %3843 }
0x160a   :  { %7873 = vmatprep.mubr.msk.f32.mxu0 %vm505_vm3, %v6716_v15 }
0x160c   :  { %v4058_v14 = vpop.permute.xlu1 %4057 }
0x160d   :  { %v4053_v15 = vpop.permute.xlu0 %4052 }
0x16d0   :  { %v7855_v44 = vpop.f32.mrb[58].mxu0 }
0x16d1   :  { %v3961_v57 = vpop.f32.mrb[59].mxu0  ;;  %v3967_v45 = vadd.f32 %v7855_v44, %v3839_v42 }
0x16d2   :  { %v3962_v46 = vadd.f32 %v3961_v57, %v3834_v43 }
0x16d4   :  { %v7858_v47 = vpop.f32.mrb[60].mxu0 }
0x16d5   :  { %v3971_v22 = vpop.f32.mrb[61].mxu0  ;;  %v3977_v49 = vadd.f32 %v7858_v47, %v3849_v38  ;;  %v6749_v38 = vld [vmem:[%s11034_s6 + $0x208] sm:$0xff] }
0x16d6   :  { %v3972_v51 = vadd.f32 %v3971_v22, %v3844_v48  ;;  %v6751_v48 = vld [vmem:[%s11034_s6 + $0x218] sm:$0xff] }
0x16d8   :  { %v7861_v27 = vpop.f32.mrb[62].mxu0 }
0x16d9   :  { %v3987_v28 = vadd.f32 %v7861_v27, %v3859_v19  ;;  %v3981_v18 = vpop.f32.mrb[63].mxu0 }
0x16da   :  { %v3982_v25 = vadd.f32 %v3981_v18, %v3854_v23  ;;  %v4068_v23 = vpop.permute.xlu1 %4067  ;;  %v4063_v18 = vpop.permute.xlu0 %4062 }
0x16db   :  { %v6713_v31 = vmul.f32 -1.442695, %v3987_v28 }
0x16dc   :  { %v6712_v24 = vmul.f32 -1.442695, %v3982_v25  ;;  %v7864_v36 = vpop.f32.mrb[64].mxu0 }
0x16dd   :  { %8807 = vpow2.f32 %v6713_v31  ;;  %v3997_v37 = vadd.f32 %v7864_v36, %v3869_v26  ;;  %v3991_v20 = vpop.f32.mrb[65].mxu0 }
0x16de   :  { %8809 = vpow2.f32 %v6712_v24  ;;  %v3992_v40 = vadd.f32 %v3991_v20, %v3864_v21 }
0x16df   :  { %v6715_v12 = vmul.f32 -1.442695, %v3997_v37 }
0x16e0   :  { %v6714_v29 = vmul.f32 -1.442695, %v3992_v40 }
0x16e1   :  { %8811 = vpow2.f32 %v6715_v12 }
0x16e2   :  { %8813 = vpow2.f32 %v6714_v29 }
0x16e3   :  { %8815 = vtanh.f32 %v3967_v45  ;;  %v6752_v45 = vld [vmem:[%s11034_s6 + $0x220] sm:$0xff] }
0x16e4   :  { %8817 = vtanh.f32 %v3962_v46  ;;  %v6755_v46 = vld [vmem:[%s11034_s6 + $0x238] sm:$0xff] }
0x16e7   :  { %v8808_v30 = vpop.eup %8807 }
0x16e8   :  { %v8810_v39 = vpop.eup %8809  ;;  %v4017_v50 = vadd.f32 1.0, %v8808_v30  ;;  %v6754_v30 = vld [vmem:[%s11034_s6 + $0x230] sm:$0xff] }
0x16e9   :  { %v4016_v52 = vadd.f32 1.0, %v8810_v39  ;;  %v6748_v39 = vld [vmem:[%s11034_s6 + $0x200] sm:$0xff] }
0x16ea   :  { %8819 = vrcp.f32 %v4017_v50  ;;  %v6677_v50 = vld [vmem:[%s11036_s8 + $0x1a8] sm:$0xff] }
0x16eb   :  { %v8812_v54 = vpop.eup %8811  ;;  %8821 = vrcp.f32 %v4016_v52  ;;  %v6729_v52 = vld [vmem:[%s11036_s8 + $0x1e8] sm:$0xff] }
0x16ec   :  { %v8814_v55 = vpop.eup %8813  ;;  %8823 = vtanh.f32 %v3977_v49  ;;  %v4019_v8 = vadd.f32 1.0, %v8812_v54  ;;  %v6750_v49 = vld [vmem:[%s11034_s6 + $0x210] sm:$0xff]  ;;  %v6728_v54 = vld [vmem:[%s11036_s8 + $0x1e0] sm:$0xff] }
0x16ed   :  { %8825 = vtanh.f32 %v3972_v51  ;;  %v4018_v56 = vadd.f32 1.0, %v8814_v55  ;;  %v8816_v58 = vpop.eup %8815  ;;  %v6676_v51 = vld [vmem:[%s11036_s8 + $0x1a0] sm:$0xff]  ;;  %v6781_v55 = vld [vmem:[%s11036_s8 + $0x228] sm:$0xff] }
0x16ee   :  { %8827 = vrcp.f32 %v4019_v8  ;;  %v8818_v59 = vpop.eup %8817  ;;  %v6780_v8 = vld [vmem:[%s11036_s8 + $0x220] sm:$0xff] }
0x16ef   :  { %8829 = vrcp.f32 %v4018_v56  ;;  %v6679_v56 = vld [vmem:[%s11036_s8 + $0x1b8] sm:$0xff] }
0x16f4   :  { %v8820_v60 = vpop.eup %8819 }
0x16f5   :  { %v8822_v41 = vpop.eup %8821  ;;  %v4029_v61 = vmul.f32 %v8820_v60, %v8816_v58  ;;  %v6678_v58 = vld [vmem:[%s11036_s8 + $0x1b0] sm:$0xff] }
0x16f6   :  { %v8824_v62 = vpop.eup %8823  ;;  %v4028_v0 = vmul.f32 %v8822_v41, %v8818_v59  ;;  %v6731_v59 = vld [vmem:[%s11036_s8 + $0x1f8] sm:$0xff]  ;;  %v6730_v60 = vld [vmem:[%s11036_s8 + $0x1f0] sm:$0xff] }
0x16f7   :  { %v8826_v1 = vpop.eup %8825  ;;  %v6783_v41 = vld [vmem:[%s11036_s8 + $0x238] sm:$0xff] }
0x16f8   :  { %v8828_v32 = vpop.eup %8827  ;;  %v8399_v2 = vpack.c.bf16 %v4029_v61, %v4028_v0  ;;  %v6782_v61 = vld [vmem:[%s11036_s8 + $0x230] sm:$0xff]  ;;  %v6793_v0 = vld [vmem:[%s11039_s10 + $0x4] sm:$0x3] }
0x16f9   :  { %v8830_v3 = vpop.eup %8829  ;;  %v4031_v4 = vmul.f32 %v8828_v32, %v8824_v62  ;;  %v6799_v62 = vld [vmem:[%s11032_s4 + $0x60] sm:$0xff]  ;;  %v6800_v32 = vld [vmem:[%s11032_s4 + $0x68] sm:$0xff] }
0x16fa   :  { %8400 = vmatprep.subr.bf16.mxu0 %v8399_v2  ;;  %v4030_v5 = vmul.f32 %v8830_v3, %v8826_v1  ;;  %v6801_v1 = vld [vmem:[%s11032_s4 + $0x70] sm:$0xff] }
0x16fb   :  { %8402 = vmatpush3.bf16.msra.mxu0 %v8399_v2  ;;  %v6802_v2 = vld [vmem:[%s11032_s4 + $0x78] sm:$0xff] }
0x16fc   :  { %v8403_v6 = vpack.c.bf16 %v4031_v4, %v4030_v5  ;;  %v8946_v4 = vld [vmem:[%s11037_s2 + $0x6] ss:$0 sm:$0xff] }
0x16fe   :  { %8404 = vmatprep.subr.bf16.mxu0 %v8403_v6 }
0x16ff   :  { %8406 = vmatpush3.bf16.msra.mxu0 %v8403_v6 }
0x1702   :  { %7874 = vmatmul.mubr.msk.f32.vlgmr.msra.gmra.mrb[66].mxu0 %vm505_vm3, %v6717_v7 }
0x1703   :  { %7876 = vmatprep.mubr.msk.f32.mxu0 %vm505_vm3, %v6718_v10 }
0x1706   :  { %7877 = vmatmul.mubr.msk.f32.gmra.mrb[68].mxu0 %vm505_vm3, %v6719_v11 }
0x17d5   :  { %v7875_v44 = vpop.f32.mrb[66].mxu0 }
0x17d6   :  { %v4186_v57 = vadd.f32 %v7875_v44, %v4058_v14  ;;  %v4180_v47 = vpop.f32.mrb[67].mxu0 }
0x17d7   :  { %v4181_v19 = vadd.f32 %v4180_v47, %v4053_v15 }
0x17d8   :  { %v4220_v22 = vadd.f32 %v4186_v57, %v10195_v9  ;;  %v8945_v9 = vld [vmem:[%s11037_s2 + $0x7] ss:$0 sm:$0xff] }
0x17d9   :  { %v4219_v27 = vadd.f32 %v4181_v19, %v10198_v13  ;;  %v7878_v28 = vpop.f32.mrb[68].mxu0 }
0x17da   :  { %v4224_v25 = vmul.f32 %v10032_v35, %v4220_v22  ;;  %v4196_v26 = vadd.f32 %v7878_v28, %v4068_v23  ;;  %v4190_v31 = vpop.f32.mrb[69].mxu0  ;;  %v8947_v22 = vld [vmem:[%s11037_s2 + $0x8] ss:$0 sm:$0xff] }
0x17db   :  { %v4223_v21 = vmul.f32 %v10032_v35, %v4219_v27  ;;  %v4191_v24 = vadd.f32 %v4190_v31, %v4063_v18 }
0x17dc   :  { %v4222_v36 = vadd.f32 %v4196_v26, %v10207_v63  ;;  %4233 = vrot.lane.b32.xlu1 %v4224_v25, %s8960_s18  ;;  %v4244_v37 = vmul.f32 %v8945_v9, %v4224_v25 }
0x17dd   :  { %v4221_v13 = vadd.f32 %v4191_v24, %v10210_v17  ;;  %4231 = vrot.lane.b32.xlu0 %v4223_v21, %s8960_s18  ;;  %v4243_v20 = vmul.f32 %v8945_v9, %v4223_v21  ;;  %v6740_v17 = vld [vmem:[%s11035_s5 + $0x200] sm:$0xff]  ;;  %v6741_v24 = vld [vmem:[%s11035_s5 + $0x208] sm:$0xff] }
0x17de   :  { %v4226_v40 = vmul.f32 %v10032_v35, %v4222_v36  ;;  %7909 = vmatprep.mubr.msk.f32.mxu1 %vm287_vm2, %v6740_v17  ;;  %v6742_v36 = vld [vmem:[%s11035_s5 + $0x210] sm:$0xff] }
0x17df   :  { %v4225_v12 = vmul.f32 %v10032_v35, %v4221_v13  ;;  %v10350_v29 = vpack.c.bf16 %v4244_v37, %v4243_v20  ;;  %v6753_v35 = vld [vmem:[%s11034_s6 + $0x228] sm:$0xff]  ;;  %v6744_v37 = vld [vmem:[%s11035_s5 + $0x220] sm:$0xff]  ;;  %v6746_v20 = vld [vmem:[%s11035_s5 + $0x230] sm:$0xff] }
0x17e0   :  { %4237 = vrot.lane.b32.xlu1 %v4226_v40, %s8960_s18  ;;  %v4246_v63 = vmul.f32 %v8945_v9, %v4226_v40  ;;  %v6745_v13 = vld [vmem:[%s11035_s5 + $0x228] sm:$0xff] }
0x17e1   :  { %4235 = vrot.lane.b32.xlu0 %v4225_v12, %s8960_s18  ;;  %v4245_v42 = vmul.f32 %v8945_v9, %v4225_v12  ;;  %v6743_v9 = vld [vmem:[%s11035_s5 + $0x218] sm:$0xff] }
0x17e3   :  { %v10354_v43 = vpack.c.bf16 %v4246_v63, %v4245_v42  ;;  %v6722_v63 = vld [vmem:[%s11038_s7 + $0x1f0] sm:$0xff]  ;;  %v6723_v42 = vld [vmem:[%s11038_s7 + $0x1f8] sm:$0xff] }
0x17e4   :  { %4249 = vrot.lane.b32.xlu1 %v4224_v25, %s8961_s19 }
0x17e5   :  { %4247 = vrot.lane.b32.xlu0 %v4223_v21, %s8961_s19 }
0x17e8   :  { %4253 = vrot.lane.b32.xlu1 %v4226_v40, %s8961_s19  ;;  %v6747_v40 = vld [vmem:[%s11035_s5 + $0x238] sm:$0xff] }
0x17e9   :  { %4251 = vrot.lane.b32.xlu0 %v4225_v12, %s8961_s19  ;;  %v6720_v12 = vld [vmem:[%s11038_s7 + $0x1e0] sm:$0xff] }
0x17ea   :  { %7879 = vmatprep.mubr.msk.f32.mxu0 %vm505_vm3, %v6720_v12  ;;  %v6774_v12 = vld [vmem:[%s11038_s7 + $0x230] sm:$0xff] }
0x17ec   :  { %4304 = vperm.xlu1 %8638, %v6753_v35  }
0x17ed   :  { %4299 = vperm.xlu0 %8637, %v6752_v45  }
0x17f0   :  { %4314 = vperm.xlu1 %8638, %v6755_v46  }
0x17f1   :  { %4309 = vperm.xlu0 %8637, %v6754_v30  }
0x17f4   :  { %4284 = vperm.xlu1 %8638, %v6749_v38  }
0x17f5   :  { %4279 = vperm.xlu0 %8637, %v6748_v39  }
0x17f8   :  { %4294 = vperm.xlu1 %8638, %v6751_v48  }
0x17f9   :  { %4289 = vperm.xlu0 %8637, %v6750_v49  }
0x17fc   :  { %3631 = vperm.xlu1 %8638, %v6677_v50  }
0x17fd   :  { %3626 = vperm.xlu0 %8637, %v6676_v51  }
0x1800   :  { %4077 = vperm.xlu1 %8638, %v6729_v52  }
0x1801   :  { %4072 = vperm.xlu0 %8637, %v6728_v54  }
0x1804   :  { %4519 = vperm.xlu1 %8638, %v6781_v55  }
0x1805   :  { %4514 = vperm.xlu0 %8637, %v6780_v8  }
0x1808   :  { %3641 = vperm.xlu1 %8638, %v6679_v56  }
0x1809   :  { %3636 = vperm.xlu0 %8637, %v6678_v58  }
0x180c   :  { %4087 = vperm.xlu1 %8638, %v6731_v59  }
0x180d   :  { %4082 = vperm.xlu0 %8637, %v6730_v60  }
0x1810   :  { %4529 = vperm.xlu1 %8638, %v6783_v41  }
0x1811   :  { %4524 = vperm.xlu0 %8637, %v6782_v61  }
0x1814   :  { %4762 = vperm.xlu1 %8638, %v6799_v62  }
0x1815   :  { %4671 = vperm.xlu0 %8637, %v6793_v0  }
0x1818   :  { %4772 = vperm.xlu1 %8638, %v6801_v1  }
0x1819   :  { %4767 = vperm.xlu0 %8637, %v6800_v32  }
0x181d   :  { %4777 = vperm.xlu0 %8637, %v6802_v2  }
0x184e   :  { %v4234_v3 = vpop.permute.xlu1 %4233 }
0x184f   :  { %v4240_v5 = vmul.f32 %v8946_v4, %v4234_v3  ;;  %v4232_v6 = vpop.permute.xlu0 %4231 }
0x1850   :  { %v4239_v7 = vmul.f32 %v8946_v4, %v4232_v6 }
0x1852   :  { %v8407_v10 = vpack.c.bf16 %v4240_v5, %v4239_v7  ;;  %v4238_v11 = vpop.permute.xlu1 %4237 }
0x1853   :  { %v4242_v14 = vmul.f32 %v8946_v4, %v4238_v11  ;;  %v4236_v15 = vpop.permute.xlu0 %4235 }
0x1854   :  { %v4241_v44 = vmul.f32 %v8946_v4, %v4236_v15  ;;  %8408 = vmatprep.subr.bf16.mxu1 %v8407_v10 }
0x1855   :  { %8410 = vmatpush3.bf16.msra.mxu1 %v8407_v10 }
0x1856   :  { %v8411_v57 = vpack.c.bf16 %v4242_v14, %v4241_v44  ;;  %v4250_v47 = vpop.permute.xlu1 %4249 }
0x1857   :  { %v4248_v19 = vpop.permute.xlu0 %4247  ;;  %v4256_v23 = vmul.f32 %v8947_v22, %v4250_v47 }
0x1858   :  { %8412 = vmatprep.subr.bf16.mxu1 %v8411_v57  ;;  %v4255_v27 = vmul.f32 %v8947_v22, %v4248_v19 }
0x1859   :  { %8414 = vmatpush3.bf16.msra.mxu1 %v8411_v57 }
0x185a   :  { %8416 = vmatprep.subr.bf16.mxu1 %v10350_v29  ;;  %v4254_v28 = vpop.permute.xlu1 %4253  ;;  %v8423_v25 = vpack.c.bf16 %v4256_v23, %v4255_v27 }
0x185b   :  { %v4252_v18 = vpop.permute.xlu0 %4251  ;;  %v4258_v26 = vmul.f32 %v8947_v22, %v4254_v28 }
0x185c   :  { %v4257_v31 = vmul.f32 %v8947_v22, %v4252_v18 }
0x185d   :  { %8418 = vmatpush3.bf16.msra.mxu1 %v10350_v29  ;;  %v6721_v29 = vld [vmem:[%s11038_s7 + $0x1e8] sm:$0xff] }
0x185e   :  { %8420 = vmatprep.subr.bf16.mxu1 %v10354_v43  ;;  %v8427_v21 = vpack.c.bf16 %v4258_v26, %v4257_v31  ;;  %7880 = vmatmul.mubr.msk.f32.gmra.mrb[54].mxu0 %vm505_vm3, %v6721_v29  ;;  %v6775_v29 = vld [vmem:[%s11038_s7 + $0x238] sm:$0xff] }
0x185f   :  { %7882 = vmatprep.mubr.msk.f32.mxu0 %vm505_vm3, %v6722_v63 }
0x1861   :  { %8422 = vmatpush3.bf16.msra.mxu1 %v10354_v43  ;;  %v6768_v43 = vld [vmem:[%s11038_s7 + $0x200] sm:$0xff] }
0x1862   :  { %8424 = vmatprep.subr.bf16.mxu1 %v8423_v25  ;;  %7883 = vmatmul.mubr.msk.f32.gmra.mrb[56].mxu0 %vm505_vm3, %v6723_v42 }
0x1863   :  { %7929 = vmatprep.mubr.msk.f32.mxu0 %vm505_vm3, %v6768_v43 }
0x1865   :  { %8426 = vmatpush3.bf16.msra.mxu1 %v8423_v25 }
0x1866   :  { %8428 = vmatprep.subr.bf16.mxu1 %v8427_v21 }
0x1869   :  { %8430 = vmatpush3.bf16.msra.mxu1 %v8427_v21 }
0x186a   :  { %8439 = vmatprep.subr.bf16.mxu1 %v8962_v33 }
0x186b   :  { %v4305_v46 = vpop.permute.xlu1 %4304 }
0x186c   :  { %7910 = vmatmul.mubr.msk.f32.vlgmr.msra.gmra.mrb[54].mxu1 %vm287_vm2, %v6741_v24  ;;  %v4300_v38 = vpop.permute.xlu0 %4299 }
0x186d   :  { %7912 = vmatprep.mubr.msk.f32.mxu1 %vm287_vm2, %v6742_v36 }
0x186f   :  { %v4315_v51 = vpop.permute.xlu1 %4314 }
0x1870   :  { %7913 = vmatmul.mubr.msk.f32.gmra.mrb[56].mxu1 %vm287_vm2, %v6743_v9  ;;  %v4310_v54 = vpop.permute.xlu0 %4309  ;;  %v6769_v9 = vld [vmem:[%s11038_s7 + $0x208] sm:$0xff] }
0x1871   :  { %7915 = vmatprep.mubr.msk.f32.mxu1 %vm287_vm2, %v6744_v37  ;;  %v6770_v37 = vld [vmem:[%s11038_s7 + $0x210] sm:$0xff] }
0x1873   :  { %v4285_v61 = vpop.permute.xlu1 %4284 }
0x1874   :  { %7916 = vmatmul.mubr.msk.f32.gmra.mrb[58].mxu1 %vm287_vm2, %v6745_v13  ;;  %v4280_v62 = vpop.permute.xlu0 %4279  ;;  %v6771_v13 = vld [vmem:[%s11038_s7 + $0x218] sm:$0xff] }
0x1875   :  { %7918 = vmatprep.mubr.msk.f32.mxu1 %vm287_vm2, %v6746_v20  ;;  %v6772_v20 = vld [vmem:[%s11038_s7 + $0x220] sm:$0xff] }
0x1877   :  { %v4295_v2 = vpop.permute.xlu1 %4294 }
0x1878   :  { %7919 = vmatmul.mubr.msk.f32.gmra.mrb[60].mxu1 %vm287_vm2, %v6747_v40  ;;  %v4290_v4 = vpop.permute.xlu0 %4289  ;;  %v6773_v40 = vld [vmem:[%s11038_s7 + $0x228] sm:$0xff] }
0x1879   :  { %7949 = vmatprep.mubr.msk.f32.mxu1 %vm8963_vm4, %v8964_v34 }
0x187b   :  { %v3632_v63 = vpop.permute.xlu1 %3631 }
0x187c   :  { %v3627_v42 = vpop.permute.xlu0 %3626 }
0x187f   :  { %v4078_v43 = vpop.permute.xlu1 %4077 }
0x193f   :  { %v7911_v35 = vpop.f32.mrb[54].mxu1 }
0x1940   :  { %v4407_v17 = vpop.f32.mrb[55].mxu1  ;;  %v4413_v0 = vadd.f32 %v7911_v35, %v4285_v61  ;;  %v4073_v35 = vpop.permute.xlu0 %4072 }
0x1941   :  { %v4408_v1 = vadd.f32 %v4407_v17, %v4280_v62  ;;  %v4520_v17 = vpop.permute.xlu1 %4519 }
0x1943   :  { %v7914_v45 = vpop.f32.mrb[56].mxu1 }
0x1944   :  { %v4417_v30 = vpop.f32.mrb[57].mxu1  ;;  %v4423_v5 = vadd.f32 %v7914_v45, %v4295_v2  ;;  %v4515_v45 = vpop.permute.xlu0 %4514 }
0x1945   :  { %v4418_v7 = vadd.f32 %v4417_v30, %v4290_v4 }
0x1947   :  { %v7917_v39 = vpop.f32.mrb[58].mxu1 }
0x1948   :  { %v4433_v48 = vadd.f32 %v7917_v39, %v4305_v46  ;;  %v4427_v49 = vpop.f32.mrb[59].mxu1  ;;  %v3642_v46 = vpop.permute.xlu1 %3641 }
0x1949   :  { %v4428_v50 = vadd.f32 %v4427_v49, %v4300_v38  ;;  %v3637_v30 = vpop.permute.xlu0 %3636 }
0x194a   :  { %v6765_v52 = vmul.f32 -1.442695, %v4433_v48 }
0x194b   :  { %v6764_v55 = vmul.f32 -1.442695, %v4428_v50  ;;  %v7920_v8 = vpop.f32.mrb[60].mxu1 }
0x194c   :  { %8831 = vpow2.f32 %v6765_v52  ;;  %v4443_v56 = vadd.f32 %v7920_v8, %v4315_v51  ;;  %v4437_v58 = vpop.f32.mrb[61].mxu1  ;;  %v4088_v48 = vpop.permute.xlu1 %4087  ;;  %v8575_v51 = vadd.f32 %v4078_v43, %v3632_v63 }
0x194d   :  { %8833 = vpow2.f32 %v6764_v55  ;;  %v4438_v59 = vadd.f32 %v4437_v58, %v4310_v54  ;;  %v4083_v49 = vpop.permute.xlu0 %4082  ;;  %v8578_v54 = vadd.f32 %v4073_v35, %v3627_v42 }
0x194e   :  { %v6767_v60 = vmul.f32 -1.442695, %v4443_v56  ;;  %v8576_v55 = vadd.f32 %v8575_v51, %v4520_v17  ;;  %v8584_v62 = vadd.f32 %v4083_v49, %v3637_v30  ;;  %v6808_v30 = vld [vmem:[%s11035_s5 + $0x240] sm:$0xff]  ;;  %v6817_v49 = vld [vmem:[%s11034_s6 + $0x248] sm:$0xff]  ;;  %v6819_v51 = vld [vmem:[%s11034_s6 + $0x258] sm:$0xff] }
0x194f   :  { %v6766_v41 = vmul.f32 -1.442695, %v4438_v59  ;;  %v8579_v8 = vadd.f32 %v8578_v54, %v4515_v45  ;;  %v8581_v59 = vadd.f32 %v4088_v48, %v3642_v46  ;;  %v6821_v46 = vld [vmem:[%s11034_s6 + $0x268] sm:$0xff]  ;;  %v6822_v48 = vld [vmem:[%s11034_s6 + $0x270] sm:$0xff] }
0x1950   :  { %8835 = vpow2.f32 %v6767_v60  ;;  %v4530_v56 = vpop.permute.xlu1 %4529  ;;  %v6845_v54 = vld [vmem:[%s11036_s8 + $0x248] sm:$0xff] }
0x1951   :  { %8837 = vpow2.f32 %v6766_v41  ;;  %v4525_v60 = vpop.permute.xlu0 %4524 }
0x1952   :  { %8839 = vtanh.f32 %v4413_v0 }
0x1953   :  { %8841 = vtanh.f32 %v4408_v1  ;;  %v8582_v1 = vadd.f32 %v8581_v59, %v4530_v56  ;;  %v6846_v56 = vld [vmem:[%s11036_s8 + $0x250] sm:$0xff]  ;;  %v8949_v59 = vld [vmem:[%s11037_s2] ss:$0 sm:$0xff] }
0x1956   :  { %v8832_v32 = vpop.eup %8831 }
0x1957   :  { %v8834_v3 = vpop.eup %8833  ;;  %v4463_v6 = vadd.f32 1.0, %v8832_v32  ;;  %v10531_v32 = vld [vmem:[%s11033_s1] ss:$0 sm:$0xff] }
0x1958   :  { %v4462_v10 = vadd.f32 1.0, %v8834_v3  ;;  %v8585_v3 = vadd.f32 %v8584_v62, %v4525_v60 }
0x1959   :  { %8843 = vrcp.f32 %v4463_v6 }
0x195a   :  { %v8836_v11 = vpop.eup %8835  ;;  %8845 = vrcp.f32 %v4462_v10 }
0x195b   :  { %v8838_v14 = vpop.eup %8837  ;;  %8847 = vtanh.f32 %v4423_v5  ;;  %v4465_v15 = vadd.f32 1.0, %v8836_v11 }
0x195c   :  { %8849 = vtanh.f32 %v4418_v7  ;;  %v4464_v44 = vadd.f32 1.0, %v8838_v14  ;;  %v8840_v57 = vpop.eup %8839 }
0x195d   :  { %8851 = vrcp.f32 %v4465_v15  ;;  %v8842_v47 = vpop.eup %8841 }
0x195e   :  { %8853 = vrcp.f32 %v4464_v44 }
0x1963   :  { %v8844_v19 = vpop.eup %8843 }
0x1964   :  { %v8846_v22 = vpop.eup %8845  ;;  %v4475_v23 = vmul.f32 %v8844_v19, %v8840_v57  ;;  %v6792_v57 = vld [vmem:[%s11040_s9 + $0x4] sm:$0x3]  ;;  %v4672_v19 = vpop.permute.xlu0 %4671 }
0x1965   :  { %v8848_v27 = vpop.eup %8847  ;;  %v4474_v28 = vmul.f32 %v8846_v22, %v8842_v47  ;;  %v6795_v47 = vld [vmem:[%s11031_s3 + $0x60] sm:$0xff] }
0x1966   :  { %v8850_v18 = vpop.eup %8849 }
0x1967   :  { %v8852_v25 = vpop.eup %8851  ;;  %v8431_v26 = vpack.c.bf16 %v4475_v23, %v4474_v28 }
0x1968   :  { %v8854_v31 = vpop.eup %8853  ;;  %v4477_v21 = vmul.f32 %v8852_v25, %v8848_v27 }
0x1969   :  { %8432 = vmatprep.subr.bf16.mxu0 %v8431_v26  ;;  %v4476_v24 = vmul.f32 %v8854_v31, %v8850_v18  ;;  %v4748_v18 = vmul.f32 %v10531_v32, %v9550_v16  ;;  %v6797_v31 = vld [vmem:[%s11031_s3 + $0x70] sm:$0xff]  ;;  %v6798_v16 = vld [vmem:[%s11031_s3 + $0x78] sm:$0xff] }
0x196a   :  { %8434 = vmatpush3.bf16.msra.mxu0 %v8431_v26  ;;  %v6796_v26 = vld [vmem:[%s11031_s3 + $0x68] sm:$0xff] }
0x196b   :  { %v8435_v36 = vpack.c.bf16 %v4477_v21, %v4476_v24  ;;  %v4768_v21 = vpop.permute.xlu0 %4767  ;;  %v4763_v24 = vpop.permute.xlu1 %4762 }
0x196d   :  { %8436 = vmatprep.subr.bf16.mxu0 %v8435_v36 }
0x196e   :  { %8438 = vmatpush3.bf16.msra.mxu0 %v8435_v36 }
0x196f   :  { %v4773_v63 = vpop.permute.xlu1 %4772 }
0x1971   :  { %7930 = vmatmul.mubr.msk.f32.vlgmr.msra.gmra.mrb[70].mxu0 %vm505_vm3, %v6769_v9 }
0x1972   :  { %7932 = vmatprep.mubr.msk.f32.mxu0 %vm505_vm3, %v6770_v37 }
0x1975   :  { %7933 = vmatmul.mubr.msk.f32.gmra.mrb[72].mxu0 %vm505_vm3, %v6771_v13 }
0x1976   :  { %7935 = vmatprep.mubr.msk.f32.mxu0 %vm505_vm3, %v6772_v20 }
0x1979   :  { %7936 = vmatmul.mubr.msk.f32.gmra.mrb[54].mxu0 %vm505_vm3, %v6773_v40  ;;  %v4778_v40 = vpop.permute.xlu0 %4777 }
0x197a   :  { %7938 = vmatprep.mubr.msk.f32.mxu0 %vm505_vm3, %v6774_v12 }
0x197d   :  { %7939 = vmatmul.mubr.msk.f32.gmra.mrb[56].mxu0 %vm505_vm3, %v6775_v29 }
0x197e   :  { %7984 = vmatprep.mubr.msk.f32.mxu0 %vm287_vm2, %v6808_v30 }
0x1a44   :  { %v7931_v38 = vpop.f32.mrb[70].mxu0 }
0x1a45   :  { %v4622_v39 = vpop.f32.mrb[71].mxu0  ;;  %v6820_v38 = vld [vmem:[%s11034_s6 + $0x260] sm:$0xff] }
0x1a46   :  { %v6823_v39 = vld [vmem:[%s11034_s6 + $0x278] sm:$0xff] }
0x1a48   :  { %v7934_v50 = vpop.f32.mrb[72].mxu0 }
0x1a49   :  { %v4630_v52 = vpop.f32.mrb[73].mxu0  ;;  %v6816_v50 = vld [vmem:[%s11034_s6 + $0x240] sm:$0xff] }
0x1a4a   :  { %v6818_v52 = vld [vmem:[%s11034_s6 + $0x250] sm:$0xff] }
0x1a4c   :  { %v7937_v58 = vpop.f32.mrb[54].mxu0 }
0x1a4d   :  { %v8577_v41 = vadd.f32 %v8576_v55, %v7937_v58  ;;  %v4638_v61 = vpop.f32.mrb[55].mxu0  ;;  %v6844_v55 = vld [vmem:[%s11036_s8 + $0x240] sm:$0xff] }
0x1a4e   :  { %v8580_v0 = vadd.f32 %v8579_v8, %v4638_v61  ;;  %v6847_v8 = vld [vmem:[%s11036_s8 + $0x258] sm:$0xff] }
0x1a4f   :  { %v4662_v2 = vmul.f32 %v10531_v32, %v8577_v41 }
0x1a50   :  { %v4661_v4 = vmul.f32 %v10531_v32, %v8580_v0  ;;  %v7940_v5 = vpop.f32.mrb[56].mxu0 }
0x1a51   :  { %v8583_v6 = vadd.f32 %v8582_v1, %v7940_v5  ;;  %v4648_v7 = vpop.f32.mrb[57].mxu0 }
0x1a52   :  { %v8440_v10 = vpack.c.bf16 %v4662_v2, %v4661_v4  ;;  %v8586_v11 = vadd.f32 %v8585_v3, %v4648_v7  ;;  %v8950_v4 = vld [vmem:[%s11037_s2 + $0x1] ss:$0 sm:$0xff] }
0x1a53   :  { %v4664_v14 = vmul.f32 %v10531_v32, %v8583_v6 }
0x1a54   :  { %v4663_v15 = vmul.f32 %v10531_v32, %v8586_v11  ;;  %8441 = vmatpush3.bf16.msra.mxu1 %v8440_v10 }
0x1a55   :  { %8442 = vmatprep.subr.bf16.mxu1 %v8962_v33 }
0x1a56   :  { %v8443_v44 = vpack.c.bf16 %v4664_v14, %v4663_v15 }
0x1a58   :  { %8444 = vmatpush3.bf16.msra.mxu1 %v8443_v44 }
0x1a5b   :  { %7950 = vmatmul.mubr.msk.f32.vlgmr.msra.gmra.mrb[62].mxu1 %vm505_vm3, %v6792_v57  ;;  %v8951_v57 = vld [vmem:[%s11037_s2 + $0x2] ss:$0 sm:$0xff] }
0x1a5c   :  { %7954 = vmatprep.mubr.msk.f32.mxu1 %vm68_vm1, %v6795_v47 }
0x1b2e   :  { %v4743_v22 = vpop.f32.mrb[62].mxu1 }
0x1b2f   :  { %v4744_v23 = vadd.f32 %v4743_v22, %v4672_v19  ;;  %v7951_v27 = vpop.f32.mrb[63].mxu1 }
0x1b31   :  { %v4747_v28 = vmul.f32 %v10531_v32, %v4744_v23 }
0x1b33   :  { %v10549_v25 = vadd.f32 %v4748_v18, %v4747_v28 }
0x1b35   :  { %7952 = vmatprep.subr.msk.mxu1 %vm81_vm0, %v10549_v25 }
0x1b36   :  { %7953 = vmatpush3.msk.msra.mxu1 %vm81_vm0, %v10549_v25 }
0x1b37   :  { %7955 = vmatmul.mubr.msk.f32.vlgmr.msra.gmra.mrb[64].mxu1 %vm68_vm1, %v6796_v26 }
0x1b38   :  { %7957 = vmatprep.mubr.msk.f32.mxu1 %vm68_vm1, %v6797_v31 }
0x1b3b   :  { %7958 = vmatmul.mubr.msk.f32.gmra.mrb[66].mxu1 %vm68_vm1, %v6798_v16  ;;  %v6809_v16 = vld [vmem:[%s11035_s5 + $0x248] sm:$0xff] }
0x1c0a   :  { %v7956_v36 = vpop.f32.mrb[64].mxu1 }
0x1c0b   :  { %v4867_v9 = vadd.f32 %v7956_v36, %v4768_v21  ;;  %v4861_v37 = vpop.f32.mrb[65].mxu1  ;;  %v6810_v21 = vld [vmem:[%s11035_s5 + $0x250] sm:$0xff]  ;;  %v6812_v36 = vld [vmem:[%s11035_s5 + $0x260] sm:$0xff] }
0x1c0c   :  { %v4862_v13 = vadd.f32 %v4861_v37, %v4763_v24  ;;  %v6811_v24 = vld [vmem:[%s11035_s5 + $0x258] sm:$0xff]  ;;  %v6814_v37 = vld [vmem:[%s11035_s5 + $0x270] sm:$0xff] }
0x1c0d   :  { %v10568_v20 = vmul.f32 %v10531_v32, %v4867_v9  ;;  %v6813_v9 = vld [vmem:[%s11035_s5 + $0x268] sm:$0xff] }
0x1c0e   :  { %v10571_v12 = vmul.f32 %v10531_v32, %v4862_v13  ;;  %v7959_v29 = vpop.f32.mrb[66].mxu1  ;;  %v6815_v13 = vld [vmem:[%s11035_s5 + $0x278] sm:$0xff] }
0x1c0f   :  { %v4877_v42 = vadd.f32 %v7959_v29, %v4778_v40  ;;  %4886 = vrot.lane.b32.xlu0 %v10568_v20, %s8960_s18  ;;  %v4871_v43 = vpop.f32.mrb[67].mxu1  ;;  %v4897_v6 = vmul.f32 %v8950_v4, %v10568_v20  ;;  %v6836_v40 = vld [vmem:[%s11038_s7 + $0x240] sm:$0xff] }
0x1c10   :  { %v4872_v35 = vadd.f32 %v4871_v43, %v4773_v63  ;;  %4884 = vrot.lane.b32.xlu1 %v10571_v12, %s8960_s18  ;;  %v4896_v5 = vmul.f32 %v8950_v4, %v10571_v12  ;;  %8004 = vmatprep.mubr.msk.f32.mxu1 %vm505_vm3, %v6836_v40 }
0x1c11   :  { %v10578_v17 = vmul.f32 %v10531_v32, %v4877_v42 }
0x1c12   :  { %v10581_v45 = vmul.f32 %v10531_v32, %v4872_v35  ;;  %v8453_v14 = vpack.c.bf16 %v4897_v6, %v4896_v5 }
0x1c13   :  { %4890 = vrot.lane.b32.xlu0 %v10578_v17, %s8960_s18  ;;  %v4899_v44 = vmul.f32 %v8950_v4, %v10578_v17 }
0x1c14   :  { %4888 = vrot.lane.b32.xlu1 %v10581_v45, %s8960_s18  ;;  %v4898_v15 = vmul.f32 %v8950_v4, %v10581_v45 }
0x1c16   :  { %v8457_v22 = vpack.c.bf16 %v4899_v44, %v4898_v15 }
0x1c17   :  { %4902 = vrot.lane.b32.xlu0 %v10568_v20, %s8961_s19 }
0x1c18   :  { %4900 = vrot.lane.b32.xlu1 %v10571_v12, %s8961_s19 }
0x1c1b   :  { %4906 = vrot.lane.b32.xlu0 %v10578_v17, %s8961_s19 }
0x1c1c   :  { %4904 = vrot.lane.b32.xlu1 %v10581_v45, %s8961_s19 }
0x1c1f   :  { %4957 = vperm.xlu0 %8637, %v6821_v46  }
0x1c20   :  { %4952 = vperm.xlu1 %8638, %v6820_v38  }
0x1c23   :  { %4967 = vperm.xlu0 %8637, %v6823_v39  }
0x1c24   :  { %4962 = vperm.xlu1 %8638, %v6822_v48  }
0x1c27   :  { %4937 = vperm.xlu0 %8637, %v6817_v49  }
0x1c28   :  { %4932 = vperm.xlu1 %8638, %v6816_v50  }
0x1c2b   :  { %4947 = vperm.xlu0 %8637, %v6819_v51  }
0x1c2c   :  { %4942 = vperm.xlu1 %8638, %v6818_v52  }
0x1c2f   :  { %5156 = vperm.xlu0 %8637, %v6845_v54  }
0x1c30   :  { %5151 = vperm.xlu1 %8638, %v6844_v55  }
0x1c33   :  { %5166 = vperm.xlu0 %8637, %v6847_v8  }
0x1c34   :  { %5161 = vperm.xlu1 %8638, %v6846_v56  }
0x1c81   :  { %v4887_v58 = vpop.permute.xlu0 %4886 }
0x1c82   :  { %v4893_v60 = vmul.f32 %v8949_v59, %v4887_v58  ;;  %v4885_v41 = vpop.permute.xlu1 %4884 }
0x1c83   :  { %v4892_v61 = vmul.f32 %v8949_v59, %v4885_v41 }
0x1c85   :  { %v8445_v62 = vpack.c.bf16 %v4893_v60, %v4892_v61  ;;  %v4891_v0 = vpop.permute.xlu0 %4890 }
0x1c86   :  { %v4895_v1 = vmul.f32 %v8949_v59, %v4891_v0  ;;  %v4889_v2 = vpop.permute.xlu1 %4888 }
0x1c87   :  { %v4894_v3 = vmul.f32 %v8949_v59, %v4889_v2  ;;  %8446 = vmatprep.subr.bf16.mxu0 %v8445_v62 }
0x1c88   :  { %8448 = vmatpush3.bf16.msra.mxu0 %v8445_v62 }
0x1c89   :  { %v8449_v7 = vpack.c.bf16 %v4895_v1, %v4894_v3  ;;  %v4903_v10 = vpop.permute.xlu0 %4902 }
0x1c8a   :  { %v4901_v11 = vpop.permute.xlu1 %4900  ;;  %v4909_v47 = vmul.f32 %v8951_v57, %v4903_v10 }
0x1c8b   :  { %8450 = vmatprep.subr.bf16.mxu0 %v8449_v7  ;;  %v4908_v19 = vmul.f32 %v8951_v57, %v4901_v11 }
0x1c8c   :  { %8452 = vmatpush3.bf16.msra.mxu0 %v8449_v7 }
0x1c8d   :  { %8454 = vmatprep.subr.bf16.mxu0 %v8453_v14  ;;  %v4907_v23 = vpop.permute.xlu0 %4906  ;;  %v8461_v28 = vpack.c.bf16 %v4909_v47, %v4908_v19 }
0x1c8e   :  { %v4905_v27 = vpop.permute.xlu1 %4904  ;;  %v4911_v18 = vmul.f32 %v8951_v57, %v4907_v23 }
0x1c8f   :  { %v4910_v26 = vmul.f32 %v8951_v57, %v4905_v27 }
0x1c90   :  { %8456 = vmatpush3.bf16.msra.mxu0 %v8453_v14 }
0x1c91   :  { %8458 = vmatprep.subr.bf16.mxu0 %v8457_v22  ;;  %v8465_v31 = vpack.c.bf16 %v4911_v18, %v4910_v26 }
0x1c94   :  { %8460 = vmatpush3.bf16.msra.mxu0 %v8457_v22 }
0x1c95   :  { %8462 = vmatprep.subr.bf16.mxu0 %v8461_v28 }
0x1c98   :  { %8464 = vmatpush3.bf16.msra.mxu0 %v8461_v28 }
0x1c99   :  { %8466 = vmatprep.subr.bf16.mxu0 %v8465_v31 }
0x1c9c   :  { %8468 = vmatpush3.bf16.msra.mxu0 %v8465_v31 }
0x1c9e   :  { %v4958_v43 = vpop.permute.xlu0 %4957 }
0x1c9f   :  { %7985 = vmatmul.mubr.msk.f32.vlgmr.msra.gmra.mrb[74].mxu0 %vm287_vm2, %v6809_v16  ;;  %v4953_v46 = vpop.permute.xlu1 %4952 }
0x1ca0   :  { %7987 = vmatprep.mubr.msk.f32.mxu0 %vm287_vm2, %v6810_v21 }
0x1ca2   :  { %v4968_v49 = vpop.permute.xlu0 %4967 }
0x1ca3   :  { %7988 = vmatmul.mubr.msk.f32.gmra.mrb[76].mxu0 %vm287_vm2, %v6811_v24  ;;  %v4963_v51 = vpop.permute.xlu1 %4962 }
0x1ca4   :  { %7990 = vmatprep.mubr.msk.f32.mxu0 %vm287_vm2, %v6812_v36  ;;  %v6837_v36 = vld [vmem:[%s11038_s7 + $0x248] sm:$0xff] }
0x1ca6   :  { %v4938_v60 = vpop.permute.xlu0 %4937 }
0x1ca7   :  { %7991 = vmatmul.mubr.msk.f32.gmra.mrb[78].mxu0 %vm287_vm2, %v6813_v9  ;;  %v4933_v41 = vpop.permute.xlu1 %4932  ;;  %v6838_v9 = vld [vmem:[%s11038_s7 + $0x250] sm:$0xff] }
0x1ca8   :  { %7993 = vmatprep.mubr.msk.f32.mxu0 %vm287_vm2, %v6814_v37  ;;  %v6839_v37 = vld [vmem:[%s11038_s7 + $0x258] sm:$0xff] }
0x1caa   :  { %v4948_v1 = vpop.permute.xlu0 %4947 }
0x1cab   :  { %7994 = vmatmul.mubr.msk.f32.gmra.mrb[80].mxu0 %vm287_vm2, %v6815_v13  ;;  %v4943_v3 = vpop.permute.xlu1 %4942 }
0x1cae   :  { %v5157_v13 = vpop.permute.xlu0 %5156 }
0x1caf   :  { %v5152_v40 = vpop.permute.xlu1 %5151 }
0x1d72   :  { %v7986_v29 = vpop.f32.mrb[74].mxu0 }
0x1d73   :  { %v5060_v63 = vpop.f32.mrb[75].mxu0  ;;  %v5066_v61 = vadd.f32 %v7986_v29, %v4938_v60  ;;  %v6872_v60 = vld [vmem:[%s11034_s6 + $0x2a0] sm:$0xff] }
0x1d74   :  { %v5061_v62 = vadd.f32 %v5060_v63, %v4933_v41  ;;  %v6875_v41 = vld [vmem:[%s11034_s6 + $0x2b8] sm:$0xff] }
0x1d76   :  { %v7989_v42 = vpop.f32.mrb[76].mxu0 }
0x1d77   :  { %v5070_v35 = vpop.f32.mrb[77].mxu0  ;;  %v5076_v4 = vadd.f32 %v7989_v42, %v4948_v1  ;;  %v6871_v1 = vld [vmem:[%s11034_s6 + $0x298] sm:$0xff] }
0x1d78   :  { %v5071_v6 = vadd.f32 %v5070_v35, %v4943_v3  ;;  %v6897_v3 = vld [vmem:[%s11036_s8 + $0x288] sm:$0xff] }
0x1d7a   :  { %v7992_v30 = vpop.f32.mrb[78].mxu0 }
0x1d7b   :  { %v5086_v38 = vadd.f32 %v7992_v30, %v4958_v43  ;;  %v5080_v39 = vpop.f32.mrb[79].mxu0 }
0x1d7c   :  { %v5081_v48 = vadd.f32 %v5080_v39, %v4953_v46  ;;  %v5167_v46 = vpop.permute.xlu0 %5166  ;;  %v5162_v39 = vpop.permute.xlu1 %5161 }
0x1d7d   :  { %v6833_v50 = vmul.f32 -1.442695, %v5086_v38 }
0x1d7e   :  { %v6832_v52 = vmul.f32 -1.442695, %v5081_v48  ;;  %v7995_v54 = vpop.f32.mrb[80].mxu0 }
0x1d7f   :  { %8855 = vpow2.f32 %v6833_v50  ;;  %v5096_v55 = vadd.f32 %v7995_v54, %v4968_v49  ;;  %v5090_v8 = vpop.f32.mrb[81].mxu0 }
0x1d80   :  { %8857 = vpow2.f32 %v6832_v52  ;;  %v5091_v56 = vadd.f32 %v5090_v8, %v4963_v51  ;;  %v6842_v8 = vld [vmem:[%s11038_s7 + $0x270] sm:$0xff] }
0x1d81   :  { %v6835_v58 = vmul.f32 -1.442695, %v5096_v55 }
0x1d82   :  { %v6834_v59 = vmul.f32 -1.442695, %v5091_v56  ;;  %v6843_v56 = vld [vmem:[%s11038_s7 + $0x278] sm:$0xff] }
0x1d83   :  { %8859 = vpow2.f32 %v6835_v58  ;;  %v6873_v58 = vld [vmem:[%s11034_s6 + $0x2a8] sm:$0xff] }
0x1d84   :  { %8861 = vpow2.f32 %v6834_v59  ;;  %v6860_v59 = vld [vmem:[%s11035_s5 + $0x280] sm:$0xff] }
0x1d85   :  { %8863 = vtanh.f32 %v5066_v61  ;;  %v6874_v61 = vld [vmem:[%s11034_s6 + $0x2b0] sm:$0xff] }
0x1d86   :  { %8865 = vtanh.f32 %v5061_v62  ;;  %v6869_v62 = vld [vmem:[%s11034_s6 + $0x288] sm:$0xff] }
0x1d89   :  { %v8856_v0 = vpop.eup %8855 }
0x1d8a   :  { %v8858_v2 = vpop.eup %8857  ;;  %v5116_v5 = vadd.f32 1.0, %v8856_v0  ;;  %v6868_v0 = vld [vmem:[%s11034_s6 + $0x280] sm:$0xff] }
0x1d8b   :  { %v5115_v7 = vadd.f32 1.0, %v8858_v2  ;;  %v6870_v2 = vld [vmem:[%s11034_s6 + $0x290] sm:$0xff] }
0x1d8c   :  { %8867 = vrcp.f32 %v5116_v5  ;;  %v6899_v5 = vld [vmem:[%s11036_s8 + $0x298] sm:$0xff] }
0x1d8d   :  { %v8860_v10 = vpop.eup %8859  ;;  %8869 = vrcp.f32 %v5115_v7 }
0x1d8e   :  { %v8862_v11 = vpop.eup %8861  ;;  %8871 = vtanh.f32 %v5076_v4  ;;  %v5118_v14 = vadd.f32 1.0, %v8860_v10  ;;  %v6896_v4 = vld [vmem:[%s11036_s8 + $0x280] sm:$0xff] }
0x1d8f   :  { %8873 = vtanh.f32 %v5071_v6  ;;  %v5117_v15 = vadd.f32 1.0, %v8862_v11  ;;  %v8864_v44 = vpop.eup %8863  ;;  %v6898_v6 = vld [vmem:[%s11036_s8 + $0x290] sm:$0xff]  ;;  %v8952_v10 = vld [vmem:[%s11037_s2 + $0x3] ss:$0 sm:$0xff] }
0x1d90   :  { %8875 = vrcp.f32 %v5118_v14  ;;  %v8866_v57 = vpop.eup %8865 }
0x1d91   :  { %8877 = vrcp.f32 %v5117_v15 }
0x1d96   :  { %v8868_v47 = vpop.eup %8867 }
0x1d97   :  { %v8870_v19 = vpop.eup %8869  ;;  %v5128_v22 = vmul.f32 %v8868_v47, %v8864_v44 }
0x1d98   :  { %v8872_v23 = vpop.eup %8871  ;;  %v5127_v27 = vmul.f32 %v8870_v19, %v8866_v57 }
0x1d99   :  { %v8874_v28 = vpop.eup %8873 }
0x1d9a   :  { %v8876_v18 = vpop.eup %8875  ;;  %v8469_v26 = vpack.c.bf16 %v5128_v22, %v5127_v27 }
0x1d9b   :  { %v8878_v31 = vpop.eup %8877  ;;  %v5130_v16 = vmul.f32 %v8876_v18, %v8872_v23  ;;  %v8953_v23 = vld [vmem:[%s11037_s2 + $0x4] ss:$0 sm:$0xff] }
0x1d9c   :  { %8470 = vmatprep.subr.bf16.mxu1 %v8469_v26  ;;  %v5129_v21 = vmul.f32 %v8878_v31, %v8874_v28 }
0x1d9d   :  { %8472 = vmatpush3.bf16.msra.mxu1 %v8469_v26 }
0x1d9e   :  { %v8473_v24 = vpack.c.bf16 %v5130_v16, %v5129_v21 }
0x1da0   :  { %8474 = vmatprep.subr.bf16.mxu1 %v8473_v24 }
0x1da1   :  { %8476 = vmatpush3.bf16.msra.mxu1 %v8473_v24 }
0x1da4   :  { %8005 = vmatmul.mubr.msk.f32.vlgmr.msra.gmra.mrb[68].mxu1 %vm505_vm3, %v6837_v36  ;;  %v8954_v36 = vld [vmem:[%s11037_s2 + $0x5] ss:$0 sm:$0xff] }
0x1da5   :  { %8007 = vmatprep.mubr.msk.f32.mxu1 %vm505_vm3, %v6838_v9 }
0x1da8   :  { %8008 = vmatmul.mubr.msk.f32.gmra.mrb[70].mxu1 %vm505_vm3, %v6839_v37 }
0x1e77   :  { %v8006_v29 = vpop.f32.mrb[68].mxu1 }
0x1e78   :  { %v5285_v63 = vadd.f32 %v8006_v29, %v5157_v13  ;;  %v5279_v42 = vpop.f32.mrb[69].mxu1 }
0x1e79   :  { %v5280_v43 = vadd.f32 %v5279_v42, %v5152_v40 }
0x1e7a   :  { %v5319_v35 = vadd.f32 %v5285_v63, %v10568_v20 }
0x1e7b   :  { %v5318_v30 = vadd.f32 %v5280_v43, %v10571_v12  ;;  %v8009_v38 = vpop.f32.mrb[70].mxu1 }
0x1e7c   :  { %v10695_v48 = vmul.f32 %v10531_v32, %v5319_v35  ;;  %v5295_v49 = vadd.f32 %v8009_v38, %v5167_v46  ;;  %v5289_v50 = vpop.f32.mrb[71].mxu1  ;;  %v6861_v46 = vld [vmem:[%s11035_s5 + $0x288] sm:$0xff]  ;;  %v6863_v38 = vld [vmem:[%s11035_s5 + $0x298] sm:$0xff] }
0x1e7d   :  { %v10698_v51 = vmul.f32 %v10531_v32, %v5318_v30  ;;  %v5290_v52 = vadd.f32 %v5289_v50, %v5162_v39  ;;  %v6862_v30 = vld [vmem:[%s11035_s5 + $0x290] sm:$0xff]  ;;  %v6864_v39 = vld [vmem:[%s11035_s5 + $0x2a0] sm:$0xff] }
0x1e7e   :  { %v5321_v54 = vadd.f32 %v5295_v49, %v10578_v17  ;;  %5332 = vrot.lane.b32.xlu0 %v10695_v48, %s8960_s18  ;;  %v6840_v17 = vld [vmem:[%s11038_s7 + $0x260] sm:$0xff]  ;;  %v5343_v28 = vmul.f32 %v8953_v23, %v10695_v48  ;;  %v6865_v49 = vld [vmem:[%s11035_s5 + $0x2a8] sm:$0xff]  ;;  %v6866_v50 = vld [vmem:[%s11035_s5 + $0x2b0] sm:$0xff] }
0x1e7f   :  { %v5320_v20 = vadd.f32 %v5290_v52, %v10581_v45  ;;  %5330 = vrot.lane.b32.xlu1 %v10698_v51, %s8960_s18  ;;  %v6841_v45 = vld [vmem:[%s11038_s7 + $0x268] sm:$0xff]  ;;  %8010 = vmatprep.mubr.msk.f32.mxu1 %vm505_vm3, %v6840_v17  ;;  %v5342_v27 = vmul.f32 %v8953_v23, %v10698_v51  ;;  %v6867_v52 = vld [vmem:[%s11035_s5 + $0x2b8] sm:$0xff] }
0x1e80   :  { %v10707_v12 = vmul.f32 %v10531_v32, %v5321_v54  ;;  %8011 = vmatmul.mubr.msk.f32.gmra.mrb[72].mxu1 %vm505_vm3, %v6841_v45  ;;  %v6888_v54 = vld [vmem:[%s11038_s7 + $0x280] sm:$0xff] }
0x1e81   :  { %v10710_v55 = vmul.f32 %v10531_v32, %v5320_v20  ;;  %8013 = vmatprep.mubr.msk.f32.mxu1 %vm505_vm3, %v6842_v8  ;;  %v8485_v16 = vpack.c.bf16 %v5343_v28, %v5342_v27 }
0x1e82   :  { %5336 = vrot.lane.b32.xlu0 %v10707_v12, %s8960_s18  ;;  %v5345_v24 = vmul.f32 %v8953_v23, %v10707_v12 }
0x1e83   :  { %5334 = vrot.lane.b32.xlu1 %v10710_v55, %s8960_s18  ;;  %v5344_v21 = vmul.f32 %v8953_v23, %v10710_v55 }
0x1e84   :  { %8014 = vmatmul.mubr.msk.f32.gmra.mrb[74].mxu1 %vm505_vm3, %v6843_v56 }
0x1e85   :  { %8040 = vmatprep.mubr.msk.f32.mxu1 %vm287_vm2, %v6860_v59  ;;  %v8489_v13 = vpack.c.bf16 %v5345_v24, %v5344_v21 }
0x1e86   :  { %5348 = vrot.lane.b32.xlu0 %v10695_v48, %s8961_s19 }
0x1e87   :  { %5346 = vrot.lane.b32.xlu1 %v10698_v51, %s8961_s19 }
0x1e8a   :  { %5352 = vrot.lane.b32.xlu0 %v10707_v12, %s8961_s19 }
0x1e8b   :  { %5350 = vrot.lane.b32.xlu1 %v10710_v55, %s8961_s19 }
0x1e8e   :  { %5403 = vperm.xlu0 %8637, %v6873_v58  }
0x1e8f   :  { %5398 = vperm.xlu1 %8638, %v6872_v60  }
0x1e92   :  { %5413 = vperm.xlu0 %8637, %v6875_v41  }
0x1e93   :  { %5408 = vperm.xlu1 %8638, %v6874_v61  }
0x1e96   :  { %5383 = vperm.xlu0 %8637, %v6869_v62  }
0x1e97   :  { %5378 = vperm.xlu1 %8638, %v6868_v0  }
0x1e9a   :  { %5393 = vperm.xlu0 %8637, %v6871_v1  }
0x1e9b   :  { %5388 = vperm.xlu1 %8638, %v6870_v2  }
0x1e9e   :  { %5602 = vperm.xlu0 %8637, %v6897_v3  }
0x1e9f   :  { %5597 = vperm.xlu1 %8638, %v6896_v4  }
0x1ea2   :  { %5612 = vperm.xlu0 %8637, %v6899_v5  }
0x1ea3   :  { %5607 = vperm.xlu1 %8638, %v6898_v6  }
0x1ef0   :  { %v5333_v7 = vpop.permute.xlu0 %5332 }
0x1ef1   :  { %v5339_v11 = vmul.f32 %v8952_v10, %v5333_v7  ;;  %v5331_v14 = vpop.permute.xlu1 %5330 }
0x1ef2   :  { %v5338_v15 = vmul.f32 %v8952_v10, %v5331_v14 }
0x1ef4   :  { %v8477_v44 = vpack.c.bf16 %v5339_v11, %v5338_v15  ;;  %v5337_v57 = vpop.permute.xlu0 %5336 }
0x1ef5   :  { %v5341_v47 = vmul.f32 %v8952_v10, %v5337_v57  ;;  %v5335_v19 = vpop.permute.xlu1 %5334 }
0x1ef6   :  { %v5340_v22 = vmul.f32 %v8952_v10, %v5335_v19  ;;  %8478 = vmatprep.subr.bf16.mxu1 %v8477_v44 }
0x1ef7   :  { %8480 = vmatpush3.bf16.msra.mxu1 %v8477_v44 }
0x1ef8   :  { %v8481_v18 = vpack.c.bf16 %v5341_v47, %v5340_v22  ;;  %v5349_v26 = vpop.permute.xlu0 %5348 }
0x1ef9   :  { %v5347_v31 = vpop.permute.xlu1 %5346  ;;  %v5355_v9 = vmul.f32 %v8954_v36, %v5349_v26 }
0x1efa   :  { %8482 = vmatprep.subr.bf16.mxu1 %v8481_v18  ;;  %v5354_v37 = vmul.f32 %v8954_v36, %v5347_v31 }
0x1efb   :  { %8484 = vmatpush3.bf16.msra.mxu1 %v8481_v18 }
0x1efc   :  { %8486 = vmatprep.subr.bf16.mxu1 %v8485_v16  ;;  %v5353_v40 = vpop.permute.xlu0 %5352  ;;  %v8493_v63 = vpack.c.bf16 %v5355_v9, %v5354_v37 }
0x1efd   :  { %v5351_v29 = vpop.permute.xlu1 %5350  ;;  %v5357_v42 = vmul.f32 %v8954_v36, %v5353_v40 }
0x1efe   :  { %v5356_v43 = vmul.f32 %v8954_v36, %v5351_v29 }
0x1eff   :  { %8488 = vmatpush3.bf16.msra.mxu1 %v8485_v16 }
0x1f00   :  { %8490 = vmatprep.subr.bf16.mxu1 %v8489_v13  ;;  %v8497_v35 = vpack.c.bf16 %v5357_v42, %v5356_v43 }
0x1f03   :  { %8492 = vmatpush3.bf16.msra.mxu1 %v8489_v13 }
0x1f04   :  { %8494 = vmatprep.subr.bf16.mxu1 %v8493_v63 }
0x1f07   :  { %8496 = vmatpush3.bf16.msra.mxu1 %v8493_v63 }
0x1f08   :  { %8498 = vmatprep.subr.bf16.mxu1 %v8497_v35 }
0x1f0b   :  { %8500 = vmatpush3.bf16.msra.mxu1 %v8497_v35 }
0x1f0d   :  { %v5404_v8 = vpop.permute.xlu0 %5403 }
0x1f0e   :  { %8041 = vmatmul.mubr.msk.f32.vlgmr.msra.gmra.mrb[76].mxu1 %vm287_vm2, %v6861_v46  ;;  %v5399_v58 = vpop.permute.xlu1 %5398 }
0x1f0f   :  { %8043 = vmatprep.mubr.msk.f32.mxu1 %vm287_vm2, %v6862_v30 }
0x1f11   :  { %v5414_v62 = vpop.permute.xlu0 %5413 }
0x1f12   :  { %8044 = vmatmul.mubr.msk.f32.gmra.mrb[78].mxu1 %vm287_vm2, %v6863_v38  ;;  %v5409_v1 = vpop.permute.xlu1 %5408 }
0x1f13   :  { %8046 = vmatprep.mubr.msk.f32.mxu1 %vm287_vm2, %v6864_v39  ;;  %v6889_v39 = vld [vmem:[%s11038_s7 + $0x288] sm:$0xff] }
0x1f15   :  { %v5384_v11 = vpop.permute.xlu0 %5383 }
0x1f16   :  { %8047 = vmatmul.mubr.msk.f32.gmra.mrb[80].mxu1 %vm287_vm2, %v6865_v49  ;;  %v5379_v14 = vpop.permute.xlu1 %5378  ;;  %v6890_v49 = vld [vmem:[%s11038_s7 + $0x290] sm:$0xff] }
0x1f17   :  { %8049 = vmatprep.mubr.msk.f32.mxu1 %vm287_vm2, %v6866_v50  ;;  %v6891_v50 = vld [vmem:[%s11038_s7 + $0x298] sm:$0xff] }
0x1f19   :  { %v5394_v47 = vpop.permute.xlu0 %5393 }
0x1f1a   :  { %8050 = vmatmul.mubr.msk.f32.gmra.mrb[82].mxu1 %vm287_vm2, %v6867_v52  ;;  %v5389_v22 = vpop.permute.xlu1 %5388 }
0x1f1b   :  { %8060 = vmatprep.mubr.msk.f32.mxu1 %vm505_vm3, %v6888_v54 }
0x1f1d   :  { %v5603_v52 = vpop.permute.xlu0 %5602 }
0x1f1e   :  { %v5598_v54 = vpop.permute.xlu1 %5597 }
0x1fe1   :  { %v8042_v20 = vpop.f32.mrb[76].mxu1 }
0x1fe2   :  { %v5506_v17 = vpop.f32.mrb[77].mxu1  ;;  %v5512_v15 = vadd.f32 %v8042_v20, %v5384_v11 }
0x1fe3   :  { %v5507_v44 = vadd.f32 %v5506_v17, %v5379_v14 }
0x1fe5   :  { %v8045_v45 = vpop.f32.mrb[78].mxu1 }
0x1fe6   :  { %v5516_v56 = vpop.f32.mrb[79].mxu1  ;;  %v5522_v23 = vadd.f32 %v8045_v45, %v5394_v47  ;;  %v6921_v47 = vld [vmem:[%s11034_s6 + $0x2c8] sm:$0xff] }
0x1fe7   :  { %v5517_v28 = vadd.f32 %v5516_v56, %v5389_v22  ;;  %v6923_v22 = vld [vmem:[%s11034_s6 + $0x2d8] sm:$0xff] }
0x1fe9   :  { %v8048_v59 = vpop.f32.mrb[80].mxu1 }
0x1fea   :  { %v5532_v60 = vadd.f32 %v8048_v59, %v5404_v8  ;;  %v5526_v41 = vpop.f32.mrb[81].mxu1 }
0x1feb   :  { %v5527_v61 = vadd.f32 %v5526_v41, %v5399_v58  ;;  %v5613_v58 = vpop.permute.xlu0 %5612  ;;  %v5608_v41 = vpop.permute.xlu1 %5607 }
0x1fec   :  { %v6885_v0 = vmul.f32 -1.442695, %v5532_v60 }
0x1fed   :  { %v6884_v2 = vmul.f32 -1.442695, %v5527_v61  ;;  %v8051_v3 = vpop.f32.mrb[82].mxu1 }
0x1fee   :  { %8879 = vpow2.f32 %v6885_v0  ;;  %v5542_v4 = vadd.f32 %v8051_v3, %v5414_v62  ;;  %v5536_v5 = vpop.f32.mrb[83].mxu1 }
0x1fef   :  { %8881 = vpow2.f32 %v6884_v2  ;;  %v5537_v6 = vadd.f32 %v5536_v5, %v5409_v1 }
0x1ff0   :  { %v6887_v7 = vmul.f32 -1.442695, %v5542_v4 }
0x1ff1   :  { %v6886_v10 = vmul.f32 -1.442695, %v5537_v6 }
0x1ff2   :  { %8883 = vpow2.f32 %v6887_v7 }
0x1ff3   :  { %8885 = vpow2.f32 %v6886_v10 }
0x1ff4   :  { %8887 = vtanh.f32 %v5512_v15  ;;  %v6924_v15 = vld [vmem:[%s11034_s6 + $0x2e0] sm:$0xff] }
0x1ff5   :  { %8889 = vtanh.f32 %v5507_v44  ;;  %v6927_v44 = vld [vmem:[%s11034_s6 + $0x2f8] sm:$0xff] }
0x1ff8   :  { %v8880_v57 = vpop.eup %8879 }
0x1ff9   :  { %v8882_v19 = vpop.eup %8881  ;;  %v5562_v27 = vadd.f32 1.0, %v8880_v57  ;;  %v6926_v57 = vld [vmem:[%s11034_s6 + $0x2f0] sm:$0xff] }
0x1ffa   :  { %v5561_v18 = vadd.f32 1.0, %v8882_v19  ;;  %v6920_v19 = vld [vmem:[%s11034_s6 + $0x2c0] sm:$0xff] }
0x1ffb   :  { %8891 = vrcp.f32 %v5562_v27  ;;  %v6849_v27 = vld [vmem:[%s11036_s8 + $0x268] sm:$0xff] }
0x1ffc   :  { %v8884_v26 = vpop.eup %8883  ;;  %8893 = vrcp.f32 %v5561_v18  ;;  %v6901_v18 = vld [vmem:[%s11036_s8 + $0x2a8] sm:$0xff] }
0x1ffd   :  { %v8886_v31 = vpop.eup %8885  ;;  %8895 = vtanh.f32 %v5522_v23  ;;  %v5564_v16 = vadd.f32 1.0, %v8884_v26  ;;  %v6922_v23 = vld [vmem:[%s11034_s6 + $0x2d0] sm:$0xff]  ;;  %v6900_v26 = vld [vmem:[%s11036_s8 + $0x2a0] sm:$0xff] }
0x1ffe   :  { %8897 = vtanh.f32 %v5517_v28  ;;  %v5563_v21 = vadd.f32 1.0, %v8886_v31  ;;  %v8888_v24 = vpop.eup %8887  ;;  %v6848_v28 = vld [vmem:[%s11036_s8 + $0x260] sm:$0xff]  ;;  %v6953_v31 = vld [vmem:[%s11036_s8 + $0x2e8] sm:$0xff] }
0x1fff   :  { %8899 = vrcp.f32 %v5564_v16  ;;  %v8890_v36 = vpop.eup %8889  ;;  %v6952_v16 = vld [vmem:[%s11036_s8 + $0x2e0] sm:$0xff] }
0x2000   :  { %8901 = vrcp.f32 %v5563_v21  ;;  %v6851_v21 = vld [vmem:[%s11036_s8 + $0x278] sm:$0xff] }
0x2005   :  { %v8892_v9 = vpop.eup %8891 }
0x2006   :  { %v8894_v37 = vpop.eup %8893  ;;  %v5574_v13 = vmul.f32 %v8892_v9, %v8888_v24  ;;  %v6850_v24 = vld [vmem:[%s11036_s8 + $0x270] sm:$0xff] }
0x2007   :  { %v8896_v40 = vpop.eup %8895  ;;  %v5573_v29 = vmul.f32 %v8894_v37, %v8890_v36  ;;  %v6903_v36 = vld [vmem:[%s11036_s8 + $0x2b8] sm:$0xff]  ;;  %v6902_v9 = vld [vmem:[%s11036_s8 + $0x2b0] sm:$0xff] }
0x2008   :  { %v8898_v63 = vpop.eup %8897  ;;  %v6955_v37 = vld [vmem:[%s11036_s8 + $0x2f8] sm:$0xff] }
0x2009   :  { %v8900_v42 = vpop.eup %8899  ;;  %v8501_v43 = vpack.c.bf16 %v5574_v13, %v5573_v29  ;;  %v6954_v13 = vld [vmem:[%s11036_s8 + $0x2f0] sm:$0xff] }
0x200a   :  { %v8902_v35 = vpop.eup %8901  ;;  %v5576_v46 = vmul.f32 %v8900_v42, %v8896_v40  ;;  %v6965_v40 = vld [vmem:[%s11039_s10 + $0x6] sm:$0x3] }
0x200b   :  { %8502 = vmatprep.subr.bf16.mxu1 %v8501_v43  ;;  %v5575_v30 = vmul.f32 %v8902_v35, %v8898_v63  ;;  %v8956_v63 = vld [vmem:[%s11037_s2 + $0x6] ss:$0 sm:$0xff] }
0x200c   :  { %8504 = vmatpush3.bf16.msra.mxu1 %v8501_v43 }
0x200d   :  { %v8505_v38 = vpack.c.bf16 %v5576_v46, %v5575_v30 }
0x200f   :  { %8506 = vmatprep.subr.bf16.mxu1 %v8505_v38 }
0x2010   :  { %8508 = vmatpush3.bf16.msra.mxu1 %v8505_v38 }
0x2013   :  { %8061 = vmatmul.mubr.msk.f32.vlgmr.msra.gmra.mrb[84].mxu1 %vm505_vm3, %v6889_v39 }
0x2014   :  { %8063 = vmatprep.mubr.msk.f32.mxu1 %vm505_vm3, %v6890_v49 }
0x2017   :  { %8064 = vmatmul.mubr.msk.f32.gmra.mrb[86].mxu1 %vm505_vm3, %v6891_v50 }
0x20e6   :  { %v8062_v20 = vpop.f32.mrb[84].mxu1 }
0x20e7   :  { %v5731_v17 = vadd.f32 %v8062_v20, %v5603_v52  ;;  %v5725_v45 = vpop.f32.mrb[85].mxu1  ;;  %v8957_v20 = vld [vmem:[%s11037_s2 + $0x8] ss:$0 sm:$0xff] }
0x20e8   :  { %v5726_v8 = vadd.f32 %v5725_v45, %v5598_v54 }
0x20e9   :  { %v5765_v56 = vadd.f32 %v5731_v17, %v10695_v48  ;;  %v8955_v48 = vld [vmem:[%s11037_s2 + $0x7] ss:$0 sm:$0xff] }
0x20ea   :  { %v5764_v59 = vadd.f32 %v5726_v8, %v10698_v51  ;;  %v8065_v60 = vpop.f32.mrb[86].mxu1 }
0x20eb   :  { %v5769_v61 = vmul.f32 %v10531_v32, %v5765_v56  ;;  %v5741_v62 = vadd.f32 %v8065_v60, %v5613_v58  ;;  %v5735_v0 = vpop.f32.mrb[87].mxu1 }
0x20ec   :  { %v5768_v1 = vmul.f32 %v10531_v32, %v5764_v59  ;;  %v5736_v2 = vadd.f32 %v5735_v0, %v5608_v41  ;;  %v6915_v0 = vld [vmem:[%s11035_s5 + $0x2d8] sm:$0xff] }
0x20ed   :  { %v5767_v3 = vadd.f32 %v5741_v62, %v10707_v12  ;;  %5778 = vrot.lane.b32.xlu0 %v5769_v61, %s8960_s18  ;;  %v5789_v4 = vmul.f32 %v8955_v48, %v5769_v61  ;;  %v6914_v62 = vld [vmem:[%s11035_s5 + $0x2d0] sm:$0xff] }
0x20ee   :  { %v5766_v51 = vadd.f32 %v5736_v2, %v10710_v55  ;;  %5776 = vrot.lane.b32.xlu1 %v5768_v1, %s8960_s18  ;;  %v5788_v5 = vmul.f32 %v8955_v48, %v5768_v1  ;;  %v6912_v55 = vld [vmem:[%s11035_s5 + $0x2c0] sm:$0xff]  ;;  %v6917_v2 = vld [vmem:[%s11035_s5 + $0x2e8] sm:$0xff] }
0x20ef   :  { %v5771_v6 = vmul.f32 %v10531_v32, %v5767_v3  ;;  %8096 = vmatprep.mubr.msk.f32.mxu0 %vm287_vm2, %v6912_v55  ;;  %v6918_v3 = vld [vmem:[%s11035_s5 + $0x2f0] sm:$0xff] }
0x20f0   :  { %v5770_v7 = vmul.f32 %v10531_v32, %v5766_v51  ;;  %v10850_v10 = vpack.c.bf16 %v5789_v4, %v5788_v5  ;;  %v6925_v32 = vld [vmem:[%s11034_s6 + $0x2e8] sm:$0xff]  ;;  %v6892_v4 = vld [vmem:[%s11038_s7 + $0x2a0] sm:$0xff]  ;;  %v6894_v5 = vld [vmem:[%s11038_s7 + $0x2b0] sm:$0xff] }
0x20f1   :  { %5782 = vrot.lane.b32.xlu0 %v5771_v6, %s8960_s18  ;;  %v5791_v12 = vmul.f32 %v8955_v48, %v5771_v6  ;;  %v6893_v51 = vld [vmem:[%s11038_s7 + $0x2a8] sm:$0xff]  ;;  %8066 = vmatprep.mubr.msk.f32.mxu1 %vm505_vm3, %v6892_v4  ;;  %v6942_v4 = vld [vmem:[%s11038_s7 + $0x2d0] sm:$0xff] }
0x20f2   :  { %5780 = vrot.lane.b32.xlu1 %v5770_v7, %s8960_s18  ;;  %v5790_v11 = vmul.f32 %v8955_v48, %v5770_v7  ;;  %v6919_v48 = vld [vmem:[%s11035_s5 + $0x2f8] sm:$0xff]  ;;  %8067 = vmatmul.mubr.msk.f32.gmra.mrb[72].mxu1 %vm505_vm3, %v6893_v51 }
0x20f3   :  { %8069 = vmatprep.mubr.msk.f32.mxu1 %vm505_vm3, %v6894_v5  ;;  %v6943_v51 = vld [vmem:[%s11038_s7 + $0x2d8] sm:$0xff] }
0x20f4   :  { %v10854_v14 = vpack.c.bf16 %v5791_v12, %v5790_v11 }
0x20f5   :  { %5794 = vrot.lane.b32.xlu0 %v5769_v61, %s8961_s19  ;;  %v6913_v61 = vld [vmem:[%s11035_s5 + $0x2c8] sm:$0xff] }
0x20f6   :  { %5792 = vrot.lane.b32.xlu1 %v5768_v1, %s8961_s19  ;;  %v6916_v1 = vld [vmem:[%s11035_s5 + $0x2e0] sm:$0xff] }
0x20f9   :  { %5798 = vrot.lane.b32.xlu0 %v5771_v6, %s8961_s19  ;;  %v6895_v6 = vld [vmem:[%s11038_s7 + $0x2b8] sm:$0xff] }
0x20fa   :  { %5796 = vrot.lane.b32.xlu1 %v5770_v7, %s8961_s19  ;;  %8070 = vmatmul.mubr.msk.f32.gmra.mrb[74].mxu1 %vm505_vm3, %v6895_v6  ;;  %v6944_v7 = vld [vmem:[%s11038_s7 + $0x2e0] sm:$0xff] }
0x20fb   :  { %8122 = vmatprep.mubr.msk.f32.mxu1 %vm505_vm3, %v6944_v7 }
0x20fd   :  { %5849 = vperm.xlu0 %8637, %v6925_v32  }
0x20fe   :  { %5844 = vperm.xlu1 %8638, %v6924_v15  }
0x2101   :  { %5859 = vperm.xlu0 %8637, %v6927_v44  }
0x2102   :  { %5854 = vperm.xlu1 %8638, %v6926_v57  }
0x2105   :  { %5829 = vperm.xlu0 %8637, %v6921_v47  }
0x2106   :  { %5824 = vperm.xlu1 %8638, %v6920_v19  }
0x2109   :  { %5839 = vperm.xlu0 %8637, %v6923_v22  }
0x210a   :  { %5834 = vperm.xlu1 %8638, %v6922_v23  }
0x210d   :  { %5176 = vperm.xlu0 %8637, %v6849_v27  }
0x210e   :  { %5171 = vperm.xlu1 %8638, %v6848_v28  }
0x2111   :  { %5622 = vperm.xlu0 %8637, %v6901_v18  }
0x2112   :  { %5617 = vperm.xlu1 %8638, %v6900_v26  }
0x2115   :  { %6064 = vperm.xlu0 %8637, %v6953_v31  }
0x2116   :  { %6059 = vperm.xlu1 %8638, %v6952_v16  }
0x2119   :  { %5186 = vperm.xlu0 %8637, %v6851_v21  }
0x211a   :  { %5181 = vperm.xlu1 %8638, %v6850_v24  }
0x211d   :  { %5632 = vperm.xlu0 %8637, %v6903_v36  }
0x211e   :  { %5627 = vperm.xlu1 %8638, %v6902_v9  }
0x2121   :  { %6074 = vperm.xlu0 %8637, %v6955_v37  }
0x2122   :  { %6069 = vperm.xlu1 %8638, %v6954_v13  }
0x2126   :  { %6216 = vperm.xlu1 %8638, %v6965_v40  }
0x215f   :  { %v5779_v29 = vpop.permute.xlu0 %5778 }
0x2160   :  { %v5785_v42 = vmul.f32 %v8956_v63, %v5779_v29  ;;  %v5777_v43 = vpop.permute.xlu1 %5776 }
0x2161   :  { %v5784_v35 = vmul.f32 %v8956_v63, %v5777_v43 }
0x2163   :  { %v8509_v46 = vpack.c.bf16 %v5785_v42, %v5784_v35  ;;  %v5783_v30 = vpop.permute.xlu0 %5782 }
0x2164   :  { %v5787_v38 = vmul.f32 %v8956_v63, %v5783_v30  ;;  %v5781_v39 = vpop.permute.xlu1 %5780 }
0x2165   :  { %v5786_v49 = vmul.f32 %v8956_v63, %v5781_v39  ;;  %8510 = vmatprep.subr.bf16.mxu0 %v8509_v46 }
0x2166   :  { %8512 = vmatpush3.bf16.msra.mxu0 %v8509_v46 }
0x2167   :  { %v8513_v50 = vpack.c.bf16 %v5787_v38, %v5786_v49  ;;  %v5795_v52 = vpop.permute.xlu0 %5794 }
0x2168   :  { %v5793_v54 = vpop.permute.xlu1 %5792  ;;  %v5801_v17 = vmul.f32 %v8957_v20, %v5795_v52 }
0x2169   :  { %8514 = vmatprep.subr.bf16.mxu0 %v8513_v50  ;;  %v5800_v45 = vmul.f32 %v8957_v20, %v5793_v54 }
0x216a   :  { %8516 = vmatpush3.bf16.msra.mxu0 %v8513_v50 }
0x216b   :  { %8518 = vmatprep.subr.bf16.mxu0 %v10850_v10  ;;  %v5799_v8 = vpop.permute.xlu0 %5798  ;;  %v8525_v58 = vpack.c.bf16 %v5801_v17, %v5800_v45 }
0x216c   :  { %v5797_v56 = vpop.permute.xlu1 %5796  ;;  %v5803_v59 = vmul.f32 %v8957_v20, %v5799_v8 }
0x216d   :  { %v5802_v60 = vmul.f32 %v8957_v20, %v5797_v56 }
0x216e   :  { %8520 = vmatpush3.bf16.msra.mxu0 %v10850_v10 }
0x216f   :  { %8522 = vmatprep.subr.bf16.mxu0 %v10854_v14  ;;  %v8529_v41 = vpack.c.bf16 %v5803_v59, %v5802_v60 }
0x2172   :  { %8524 = vmatpush3.bf16.msra.mxu0 %v10854_v14 }
0x2173   :  { %8526 = vmatprep.subr.bf16.mxu0 %v8525_v58 }
0x2176   :  { %8528 = vmatpush3.bf16.msra.mxu0 %v8525_v58 }
0x2177   :  { %8530 = vmatprep.subr.bf16.mxu0 %v8529_v41 }
0x217a   :  { %8532 = vmatpush3.bf16.msra.mxu0 %v8529_v41 }
0x217c   :  { %v5850_v14 = vpop.permute.xlu0 %5849 }
0x217d   :  { %8097 = vmatmul.mubr.msk.f32.vlgmr.msra.gmra.mrb[82].mxu0 %vm287_vm2, %v6913_v61  ;;  %v5845_v55 = vpop.permute.xlu1 %5844 }
0x217e   :  { %8099 = vmatprep.mubr.msk.f32.mxu0 %vm287_vm2, %v6914_v62 }
0x2180   :  { %v5860_v19 = vpop.permute.xlu0 %5859 }
0x2181   :  { %8100 = vmatmul.mubr.msk.f32.gmra.mrb[84].mxu0 %vm287_vm2, %v6915_v0  ;;  %v5855_v23 = vpop.permute.xlu1 %5854  ;;  %v6945_v0 = vld [vmem:[%s11038_s7 + $0x2e8] sm:$0xff] }
0x2182   :  { %8102 = vmatprep.mubr.msk.f32.mxu0 %vm287_vm2, %v6916_v1  ;;  %v6946_v1 = vld [vmem:[%s11038_s7 + $0x2f0] sm:$0xff] }
0x2184   :  { %v5830_v24 = vpop.permute.xlu0 %5829 }
0x2185   :  { %8103 = vmatmul.mubr.msk.f32.gmra.mrb[86].mxu0 %vm287_vm2, %v6917_v2  ;;  %v5825_v36 = vpop.permute.xlu1 %5824  ;;  %v6947_v2 = vld [vmem:[%s11038_s7 + $0x2f8] sm:$0xff] }
0x2186   :  { %8105 = vmatprep.mubr.msk.f32.mxu0 %vm287_vm2, %v6918_v3  ;;  %v6940_v3 = vld [vmem:[%s11038_s7 + $0x2c0] sm:$0xff] }
0x2188   :  { %v5840_v40 = vpop.permute.xlu0 %5839 }
0x2189   :  { %8106 = vmatmul.mubr.msk.f32.gmra.mrb[88].mxu0 %vm287_vm2, %v6919_v48  ;;  %v5835_v63 = vpop.permute.xlu1 %5834  ;;  %v6941_v48 = vld [vmem:[%s11038_s7 + $0x2c8] sm:$0xff] }
0x218a   :  { %8116 = vmatprep.mubr.msk.f32.mxu0 %vm505_vm3, %v6940_v3 }
0x218c   :  { %v5177_v5 = vpop.permute.xlu0 %5176 }
0x218d   :  { %v5172_v6 = vpop.permute.xlu1 %5171 }
0x2190   :  { %v5623_v7 = vpop.permute.xlu0 %5622 }
0x2250   :  { %v8098_v10 = vpop.f32.mrb[82].mxu0 }
0x2251   :  { %v5952_v12 = vpop.f32.mrb[83].mxu0  ;;  %v5958_v9 = vadd.f32 %v8098_v10, %v5830_v24  ;;  %v5618_v10 = vpop.permute.xlu1 %5617 }
0x2252   :  { %v5953_v37 = vadd.f32 %v5952_v12, %v5825_v36  ;;  %v6065_v12 = vpop.permute.xlu0 %6064 }
0x2254   :  { %v8101_v11 = vpop.f32.mrb[84].mxu0 }
0x2255   :  { %v5962_v32 = vpop.f32.mrb[85].mxu0  ;;  %v5968_v42 = vadd.f32 %v8101_v11, %v5840_v40  ;;  %v6060_v11 = vpop.permute.xlu1 %6059 }
0x2256   :  { %v5963_v35 = vadd.f32 %v5962_v32, %v5835_v63 }
0x2258   :  { %v8104_v15 = vpop.f32.mrb[86].mxu0 }
0x2259   :  { %v5978_v44 = vadd.f32 %v8104_v15, %v5850_v14  ;;  %v5972_v57 = vpop.f32.mrb[87].mxu0  ;;  %v5187_v14 = vpop.permute.xlu0 %5186 }
0x225a   :  { %v5973_v47 = vadd.f32 %v5972_v57, %v5845_v55  ;;  %v5182_v32 = vpop.permute.xlu1 %5181  ;;  %v8590_v57 = vadd.f32 %v5618_v10, %v5172_v6 }
0x225b   :  { %v6937_v22 = vmul.f32 -1.442695, %v5978_v44  ;;  %v8587_v44 = vadd.f32 %v5623_v7, %v5177_v5 }
0x225c   :  { %v6936_v27 = vmul.f32 -1.442695, %v5973_v47  ;;  %v8107_v28 = vpop.f32.mrb[88].mxu0 }
0x225d   :  { %8903 = vpow2.f32 %v6937_v22  ;;  %v5988_v18 = vadd.f32 %v8107_v28, %v5860_v19  ;;  %v5982_v26 = vpop.f32.mrb[89].mxu0  ;;  %v5633_v55 = vpop.permute.xlu0 %5632  ;;  %v8588_v47 = vadd.f32 %v8587_v44, %v6065_v12  ;;  %v8591_v19 = vadd.f32 %v8590_v57, %v6060_v11 }
0x225e   :  { %8905 = vpow2.f32 %v6936_v27  ;;  %v5983_v31 = vadd.f32 %v5982_v26, %v5855_v23  ;;  %v5628_v15 = vpop.permute.xlu1 %5627  ;;  %v8593_v27 = vadd.f32 %v5633_v55, %v5187_v14 }
0x225f   :  { %v6939_v16 = vmul.f32 -1.442695, %v5988_v18  ;;  %v8596_v26 = vadd.f32 %v5628_v15, %v5182_v32 }
0x2260   :  { %v6938_v21 = vmul.f32 -1.442695, %v5983_v31 }
0x2261   :  { %8907 = vpow2.f32 %v6939_v16  ;;  %v6075_v22 = vpop.permute.xlu0 %6074 }
0x2262   :  { %8909 = vpow2.f32 %v6938_v21  ;;  %v6070_v28 = vpop.permute.xlu1 %6069  ;;  %v8594_v16 = vadd.f32 %v8593_v27, %v6075_v22  ;;  %v8958_v21 = vld [vmem:[%s11033_s1] ss:$0 sm:$0xff] }
0x2263   :  { %8911 = vtanh.f32 %v5958_v9  ;;  %v8597_v36 = vadd.f32 %v8596_v26, %v6070_v28 }
0x2264   :  { %8913 = vtanh.f32 %v5953_v37 }
0x2267   :  { %v8904_v13 = vpop.eup %8903 }
0x2268   :  { %v8906_v29 = vpop.eup %8905  ;;  %v6008_v43 = vadd.f32 1.0, %v8904_v13 }
0x2269   :  { %v6007_v46 = vadd.f32 1.0, %v8906_v29 }
0x226a   :  { %8915 = vrcp.f32 %v6008_v43 }
0x226b   :  { %v8908_v30 = vpop.eup %8907  ;;  %8917 = vrcp.f32 %v6007_v46  ;;  %v6964_v46 = vld [vmem:[%s11040_s9 + $0x6] sm:$0x3] }
0x226c   :  { %v8910_v38 = vpop.eup %8909  ;;  %8919 = vtanh.f32 %v5968_v42  ;;  %v6010_v39 = vadd.f32 1.0, %v8908_v30 }
0x226d   :  { %8921 = vtanh.f32 %v5963_v35  ;;  %v6009_v49 = vadd.f32 1.0, %v8910_v38  ;;  %v8912_v50 = vpop.eup %8911 }
0x226e   :  { %8923 = vrcp.f32 %v6010_v39  ;;  %v8914_v52 = vpop.eup %8913 }
0x226f   :  { %8925 = vrcp.f32 %v6009_v49 }
0x2274   :  { %v8916_v54 = vpop.eup %8915 }
0x2275   :  { %v8918_v20 = vpop.eup %8917  ;;  %v6020_v17 = vmul.f32 %v8916_v54, %v8912_v50  ;;  %v6217_v50 = vpop.permute.xlu1 %6216 }
0x2276   :  { %v8920_v45 = vpop.eup %8919  ;;  %v6019_v8 = vmul.f32 %v8918_v20, %v8914_v52 }
0x2277   :  { %v8922_v56 = vpop.eup %8921 }
0x2278   :  { %v8924_v58 = vpop.eup %8923  ;;  %v8533_v59 = vpack.c.bf16 %v6020_v17, %v6019_v8 }
0x2279   :  { %v8926_v60 = vpop.eup %8925  ;;  %v6022_v41 = vmul.f32 %v8924_v58, %v8920_v45  ;;  %v6293_v45 = vmul.f32 %v8958_v21, %v10049_v53 }
0x227a   :  { %8534 = vmatprep.subr.bf16.mxu0 %v8533_v59  ;;  %8547 = vmatprep.subr.bf16.mxu1 %v8533_v59  ;;  %v6021_v61 = vmul.f32 %v8926_v60, %v8922_v56 }
0x227b   :  { %8536 = vmatpush3.bf16.msra.mxu0 %v8533_v59  ;;  %8549 = vmatpush3.bf16.msra.mxu1 %v8533_v59 }
0x227c   :  { %v8537_v62 = vpack.c.bf16 %v6022_v41, %v6021_v61 }
0x227e   :  { %8538 = vmatprep.subr.bf16.mxu0 %v8537_v62  ;;  %8548 = vmatprep.subr.bf16.mxu1 %v8537_v62 }
0x227f   :  { %8540 = vmatpush3.bf16.msra.mxu0 %v8537_v62  ;;  %8550 = vmatpush3.bf16.msra.mxu1 %v8537_v62 }
0x2280   :  { %8541 = vmatprep.subr.bf16.mxu0 %v8962_v33 }
0x2282   :  { %8123 = vmatmul.mubr.msk.f32.vlgmr.msra.gmra.mrb[72].mxu1 %vm505_vm3, %v6945_v0  ;;  %8117 = vmatmul.mubr.msk.f32.vlgmr.msra.gmra.mrb[90].mxu0 %vm505_vm3, %v6941_v48 }
0x2283   :  { %8125 = vmatprep.mubr.msk.f32.mxu1 %vm505_vm3, %v6946_v1  ;;  %8119 = vmatprep.mubr.msk.f32.mxu0 %vm505_vm3, %v6942_v4 }
0x2286   :  { %8126 = vmatmul.mubr.msk.f32.gmra.mrb[74].mxu1 %vm505_vm3, %v6947_v2  ;;  %8120 = vmatmul.mubr.msk.f32.gmra.mrb[92].mxu0 %vm505_vm3, %v6943_v51 }
0x2287   :  { %8136 = vmatprep.mubr.msk.f32.mxu0 %vm8963_vm4, %v8964_v34 }
0x2355   :  { %v8124_v23 = vpop.f32.mrb[72].mxu1  ;;  %v8118_v30 = vpop.f32.mrb[90].mxu0 }
0x2356   :  { %v8589_v18 = vadd.f32 %v8588_v47, %v8124_v23  ;;  %v6183_v34 = vpop.f32.mrb[73].mxu1  ;;  %v6167_v38 = vpop.f32.mrb[91].mxu0 }
0x2357   :  { %v8592_v31 = vadd.f32 %v8591_v19, %v6183_v34 }
0x2358   :  { %v6207_v24 = vmul.f32 %v8958_v21, %v8589_v18 }
0x2359   :  { %v6206_v9 = vmul.f32 %v8958_v21, %v8592_v31  ;;  %v8127_v37 = vpop.f32.mrb[74].mxu1  ;;  %v8121_v39 = vpop.f32.mrb[92].mxu0 }
0x235a   :  { %v8595_v13 = vadd.f32 %v8594_v16, %v8127_v37  ;;  %v6193_v40 = vpop.f32.mrb[75].mxu1  ;;  %v6175_v49 = vpop.f32.mrb[93].mxu0 }
0x235b   :  { %v8542_v29 = vpack.c.bf16 %v6207_v24, %v6206_v9  ;;  %v8598_v63 = vadd.f32 %v8597_v36, %v6193_v40 }
0x235c   :  { %v6209_v42 = vmul.f32 %v8958_v21, %v8595_v13 }
0x235d   :  { %v6208_v43 = vmul.f32 %v8958_v21, %v8598_v63  ;;  %8543 = vmatpush3.bf16.msra.mxu0 %v8542_v29 }
0x235e   :  { %8544 = vmatprep.subr.bf16.mxu0 %v8962_v33  ;;  %v6295_v33 = vrot.slane %v10549_v25, 6 }
0x235f   :  { %v8545_v35 = vpack.c.bf16 %v6209_v42, %v6208_v43 }
0x2361   :  { %8546 = vmatpush3.bf16.msra.mxu0 %v8545_v35 }
0x2364   :  { %8137 = vmatmul.mubr.msk.f32.vlgmr.msra.gmra.mrb[94].mxu0 %vm505_vm3, %v6964_v46 }
0x2437   :  { %v6288_v52 = vpop.f32.mrb[94].mxu0 }
0x2438   :  { %v6289_v54 = vadd.f32 %v6288_v52, %v6217_v50  ;;  %v8138_v20 = vpop.f32.mrb[95].mxu0 }
0x243a   :  { %v6292_v17 = vmul.f32 %v8958_v21, %v6289_v54 }
0x243c   :  { %v6294_v8 = vadd.f32 %v6293_v45, %v6292_v17 }
0x243e   :  { %v6297_v56 = vsel %vm81_vm0, %v6294_v8, %v6295_v33 }
0x243f   :  { %6298 = vst [vmem:[%s11041_s11] sm:$0xf] %v6297_v56 }

</bundles_post_ra>
